<compile_context>
chip_gen: v7x
topology: tpu7x:2x2x1
jax: 0.10.0
libtpu: 0.0.40
codegen_flags: <defaults>
</compile_context>

<pallas_src>
import functools
from typing import NamedTuple

import jax
import jax.numpy as jnp
from jax.experimental import pallas as pl
from jax.experimental.pallas import tpu as pltpu


class Ranges(NamedTuple):
    offset: slice
    size: slice
    objectness: slice


ALPHA = 0.25          # focal-loss alpha
GAMMA = 2             # focal-loss gamma
EPS = 1e-8            # clamp epsilon
OBJ_SCALE = 1.5       # multiplier on focal loss in forward()
SIZE_SCALE = 1.25
OFFSET_SCALE = 2.25
CLASS_SCALE = 1.0
CLASS_START = 5       # output[:, :, 5:] are class log-probs (NLLLoss semantics)


def _yolo_loss_kernel(out_ref, lab_ref, acc_ref, *, ranges):
    # out_ref / lab_ref : [B, TILE_N, C] blocks of the original [B, N, C] arrays
    # acc_ref           : [8, 128] f32 accumulator, resident across the grid
    #                     row 0 = focal partial sum, 1 = size, 2 = offset, 3 = class
    @pl.when(pl.program_id(0) == 0)
    def _init():
        acc_ref[...] = jnp.zeros_like(acc_ref)

    x = out_ref[...].astype(jnp.float32)   # cast on vregs (accept bf16 inputs)
    y = lab_ref[...].astype(jnp.float32)

    obj_lo, obj_hi = ranges.objectness.start, ranges.objectness.stop
    size_lo, size_hi = ranges.size.start, ranges.size.stop
    off_lo, off_hi = ranges.offset.start, ranges.offset.stop

    obj_x = x[:, :, obj_lo:obj_hi]         # [B, T, 1]
    obj_y = y[:, :, obj_lo:obj_hi]         # [B, T, 1]

    # ---- focal (objectness) loss ------------------------------------------
    # y_cat = [(1-a)*y, a*(1-y)], x_cat = clamp([x, 1-x]); F = -y_cat*(1-x_cat)^g*log(x_cat)
    xp = jnp.clip(obj_x, EPS, 1.0 - EPS)
    xn = jnp.clip(1.0 - obj_x, EPS, 1.0 - EPS)
    focal = (-(1.0 - ALPHA) * obj_y * (1.0 - xp) ** GAMMA * jnp.log(xp)
             - ALPHA * (1.0 - obj_y) * (1.0 - xn) ** GAMMA * jnp.log(xn))
    focal_sum = jnp.sum(focal)

    # ---- size / offset (L1, objectness-weighted) ---------------------------
    size_sum = jnp.sum(obj_y * jnp.abs(x[:, :, size_lo:size_hi]
                                       - y[:, :, size_lo:size_hi]))
    off_sum = jnp.sum(obj_y * jnp.abs(x[:, :, off_lo:off_hi]
                                      - y[:, :, off_lo:off_hi]))

    # ---- class NLL (objectness-weighted) -----------------------------------
    x_cls = x[:, :, CLASS_START:]          # [B, T, NC] (log-probs, NLLLoss style)
    y_cls = y[:, :, CLASS_START:]          # [B, T, NC]
    nc = y_cls.shape[-1]
    cls_iota = jax.lax.broadcasted_iota(jnp.int32, y_cls.shape, 2)
    m = jnp.max(y_cls, axis=2, keepdims=True)
    # first index attaining the max (torch.argmax tie-break behaviour)
    idx = jnp.min(jnp.where(y_cls == m, cls_iota, nc), axis=2, keepdims=True)
    onehot = (cls_iota == idx).astype(jnp.float32)
    nll = -jnp.sum(onehot * x_cls, axis=2, keepdims=True)     # [B, T, 1]
    cls_sum = jnp.sum(obj_y * nll)

    # ---- single full-block accumulate (1 vreg) ------------------------------
    rows = jax.lax.broadcasted_iota(jnp.int32, acc_ref.shape, 0)
    partial = (jnp.where(rows == 0, focal_sum, 0.0)
               + jnp.where(rows == 1, size_sum, 0.0)
               + jnp.where(rows == 2, off_sum, 0.0)
               + jnp.where(rows == 3, cls_sum, 0.0))
    acc_ref[...] += partial


def _pick_tile_n(batch, n, c, itemsize, budget_bytes=16 << 20):
    """Largest anchor-tile such that 2 inputs x 2 pipeline buffers fit the budget."""
    c_pad = -(-c // 128) * 128                       # lane padding of the last dim
    per_row = 2 * 2 * batch * c_pad * itemsize       # bytes per anchor row in VMEM
    max_tile = budget_bytes // max(per_row, 1)
    for t in (2048, 1024, 512, 256, 128, 64, 32, 16, 8):
        if t <= max_tile and n % t == 0:
            return t
    return n                                         # fall back: single block over N


def yolo_loss(output_bnc, label_bnc, ranges, *, tile_n=None):
    """output/label: [B, N, C] (f32 or bf16).  Returns the same 5-tuple as YoloLoss.forward."""
    B, N, C = output_bnc.shape
    assert label_bnc.shape == (B, N, C)
    itemsize = jnp.dtype(output_bnc.dtype).itemsize
    if tile_n is None:
        tile_n = _pick_tile_n(B, N, C, itemsize)
    if N % tile_n != 0:
        tile_n = N
    grid = (N // tile_n,)

    kernel = functools.partial(_yolo_loss_kernel, ranges=ranges)
    cost = pl.CostEstimate(
        flops=int(30 * B * N * C),
        transcendentals=int(2 * B * N),
        bytes_accessed=int(2 * B * N * C * itemsize + 8 * 128 * 4),
    )

    acc = pl.pallas_call(
        kernel,
        out_shape=jax.ShapeDtypeStruct((8, 128), jnp.float32),
        grid=grid,
        in_specs=[pl.BlockSpec((B, tile_n, C), lambda n: (0, n, 0)),
                  pl.BlockSpec((B, tile_n, C), lambda n: (0, n, 0))],
        out_specs=pl.BlockSpec((8, 128), lambda n: (0, 0)),
        compiler_params=pltpu.CompilerParams(
            dimension_semantics=("arbitrary",),     # output accumulates across N-tiles
            vmem_limit_bytes=32 << 20),
        cost_estimate=cost,
    )(output_bnc, label_bnc)

    # Scales folded into the 4-scalar epilogue (instead of N-wide vectors in-kernel).
    objectness_loss = OBJ_SCALE * acc[0, 0]
    size_loss = SIZE_SCALE * acc[1, 0]
    offset_loss = OFFSET_SCALE * acc[2, 0]
    class_loss = CLASS_SCALE * acc[3, 0]
    loss = objectness_loss + size_loss + offset_loss + class_loss
    b = jnp.float32(B)
    return (loss / b, objectness_loss / b, size_loss / b, offset_loss / b,
            class_loss / b)


def _reference_yolo_loss(output, label, ranges):
    """Plain-JAX reference mirroring the PyTorch forward, for validation."""
    output = output.astype(jnp.float32)
    label = label.astype(jnp.float32)
    obj_x = output[:, :, ranges.objectness]
    obj_y = label[:, :, ranges.objectness]
    xp = jnp.clip(obj_x, EPS, 1.0 - EPS)
    xn = jnp.clip(1.0 - obj_x, EPS, 1.0 - EPS)
    focal = (-(1.0 - ALPHA) * obj_y * (1.0 - xp) ** GAMMA * jnp.log(xp)
             - ALPHA * (1.0 - obj_y) * (1.0 - xn) ** GAMMA * jnp.log(xn))
    obj_l = OBJ_SCALE * jnp.sum(focal)
    size_l = SIZE_SCALE * jnp.sum(obj_y * jnp.abs(output[:, :, ranges.size]
                                                  - label[:, :, ranges.size]))
    off_l = OFFSET_SCALE * jnp.sum(obj_y * jnp.abs(output[:, :, ranges.offset]
                                                   - label[:, :, ranges.offset]))
    x_cls = output[:, :, CLASS_START:]               # [B, N, NC]
    y_cls = label[:, :, CLASS_START:]
    tgt = jnp.argmax(y_cls, axis=-1)                 # [B, N]
    nll = -jnp.take_along_axis(x_cls, tgt[..., None], axis=-1)[..., 0]
    cls_l = CLASS_SCALE * jnp.sum(obj_y[..., 0] * nll)
    B = output.shape[0]
    loss = obj_l + size_l + off_l + cls_l
    return (loss / B, obj_l / B, size_l / B, off_l / B, cls_l / B)


if __name__ == "__main__":
    # channels: [offset(0:2), size(2:4), objectness(4:5), classes(5:)]
    ranges = Ranges(offset=slice(0, 2), size=slice(2, 4), objectness=slice(4, 5))

    B, N, NC = 2, 512, 3
    C = 5 + NC

    key = jax.random.PRNGKey(0)
    k_out, k_lab = jax.random.split(key)
    # objectness predictions kept inside (0, 1) like post-sigmoid outputs
    output = jax.random.uniform(k_out, (B, N, C), jnp.float32,
                                minval=0.01, maxval=0.99)
    label = jax.random.uniform(k_lab, (B, N, C), jnp.float32,
                               minval=0.0, maxval=1.0)

    # tile_n=128 -> grid of 4 anchor tiles, exercising the resident accumulator.
    res = jax.block_until_ready(yolo_loss(output, label, ranges, tile_n=128))
    ref = jax.block_until_ready(_reference_yolo_loss(output, label, ranges))

    for a, b in zip(res, ref):
        assert jnp.allclose(a, b, rtol=1e-4, atol=1e-2), (a, b)

    print("KERNEL_OK")
</pallas_src>

<mosaic_0001>
module attributes {stable_mosaic.version = 11 : i64} {
  func.func @_yolo_loss_kernel(%arg0: i32, %arg1: memref<2x128x8xf32, #tpu.memory_space<vmem>>, %arg2: memref<2x128x8xf32, #tpu.memory_space<vmem>>, %arg3: memref<8x128xf32, #tpu.memory_space<vmem>>) attributes {dimension_semantics = [#tpu.dimension_semantics<arbitrary>], iteration_bounds = array<i64: 4>, scalar_prefetch = 0 : i64, scratch_operands = 0 : i64, tpu.core_type = #tpu.core_type<tc>, window_params = [{transform_indices = @transform_0, window_bounds = array<i64: 2, 128, 8>}, {transform_indices = @transform_1, window_bounds = array<i64: 2, 128, 8>}, {pipeline_mode = #tpu.pipeline_mode<synchronous>, transform_indices = @transform_2, window_bounds = array<i64: 8, 128>}]} {
    %c0_i32 = arith.constant 0 : i32
    %0 = arith.cmpi eq, %arg0, %c0_i32 : i32
    %1 = arith.extui %0 : i1 to i32
    %c0_i32_0 = arith.constant 0 : i32
    %2 = arith.cmpi ne, %1, %c0_i32_0 : i32
    scf.if %2 {
      %cst_33 = arith.constant 0.000000e+00 : f32
      %112 = vector.broadcast %cst_33 : f32 to vector<8x128xf32>
      %c0_34 = arith.constant 0 : index
      %c0_35 = arith.constant 0 : index
      %113 = vector.load %arg3[%c0_34, %c0_35] : memref<8x128xf32, #tpu.memory_space<vmem>>, vector<8x128xf32>
      tpu.vector_store %arg3[%c0_34, %c0_35], %112 {strides = array<i32>} : memref<8x128xf32, #tpu.memory_space<vmem>>, vector<8x128xf32>,
    } else {
    }
    %c0 = arith.constant 0 : index
    %c0_1 = arith.constant 0 : index
    %c0_2 = arith.constant 0 : index
    %3 = vector.load %arg1[%c0, %c0_1, %c0_2] : memref<2x128x8xf32, #tpu.memory_space<vmem>>, vector<2x128x8xf32>
    %c0_3 = arith.constant 0 : index
    %c0_4 = arith.constant 0 : index
    %c0_5 = arith.constant 0 : index
    %4 = vector.load %arg2[%c0_3, %c0_4, %c0_5] : memref<2x128x8xf32, #tpu.memory_space<vmem>>, vector<2x128x8xf32>
    %5 = vector.extract_strided_slice %3 {offsets = [0, 0, 4], sizes = [2, 128, 1], strides = [1, 1, 1]} : vector<2x128x8xf32> to vector<2x128x1xf32>
    %6 = vector.extract_strided_slice %4 {offsets = [0, 0, 4], sizes = [2, 128, 1], strides = [1, 1, 1]} : vector<2x128x8xf32> to vector<2x128x1xf32>
    %cst = arith.constant 9.99999993E-9 : f32
    %cst_6 = arith.constant 1.000000e+00 : f32
    %7 = vector.broadcast %cst : f32 to vector<2x128x1xf32>
    %8 = arith.maximumf %7, %5 : vector<2x128x1xf32>
    %9 = vector.broadcast %cst_6 : f32 to vector<2x128x1xf32>
    %10 = arith.minimumf %9, %8 : vector<2x128x1xf32>
    %cst_7 = arith.constant 1.000000e+00 : f32
    %11 = vector.broadcast %cst_7 : f32 to vector<2x128x1xf32>
    %12 = arith.subf %11, %5 : vector<2x128x1xf32>
    %cst_8 = arith.constant 9.99999993E-9 : f32
    %cst_9 = arith.constant 1.000000e+00 : f32
    %13 = vector.broadcast %cst_8 : f32 to vector<2x128x1xf32>
    %14 = arith.maximumf %13, %12 : vector<2x128x1xf32>
    %15 = vector.broadcast %cst_9 : f32 to vector<2x128x1xf32>
    %16 = arith.minimumf %15, %14 : vector<2x128x1xf32>
    %cst_10 = arith.constant -7.500000e-01 : f32
    %17 = vector.broadcast %cst_10 : f32 to vector<2x128x1xf32>
    %18 = arith.mulf %17, %6 : vector<2x128x1xf32>
    %cst_11 = arith.constant 1.000000e+00 : f32
    %19 = vector.broadcast %cst_11 : f32 to vector<2x128x1xf32>
    %20 = arith.subf %19, %10 : vector<2x128x1xf32>
    %21 = arith.mulf %20, %20 : vector<2x128x1xf32>
    %22 = arith.mulf %18, %21 : vector<2x128x1xf32>
    %23 = math.log %10 : vector<2x128x1xf32>
    %24 = arith.mulf %22, %23 : vector<2x128x1xf32>
    %cst_12 = arith.constant 1.000000e+00 : f32
    %25 = vector.broadcast %cst_12 : f32 to vector<2x128x1xf32>
    %26 = arith.subf %25, %6 : vector<2x128x1xf32>
    %cst_13 = arith.constant 2.500000e-01 : f32
    %27 = vector.broadcast %cst_13 : f32 to vector<2x128x1xf32>
    %28 = arith.mulf %27, %26 : vector<2x128x1xf32>
    %cst_14 = arith.constant 1.000000e+00 : f32
    %29 = vector.broadcast %cst_14 : f32 to vector<2x128x1xf32>
    %30 = arith.subf %29, %16 : vector<2x128x1xf32>
    %31 = arith.mulf %30, %30 : vector<2x128x1xf32>
    %32 = arith.mulf %28, %31 : vector<2x128x1xf32>
    %33 = math.log %16 : vector<2x128x1xf32>
    %34 = arith.mulf %32, %33 : vector<2x128x1xf32>
    %35 = arith.subf %24, %34 : vector<2x128x1xf32>
    %36 = vector.shape_cast %35 : vector<2x128x1xf32> to vector<1x2x128x1xf32>
    %cst_15 = arith.constant dense<0.000000e+00> : vector<1xf32>
    %37 = vector.multi_reduction <add>, %36, %cst_15 [1, 2, 3] : vector<1x2x128x1xf32> to vector<1xf32>
    %38 = vector.shape_cast %37 : vector<1xf32> to vector<1x1x1x1xf32>
    %39 = vector.extract %38[0, 0, 0, 0] : f32 from vector<1x1x1x1xf32>
    %40 = vector.extract_strided_slice %3 {offsets = [0, 0, 2], sizes = [2, 128, 2], strides = [1, 1, 1]} : vector<2x128x8xf32> to vector<2x128x2xf32>
    %41 = vector.extract_strided_slice %4 {offsets = [0, 0, 2], sizes = [2, 128, 2], strides = [1, 1, 1]} : vector<2x128x8xf32> to vector<2x128x2xf32>
    %42 = arith.subf %40, %41 : vector<2x128x2xf32>
    %43 = math.absf %42 : vector<2x128x2xf32>
    %44 = vector.broadcast %6 : vector<2x128x1xf32> to vector<2x128x2xf32>
    %45 = arith.mulf %44, %43 : vector<2x128x2xf32>
    %46 = vector.shape_cast %45 : vector<2x128x2xf32> to vector<1x2x128x2xf32>
    %cst_16 = arith.constant dense<0.000000e+00> : vector<1xf32>
    %47 = vector.multi_reduction <add>, %46, %cst_16 [1, 2, 3] : vector<1x2x128x2xf32> to vector<1xf32>
    %48 = vector.shape_cast %47 : vector<1xf32> to vector<1x1x1x1xf32>
    %49 = vector.extract %48[0, 0, 0, 0] : f32 from vector<1x1x1x1xf32>
    %50 = vector.extract_strided_slice %3 {offsets = [0, 0, 0], sizes = [2, 128, 2], strides = [1, 1, 1]} : vector<2x128x8xf32> to vector<2x128x2xf32>
    %51 = vector.extract_strided_slice %4 {offsets = [0, 0, 0], sizes = [2, 128, 2], strides = [1, 1, 1]} : vector<2x128x8xf32> to vector<2x128x2xf32>
    %52 = arith.subf %50, %51 : vector<2x128x2xf32>
    %53 = math.absf %52 : vector<2x128x2xf32>
    %54 = vector.broadcast %6 : vector<2x128x1xf32> to vector<2x128x2xf32>
    %55 = arith.mulf %54, %53 : vector<2x128x2xf32>
    %56 = vector.shape_cast %55 : vector<2x128x2xf32> to vector<1x2x128x2xf32>
    %cst_17 = arith.constant dense<0.000000e+00> : vector<1xf32>
    %57 = vector.multi_reduction <add>, %56, %cst_17 [1, 2, 3] : vector<1x2x128x2xf32> to vector<1xf32>
    %58 = vector.shape_cast %57 : vector<1xf32> to vector<1x1x1x1xf32>
    %59 = vector.extract %58[0, 0, 0, 0] : f32 from vector<1x1x1x1xf32>
    %60 = vector.extract_strided_slice %3 {offsets = [0, 0, 5], sizes = [2, 128, 3], strides = [1, 1, 1]} : vector<2x128x8xf32> to vector<2x128x3xf32>
    %61 = vector.extract_strided_slice %4 {offsets = [0, 0, 5], sizes = [2, 128, 3], strides = [1, 1, 1]} : vector<2x128x8xf32> to vector<2x128x3xf32>
    %62 = tpu.iota {dimensions = array<i32: 2>} : vector<2x128x3xi32>
    %cst_18 = arith.constant dense<0xFF800000> : vector<2x128xf32>
    %63 = vector.multi_reduction <maximumf>, %61, %cst_18 [2] : vector<2x128x3xf32> to vector<2x128xf32>
    %64 = vector.shape_cast %63 : vector<2x128xf32> to vector<2x128x1xf32>
    %65 = vector.broadcast %64 : vector<2x128x1xf32> to vector<2x128x3xf32>
    %66 = arith.cmpf oeq, %61, %65 : vector<2x128x3xf32>
    %c3_i32 = arith.constant 3 : i32
    %67 = vector.broadcast %c3_i32 : i32 to vector<2x128x3xi32>
    %68 = arith.select %66, %62, %67 : vector<2x128x3xi1>, vector<2x128x3xi32>
    %cst_19 = arith.constant dense<2147483647> : vector<2x128xi32>
    %69 = vector.multi_reduction <minsi>, %68, %cst_19 [2] : vector<2x128x3xi32> to vector<2x128xi32>
    %70 = vector.shape_cast %69 : vector<2x128xi32> to vector<2x128x1xi32>
    %71 = vector.broadcast %70 : vector<2x128x1xi32> to vector<2x128x3xi32>
    %72 = arith.cmpi eq, %62, %71 : vector<2x128x3xi32>
    %73 = arith.extui %72 : vector<2x128x3xi1> to vector<2x128x3xi32>
    %74 = arith.sitofp %73 : vector<2x128x3xi32> to vector<2x128x3xf32>
    %75 = arith.mulf %74, %60 : vector<2x128x3xf32>
    %cst_20 = arith.constant dense<0.000000e+00> : vector<2x128xf32>
    %76 = vector.multi_reduction <add>, %75, %cst_20 [2] : vector<2x128x3xf32> to vector<2x128xf32>
    %77 = vector.shape_cast %76 : vector<2x128xf32> to vector<2x128x1xf32>
    %cst_21 = arith.constant 0.000000e+00 : f32
    %78 = vector.broadcast %cst_21 : f32 to vector<2x128x1xf32>
    %79 = arith.subf %78, %77 : vector<2x128x1xf32>
    %80 = arith.mulf %6, %79 : vector<2x128x1xf32>
    %81 = vector.shape_cast %80 : vector<2x128x1xf32> to vector<1x2x128x1xf32>
    %cst_22 = arith.constant dense<0.000000e+00> : vector<1xf32>
    %82 = vector.multi_reduction <add>, %81, %cst_22 [1, 2, 3] : vector<1x2x128x1xf32> to vector<1xf32>
    %83 = vector.shape_cast %82 : vector<1xf32> to vector<1x1x1x1xf32>
    %84 = vector.extract %83[0, 0, 0, 0] : f32 from vector<1x1x1x1xf32>
    %85 = tpu.iota {dimensions = array<i32: 0>} : vector<8x128xi32>
    %c0_i32_23 = arith.constant 0 : i32
    %86 = vector.broadcast %c0_i32_23 : i32 to vector<8x128xi32>
    %87 = arith.cmpi eq, %85, %86 : vector<8x128xi32>
    %cst_24 = arith.constant 0.000000e+00 : f32
    %88 = vector.broadcast %39 : f32 to vector<8x128xf32>
    %89 = vector.broadcast %cst_24 : f32 to vector<8x128xf32>
    %90 = arith.select %87, %88, %89 : vector<8x128xi1>, vector<8x128xf32>
    %c1_i32 = arith.constant 1 : i32
    %91 = vector.broadcast %c1_i32 : i32 to vector<8x128xi32>
    %92 = arith.cmpi eq, %85, %91 : vector<8x128xi32>
    %cst_25 = arith.constant 0.000000e+00 : f32
    %93 = vector.broadcast %49 : f32 to vector<8x128xf32>
    %94 = vector.broadcast %cst_25 : f32 to vector<8x128xf32>
    %95 = arith.select %92, %93, %94 : vector<8x128xi1>, vector<8x128xf32>
    %96 = arith.addf %90, %95 : vector<8x128xf32>
    %c2_i32 = arith.constant 2 : i32
    %97 = vector.broadcast %c2_i32 : i32 to vector<8x128xi32>
    %98 = arith.cmpi eq, %85, %97 : vector<8x128xi32>
    %cst_26 = arith.constant 0.000000e+00 : f32
    %99 = vector.broadcast %59 : f32 to vector<8x128xf32>
    %100 = vector.broadcast %cst_26 : f32 to vector<8x128xf32>
    %101 = arith.select %98, %99, %100 : vector<8x128xi1>, vector<8x128xf32>
    %102 = arith.addf %96, %101 : vector<8x128xf32>
    %c3_i32_27 = arith.constant 3 : i32
    %103 = vector.broadcast %c3_i32_27 : i32 to vector<8x128xi32>
    %104 = arith.cmpi eq, %85, %103 : vector<8x128xi32>
    %cst_28 = arith.constant 0.000000e+00 : f32
    %105 = vector.broadcast %84 : f32 to vector<8x128xf32>
    %106 = vector.broadcast %cst_28 : f32 to vector<8x128xf32>
    %107 = arith.select %104, %105, %106 : vector<8x128xi1>, vector<8x128xf32>
    %108 = arith.addf %102, %107 : vector<8x128xf32>
    %c0_29 = arith.constant 0 : index
    %c0_30 = arith.constant 0 : index
    %109 = vector.load %arg3[%c0_29, %c0_30] : memref<8x128xf32, #tpu.memory_space<vmem>>, vector<8x128xf32>
    %110 = arith.addf %109, %108 : vector<8x128xf32>
    %c0_31 = arith.constant 0 : index
    %c0_32 = arith.constant 0 : index
    %111 = vector.load %arg3[%c0_31, %c0_32] : memref<8x128xf32, #tpu.memory_space<vmem>>, vector<8x128xf32>
    tpu.vector_store %arg3[%c0_31, %c0_32], %110 {strides = array<i32>} : memref<8x128xf32, #tpu.memory_space<vmem>>, vector<8x128xf32>,
    return
  }
  func.func @transform_0(%arg0: i32) -> (i32, i32, i32) {
    %c0_i32 = arith.constant 0 : i32
    %c0_i32_0 = arith.constant 0 : i32
    %c0_i32_1 = arith.constant 0 : i32
    return %c0_i32, %arg0, %c0_i32_0 : i32, i32, i32
  }
  func.func @transform_1(%arg0: i32) -> (i32, i32, i32) {
    %c0_i32 = arith.constant 0 : i32
    %c0_i32_0 = arith.constant 0 : i32
    %c0_i32_1 = arith.constant 0 : i32
    return %c0_i32, %arg0, %c0_i32_0 : i32, i32, i32
  }
  func.func @transform_2(%arg0: i32) -> (i32, i32) {
    %c0_i32 = arith.constant 0 : i32
    %c0_i32_0 = arith.constant 0 : i32
    %c0_i32_1 = arith.constant 0 : i32
    return %c0_i32, %c0_i32_0 : i32, i32
  }
}

</mosaic_0001>

<bundles_post_ra>
// kernel: tpu_custom_call.1
= control target key start
LH: loop header
LB: loop body
LE: loop exit
PB: predicated region body
PF: predicated region fallthrough
CT: control target
= control target key end

     0   :  { %7 = vsyncpa [#allocation5], 0  ;;  %s3720_s9 = smov 0   ;;  %s3722_s10 = smov 0   ;;  %s5510_s0 = inlined_call_operand.vmem [shape: f32[2,512,8], index: 0, kind: input, shape index: {}]   ;;  %s5511_s1 = inlined_call_operand.vmem [shape: f32[2,512,8], index: 1, kind: input, shape index: {}]   ;;  %s5512_s2 = inlined_call_operand.hbm [shape: f32[8,128], index: 2, kind: output, shape index: {}]  }
   0x1   :  { %s3724_s11 = smov 0  }
   0x2 LB: > { %s3293_s12 = sadd.s32 4294967295, %s3695_s11   ;;  %s3737_s13 = sadd.s32 1, %s3695_s11   ;;  %s3695_s11 = sphi %s3724_s11, %s5591_s11   ;;  %s3691_s10 = sphi %s3722_s10, %s5590_s10   ;;  %s3687_s9 = sphi %s3720_s9, %s5589_s9  }
   0x3   : > { %s17_s14 = ssub.s32 %s3695_s11, %s3737_s13  ;;  %s20_s15 = sadd.s32 1, %s3691_s10 }
   0x4   : > { %p18_p0 = scmp.eq.s32.totalorder %s17_s14, 0  ;;  %p27_p1 = scmp.ne.s32.totalorder %s3691_s10, %s3687_s9 }
   0x5   : > { %p28_p2 = scmp.eq.s32.totalorder %s3695_s11, 0  ;;  %p3295_p4 = scmp.ge.s32.totalorder %s3695_s11, 4 }
   0x6   : > { %s3746_s16 = scalar_select %p18_p0, %s3691_s10, %s20_s15  }
   0x7   : > { %p3748_p3 = por %p28_p2, %p27_p1  ;;  %100 = sbr.rel (%p3295_p4) target bundleno = 54 (0x36), region = 16 }
   0xe   : > { %103 = sbr.rel (!%p3748_p3) target bundleno = 34 (0x22), region = 20  ;;  %s105_s18 = sand.u32 (%p3748_p3), 1, %s3691_s10  }
   0xf   : > { %s3342_s19 = sshll.u32 (%p3748_p3), %s3695_s11, 7  ;;  %s3296_s20 = sshll.u32 (%p3748_p3), %s105_s18, 8 }
  0x10   : > { %s3760_s23 = scalar_lea.vmem (%p3748_p3), %s5510_s0, %s3342_s19  ;;  %s3765_s24 = scalar_lea.vmem (%p3748_p3), [#allocation2], %s3296_s20 }
  0x11   : > { %v200_v0 = vld [vmem:[%s3760_s23] sm:$0xff] (%p3748_p3)  ;;  %v202_v1 = vld [vmem:[%s3760_s23 + $0x8] sm:$0xff] (%p3748_p3)  ;;  %v204_v2 = vld [vmem:[%s3760_s23 + $0x10] sm:$0xff] (%p3748_p3) }
  0x12   : > { %201 = vst [vmem:[%s3765_s24] sm:$0xff] (%p3748_p3), %v200_v0  ;;  %203 = vst [vmem:[%s3765_s24 + $0x8] sm:$0xff] (%p3748_p3), %v202_v1  ;;  %v206_v3 = vld [vmem:[%s3760_s23 + $0x18] sm:$0xff] (%p3748_p3)  ;;  %v208_v4 = vld [vmem:[%s3760_s23 + $0x20] sm:$0xff] (%p3748_p3) }
  0x13   : > { %205 = vst [vmem:[%s3765_s24 + $0x10] sm:$0xff] (%p3748_p3), %v204_v2  ;;  %v210_v5 = vld [vmem:[%s3760_s23 + $0x28] sm:$0xff] (%p3748_p3)  ;;  %207 = vst [vmem:[%s3765_s24 + $0x18] sm:$0xff] (%p3748_p3), %v206_v3  ;;  %v212_v6 = vld [vmem:[%s3760_s23 + $0x30] sm:$0xff] (%p3748_p3) }
  0x14   : > { %209 = vst [vmem:[%s3765_s24 + $0x20] sm:$0xff] (%p3748_p3), %v208_v4  ;;  %211 = vst [vmem:[%s3765_s24 + $0x28] sm:$0xff] (%p3748_p3), %v210_v5  ;;  %v214_v7 = vld [vmem:[%s3760_s23 + $0x38] sm:$0xff] (%p3748_p3)  ;;  %v216_v8 = vld [vmem:[%s3760_s23 + $0x40] sm:$0xff] (%p3748_p3) }
  0x15   : > { %213 = vst [vmem:[%s3765_s24 + $0x30] sm:$0xff] %v212_v6  ;;  %215 = vst [vmem:[%s3765_s24 + $0x38] sm:$0xff] %v214_v7  ;;  %v218_v9 = vld [vmem:[%s3760_s23 + $0x48] sm:$0xff]  ;;  %v220_v10 = vld [vmem:[%s3760_s23 + $0x50] sm:$0xff] }
  0x16   : > { %217 = vst [vmem:[%s3765_s24 + $0x40] sm:$0xff] %v216_v8  ;;  %v222_v11 = vld [vmem:[%s3760_s23 + $0x58] sm:$0xff]  ;;  %219 = vst [vmem:[%s3765_s24 + $0x48] sm:$0xff] %v218_v9  ;;  %v224_v12 = vld [vmem:[%s3760_s23 + $0x60] sm:$0xff] }
  0x17   : > { %221 = vst [vmem:[%s3765_s24 + $0x50] sm:$0xff] %v220_v10  ;;  %223 = vst [vmem:[%s3765_s24 + $0x58] sm:$0xff] %v222_v11  ;;  %v226_v13 = vld [vmem:[%s3760_s23 + $0x68] sm:$0xff]  ;;  %v228_v14 = vld [vmem:[%s3760_s23 + $0x70] sm:$0xff] }
  0x18   : > { %225 = vst [vmem:[%s3765_s24 + $0x60] sm:$0xff] %v224_v12  ;;  %227 = vst [vmem:[%s3765_s24 + $0x68] sm:$0xff] %v226_v13  ;;  %v230_v15 = vld [vmem:[%s3760_s23 + $0x78] sm:$0xff]  ;;  %v232_v16 = vld [vmem:[%s3760_s23 + $0x200] sm:$0xff] }
  0x19   : > { %229 = vst [vmem:[%s3765_s24 + $0x70] sm:$0xff] %v228_v14  ;;  %v234_v17 = vld [vmem:[%s3760_s23 + $0x208] sm:$0xff]  ;;  %231 = vst [vmem:[%s3765_s24 + $0x78] sm:$0xff] %v230_v15  ;;  %v236_v18 = vld [vmem:[%s3760_s23 + $0x210] sm:$0xff] }
  0x1a   : > { %233 = vst [vmem:[%s3765_s24 + $0x80] sm:$0xff] %v232_v16  ;;  %235 = vst [vmem:[%s3765_s24 + $0x88] sm:$0xff] %v234_v17  ;;  %v238_v19 = vld [vmem:[%s3760_s23 + $0x218] sm:$0xff]  ;;  %v240_v20 = vld [vmem:[%s3760_s23 + $0x220] sm:$0xff] }
  0x1b   : > { %237 = vst [vmem:[%s3765_s24 + $0x90] sm:$0xff] %v236_v18  ;;  %239 = vst [vmem:[%s3765_s24 + $0x98] sm:$0xff] %v238_v19  ;;  %v242_v21 = vld [vmem:[%s3760_s23 + $0x228] sm:$0xff]  ;;  %v244_v22 = vld [vmem:[%s3760_s23 + $0x230] sm:$0xff] }
  0x1c   : > { %241 = vst [vmem:[%s3765_s24 + $0xa0] sm:$0xff] %v240_v20  ;;  %v246_v23 = vld [vmem:[%s3760_s23 + $0x238] sm:$0xff]  ;;  %243 = vst [vmem:[%s3765_s24 + $0xa8] sm:$0xff] %v242_v21  ;;  %v248_v24 = vld [vmem:[%s3760_s23 + $0x240] sm:$0xff] }
  0x1d   : > { %245 = vst [vmem:[%s3765_s24 + $0xb0] sm:$0xff] %v244_v22  ;;  %247 = vst [vmem:[%s3765_s24 + $0xb8] sm:$0xff] %v246_v23  ;;  %v250_v25 = vld [vmem:[%s3760_s23 + $0x248] sm:$0xff]  ;;  %v252_v26 = vld [vmem:[%s3760_s23 + $0x250] sm:$0xff] }
  0x1e   : > { %249 = vst [vmem:[%s3765_s24 + $0xc0] sm:$0xff] %v248_v24  ;;  %251 = vst [vmem:[%s3765_s24 + $0xc8] sm:$0xff] %v250_v25  ;;  %v254_v27 = vld [vmem:[%s3760_s23 + $0x258] sm:$0xff]  ;;  %v256_v28 = vld [vmem:[%s3760_s23 + $0x260] sm:$0xff] }
  0x1f   : > { %253 = vst [vmem:[%s3765_s24 + $0xd0] sm:$0xff] %v252_v26  ;;  %v258_v29 = vld [vmem:[%s3760_s23 + $0x268] sm:$0xff]  ;;  %255 = vst [vmem:[%s3765_s24 + $0xd8] sm:$0xff] %v254_v27  ;;  %v260_v30 = vld [vmem:[%s3760_s23 + $0x270] sm:$0xff] }
  0x20   : > { %257 = vst [vmem:[%s3765_s24 + $0xe0] sm:$0xff] %v256_v28  ;;  %259 = vst [vmem:[%s3765_s24 + $0xe8] sm:$0xff] %v258_v29  ;;  %v262_v31 = vld [vmem:[%s3760_s23 + $0x278] sm:$0xff] }
  0x21   : > { %261 = vst [vmem:[%s3765_s24 + $0xf0] sm:$0xff] %v260_v30  ;;  %263 = vst [vmem:[%s3765_s24 + $0xf8] sm:$0xff] %v262_v31 }
  0x22 PF: > { %269 = sbr.rel (!%p3748_p3) target bundleno = 54 (0x36), region = 58  ;;  %s271_s25 = sand.u32 (%p3748_p3), 1, %s3691_s10  }
  0x23   : > { %s3343_s26 = sshll.u32 (%p3748_p3), %s3695_s11, 7  ;;  %s3299_s27 = sshll.u32 (%p3748_p3), %s271_s25, 8 }
  0x24   : > { %s3835_s30 = scalar_lea.vmem (%p3748_p3), %s5511_s1, %s3343_s26  ;;  %s3840_s3 = scalar_lea.vmem (%p3748_p3), [#allocation3], %s3299_s27 }
  0x25   : > { %v366_v32 = vld [vmem:[%s3835_s30] sm:$0xff] (%p3748_p3)  ;;  %v368_v33 = vld [vmem:[%s3835_s30 + $0x8] sm:$0xff] (%p3748_p3)  ;;  %v370_v34 = vld [vmem:[%s3835_s30 + $0x10] sm:$0xff] (%p3748_p3) }
  0x26   : > { %367 = vst [vmem:[%s3840_s3] sm:$0xff] (%p3748_p3), %v366_v32  ;;  %369 = vst [vmem:[%s3840_s3 + $0x8] sm:$0xff] (%p3748_p3), %v368_v33  ;;  %v372_v35 = vld [vmem:[%s3835_s30 + $0x18] sm:$0xff] (%p3748_p3)  ;;  %v374_v36 = vld [vmem:[%s3835_s30 + $0x20] sm:$0xff] (%p3748_p3) }
  0x27   : > { %371 = vst [vmem:[%s3840_s3 + $0x10] sm:$0xff] (%p3748_p3), %v370_v34  ;;  %v376_v37 = vld [vmem:[%s3835_s30 + $0x28] sm:$0xff] (%p3748_p3)  ;;  %373 = vst [vmem:[%s3840_s3 + $0x18] sm:$0xff] (%p3748_p3), %v372_v35  ;;  %v378_v38 = vld [vmem:[%s3835_s30 + $0x30] sm:$0xff] (%p3748_p3) }
  0x28   : > { %375 = vst [vmem:[%s3840_s3 + $0x20] sm:$0xff] (%p3748_p3), %v374_v36  ;;  %377 = vst [vmem:[%s3840_s3 + $0x28] sm:$0xff] (%p3748_p3), %v376_v37  ;;  %v380_v39 = vld [vmem:[%s3835_s30 + $0x38] sm:$0xff] (%p3748_p3)  ;;  %v382_v40 = vld [vmem:[%s3835_s30 + $0x40] sm:$0xff] (%p3748_p3) }
  0x29   : > { %379 = vst [vmem:[%s3840_s3 + $0x30] sm:$0xff] %v378_v38  ;;  %381 = vst [vmem:[%s3840_s3 + $0x38] sm:$0xff] %v380_v39  ;;  %v384_v41 = vld [vmem:[%s3835_s30 + $0x48] sm:$0xff]  ;;  %v386_v42 = vld [vmem:[%s3835_s30 + $0x50] sm:$0xff] }
  0x2a   : > { %383 = vst [vmem:[%s3840_s3 + $0x40] sm:$0xff] %v382_v40  ;;  %v388_v43 = vld [vmem:[%s3835_s30 + $0x58] sm:$0xff]  ;;  %385 = vst [vmem:[%s3840_s3 + $0x48] sm:$0xff] %v384_v41  ;;  %v390_v44 = vld [vmem:[%s3835_s30 + $0x60] sm:$0xff] }
  0x2b   : > { %387 = vst [vmem:[%s3840_s3 + $0x50] sm:$0xff] %v386_v42  ;;  %389 = vst [vmem:[%s3840_s3 + $0x58] sm:$0xff] %v388_v43  ;;  %v392_v45 = vld [vmem:[%s3835_s30 + $0x68] sm:$0xff]  ;;  %v394_v46 = vld [vmem:[%s3835_s30 + $0x70] sm:$0xff] }
  0x2c   : > { %391 = vst [vmem:[%s3840_s3 + $0x60] sm:$0xff] %v390_v44  ;;  %393 = vst [vmem:[%s3840_s3 + $0x68] sm:$0xff] %v392_v45  ;;  %v396_v47 = vld [vmem:[%s3835_s30 + $0x78] sm:$0xff]  ;;  %v398_v48 = vld [vmem:[%s3835_s30 + $0x200] sm:$0xff] }
  0x2d   : > { %395 = vst [vmem:[%s3840_s3 + $0x70] sm:$0xff] %v394_v46  ;;  %v400_v49 = vld [vmem:[%s3835_s30 + $0x208] sm:$0xff]  ;;  %397 = vst [vmem:[%s3840_s3 + $0x78] sm:$0xff] %v396_v47  ;;  %v402_v50 = vld [vmem:[%s3835_s30 + $0x210] sm:$0xff] }
  0x2e   : > { %399 = vst [vmem:[%s3840_s3 + $0x80] sm:$0xff] %v398_v48  ;;  %401 = vst [vmem:[%s3840_s3 + $0x88] sm:$0xff] %v400_v49  ;;  %v404_v51 = vld [vmem:[%s3835_s30 + $0x218] sm:$0xff]  ;;  %v406_v52 = vld [vmem:[%s3835_s30 + $0x220] sm:$0xff] }
  0x2f   : > { %403 = vst [vmem:[%s3840_s3 + $0x90] sm:$0xff] %v402_v50  ;;  %405 = vst [vmem:[%s3840_s3 + $0x98] sm:$0xff] %v404_v51  ;;  %v408_v53 = vld [vmem:[%s3835_s30 + $0x228] sm:$0xff]  ;;  %v410_v54 = vld [vmem:[%s3835_s30 + $0x230] sm:$0xff] }
  0x30   : > { %407 = vst [vmem:[%s3840_s3 + $0xa0] sm:$0xff] %v406_v52  ;;  %v412_v55 = vld [vmem:[%s3835_s30 + $0x238] sm:$0xff]  ;;  %409 = vst [vmem:[%s3840_s3 + $0xa8] sm:$0xff] %v408_v53  ;;  %v414_v56 = vld [vmem:[%s3835_s30 + $0x240] sm:$0xff] }
  0x31   : > { %411 = vst [vmem:[%s3840_s3 + $0xb0] sm:$0xff] %v410_v54  ;;  %413 = vst [vmem:[%s3840_s3 + $0xb8] sm:$0xff] %v412_v55  ;;  %v416_v57 = vld [vmem:[%s3835_s30 + $0x248] sm:$0xff]  ;;  %v418_v58 = vld [vmem:[%s3835_s30 + $0x250] sm:$0xff] }
  0x32   : > { %415 = vst [vmem:[%s3840_s3 + $0xc0] sm:$0xff] %v414_v56  ;;  %417 = vst [vmem:[%s3840_s3 + $0xc8] sm:$0xff] %v416_v57  ;;  %v420_v59 = vld [vmem:[%s3835_s30 + $0x258] sm:$0xff]  ;;  %v422_v60 = vld [vmem:[%s3835_s30 + $0x260] sm:$0xff] }
  0x33   : > { %419 = vst [vmem:[%s3840_s3 + $0xd0] sm:$0xff] %v418_v58  ;;  %v424_v61 = vld [vmem:[%s3835_s30 + $0x268] sm:$0xff]  ;;  %421 = vst [vmem:[%s3840_s3 + $0xd8] sm:$0xff] %v420_v59  ;;  %v426_v62 = vld [vmem:[%s3835_s30 + $0x270] sm:$0xff] }
  0x34   : > { %423 = vst [vmem:[%s3840_s3 + $0xe0] sm:$0xff] %v422_v60  ;;  %425 = vst [vmem:[%s3840_s3 + $0xe8] sm:$0xff] %v424_v61  ;;  %v428_v63 = vld [vmem:[%s3835_s30 + $0x278] sm:$0xff] }
  0x35   : > { %427 = vst [vmem:[%s3840_s3 + $0xf0] sm:$0xff] %v426_v62  ;;  %429 = vst [vmem:[%s3840_s3 + $0xf8] sm:$0xff] %v428_v63 }
  0x36 PF: > { %p3302_p5 = scmp.ge.s32.totalorder %s3695_s11, 1  ;;  %p434_p6 = scmp.lt.s32.totalorder %s3695_s11, 5 }
  0x38   : > { %p435_p7 = pnand %p3302_p5, %p434_p6 }
  0x3a   : > { %438 = sbr.rel (%p435_p7) target bundleno = 1598 (0x63e), region = 96 }
  0x41   : > { %s441_s4 = sand.u32 1, %s3687_s9   ;;  %p3305_p8 = scmp.ne.s32.totalorder %s3293_s12, 0 }
  0x42   : > { %s3303_s5 = sshll.u32 %s441_s4, 8  ;;  %v3697_v0 = vmov (!%p3305_p8), 0.0  }
  0x43   : > { %s3906_s6 = scalar_lea.vmem [#allocation2], %s3303_s5  ;;  %s3908_s7 = scalar_lea.vmem [#allocation3], %s3303_s5  ;;  %474 = vst [vmem:[#allocation4] sm:$0xff] (!%p3305_p8), %v3697_v0 }
  0x44   : > { %473 = sbr.rel (%p3305_p8) target bundleno = 75 (0x4b), region = 108 }
  0x4b PF: > { %v477_v1 = vld [vmem:[%s3906_s6 + $0x10] sm:$0xff]  ;;  %v475_v3 = vld [vmem:[%s3906_s6] sm:$0xff]  ;;  %v478_v11 = vld [vmem:[%s3906_s6 + $0x18] sm:$0xff]  ;;  %s3698_s8 = smov 124   ;;  %vm1339_vm0 = vcmask 7168   ;;  %vm1943_vm1 = vcmask 64552  }
  0x4c   : > { %v509_v2 = vld [vmem:[%s3908_s7 + $0x10] sm:$0xff]  ;;  %v541_v4 = vmax.f32 %v477_v1, 1e-08  ;;  %v605_v5 = vsub.f32 1.0, %v477_v1  ;;  %v507_v6 = vld [vmem:[%s3908_s7] sm:$0xff]  ;;  %v603_v10 = vsub.f32 1.0, %v475_v3 }
  0x4d   : > { %v701_v7 = vmul.f32 -0.75, %v509_v2  ;;  %v925_v8 = vsub.f32 1.0, %v509_v2  ;;  %v539_v9 = vmax.f32 %v475_v3, 1e-08  ;;  %v699_v14 = vmul.f32 -0.75, %v507_v6  ;;  %v510_v28 = vld [vmem:[%s3908_s7 + $0x18] sm:$0xff] }
  0x4e   : > { %v573_v12 = vmin.f32 %v541_v4, 1.0  ;;  %v637_v13 = vmax.f32 %v605_v5, 1e-08  ;;  %v606_v15 = vsub.f32 1.0, %v478_v11  ;;  %v635_v17 = vmax.f32 %v603_v10, 1e-08 }
  0x4f   : > { %v571_v16 = vmin.f32 %v539_v9, 1.0  ;;  %v923_v18 = vsub.f32 1.0, %v507_v6  ;;  %v542_v19 = vmax.f32 %v478_v11, 1e-08  ;;  %v957_v30 = vmul.f32 0.25, %v925_v8  ;;  %v476_v36 = vld [vmem:[%s3906_s6 + $0x8] sm:$0xff] }
  0x50   : > { %v669_v20 = vmin.f32 %v637_v13, 1.0  ;;  %v733_v21 = vsub.f32 1.0, %v573_v12  ;;  %3392 = vlog2.f32 %v573_v12  ;;  %v638_v22 = vmax.f32 %v606_v15, 1e-08  ;;  %v508_v41 = vld [vmem:[%s3908_s7 + $0x8] sm:$0xff]  ;;  %s3699_s9 = smov 5  }
  0x51   : > { %v667_v23 = vmin.f32 %v635_v17, 1.0  ;;  %v731_v24 = vsub.f32 1.0, %v571_v16  ;;  %3394 = vlog2.f32 %v571_v16  ;;  %v574_v25 = vmin.f32 %v542_v19, 1.0  ;;  %v480_v45 = vld [vmem:[%s3906_s6 + $0x28] sm:$0xff]  ;;  %s3700_s14 = smov 123   ;;  %s3703_s15 = smov 126  }
  0x52   : > { %v765_v26 = vmul.f32 %v733_v21, %v733_v21  ;;  %v989_v27 = vsub.f32 1.0, %v669_v20  ;;  %3396 = vlog2.f32 %v669_v20  ;;  %v670_v29 = vmin.f32 %v638_v22, 1.0  ;;  %v512_v56 = vld [vmem:[%s3908_s7 + $0x28] sm:$0xff]  ;;  %s3704_s21 = smov [#allocation4]   ;;  %p5474_p9 = scmp.eq.s32.totalorder %s3293_s12, 3 }
  0x53   : > { %v763_v31 = vmul.f32 %v731_v24, %v731_v24  ;;  %v987_v32 = vsub.f32 1.0, %v667_v23  ;;  %3398 = vlog2.f32 %v667_v23  ;;  %v955_v34 = vmul.f32 0.25, %v923_v18  ;;  %v479_v18 = vld [vmem:[%s3906_s6 + $0x20] sm:$0xff]  ;;  %s3230_s22 = sshll.u32 %s3704_s21, 4  ;;  %s3231_s22 = int_to_ptr.vmem [resolvable:$true] %s3230_s22 }
  0x54   : > { %v1021_v33 = vmul.f32 %v989_v27, %v989_v27  ;;  %v734_v35 = vsub.f32 1.0, %v574_v25  ;;  %3400 = vlog2.f32 %v574_v25  ;;  %v702_v38 = vmul.f32 -0.75, %v510_v28  ;;  %s3643_s24 = scalar_lea.vmem %s3231_s22, 128  ;;  %p3650_p13 = scmp.lt.s32.totalorder %s3231_s22, %s3231_s22 }
  0x55   : > { %v1019_v37 = vmul.f32 %v987_v32, %v987_v32  ;;  %v926_v39 = vsub.f32 1.0, %v510_v28  ;;  %v990_v40 = vsub.f32 1.0, %v670_v29  ;;  %v797_v42 = vmul.f32 %v765_v26, %v701_v7  ;;  %p3644_p10 = scmp.ne.s32.totalorder %s3231_s22, %s3643_s24  ;;  %p3651_p0 = scmp.lt.s32.totalorder %s3643_s24, %s3643_s24 }
  0x56   : > { %v766_v43 = vmul.f32 %v734_v35, %v734_v35  ;;  %3402 = vlog2.f32 %v670_v29  ;;  %v540_v44 = vmax.f32 %v476_v36, 1e-08  ;;  %v795_v46 = vmul.f32 %v763_v31, %v699_v14 }
  0x57   : > { %v958_v47 = vmul.f32 0.25, %v926_v39  ;;  %v1022_v48 = vmul.f32 %v990_v40, %v990_v40  ;;  %v604_v49 = vsub.f32 1.0, %v476_v36  ;;  %v1053_v50 = vmul.f32 %v1021_v33, %v957_v30  ;;  %v511_v36 = vld [vmem:[%s3908_s7 + $0x20] sm:$0xff]  ;;  %v482_v39 = vld [vmem:[%s3906_s6 + $0x38] sm:$0xff]  ;;  %p3645_p11 = pnand %p3644_p10, %p5474_p9  ;;  %p3652_p1 = por %p3651_p0, %p3650_p13 }
  0x58   : > { %v1051_v51 = vmul.f32 %v1019_v37, %v955_v34  ;;  %v572_v52 = vmin.f32 %v540_v44, 1.0  ;;  %v924_v53 = vsub.f32 1.0, %v508_v41  ;;  %v798_v54 = vmul.f32 %v766_v43, %v702_v38 }
  0x59   : > { %v636_v55 = vmax.f32 %v604_v49, 1e-08  ;;  %v544_v57 = vmax.f32 %v480_v45, 1e-08  ;;  %v608_v58 = vsub.f32 1.0, %v480_v45  ;;  %v1054_v60 = vmul.f32 %v1022_v48, %v958_v47  ;;  %p3646_p12 = pneg %p3645_p11 }
  0x5a   : > { %v3393_v59 = vpop.eup %3392  ;;  %v700_v61 = vmul.f32 -0.75, %v508_v41  ;;  %v732_v62 = vsub.f32 1.0, %v572_v52  ;;  %3404 = vlog2.f32 %v572_v52  ;;  %v956_v2 = vmul.f32 0.25, %v924_v53 }
  0x5b   : > { %v3395_v63 = vpop.eup %3394  ;;  %v832_v0 = vmul.f32 0.6931472, %v3393_v59  ;;  %v668_v1 = vmin.f32 %v636_v55, 1.0  ;;  %v640_v3 = vmax.f32 %v608_v58, 1e-08  ;;  %v576_v6 = vmin.f32 %v544_v57, 1.0  ;;  %p3653_p2 = pnand %p3652_p1, %p3646_p12 }
  0x5c   : > { %v3397_v4 = vpop.eup %3396  ;;  %v828_v5 = vmul.f32 0.6931472, %v3395_v63  ;;  %v704_v7 = vmul.f32 -0.75, %v512_v56  ;;  %v928_v8 = vsub.f32 1.0, %v512_v56  ;;  %v764_v16 = vmul.f32 %v732_v62, %v732_v62 }
  0x5d   : > { %v3399_v9 = vpop.eup %3398  ;;  %v893_v10 = vmul.f32 %v832_v0, %v797_v42  ;;  %v1088_v11 = vmul.f32 0.6931472, %v3397_v4  ;;  %v988_v12 = vsub.f32 1.0, %v668_v1  ;;  %3406 = vlog2.f32 %v668_v1 }
  0x5e   : > { %v3401_v13 = vpop.eup %3400  ;;  %v891_v14 = vmul.f32 %v828_v5, %v795_v46  ;;  %v1084_v15 = vmul.f32 0.6931472, %v3399_v9  ;;  %v672_v17 = vmin.f32 %v640_v3, 1.0  ;;  %v736_v21 = vsub.f32 1.0, %v576_v6  ;;  %v513_v9 = vld [vmem:[%s3908_s7 + $0x30] sm:$0xff] }
  0x5f   : > { %v1149_v19 = vmul.f32 %v1088_v11, %v1053_v50  ;;  %v834_v20 = vmul.f32 0.6931472, %v3401_v13  ;;  %v543_v22 = vmax.f32 %v479_v18, 1e-08  ;;  %v1020_v25 = vmul.f32 %v988_v12, %v988_v12  ;;  %v514_v50 = vld [vmem:[%s3908_s7 + $0x38] sm:$0xff] }
  0x60   : > { %v3403_v23 = vpop.eup %3402  ;;  %v1147_v24 = vmul.f32 %v1084_v15, %v1051_v51  ;;  %3408 = vlog2.f32 %v576_v6  ;;  %v992_v26 = vsub.f32 1.0, %v672_v17  ;;  %v960_v30 = vmul.f32 0.25, %v928_v8 }
  0x61   : > { %v1181_v27 = vsub.f32 %v893_v10, %v1149_v19  ;;  %v894_v28 = vmul.f32 %v834_v20, %v798_v54  ;;  %v1090_v29 = vmul.f32 0.6931472, %v3403_v23  ;;  %v768_v32 = vmul.f32 %v736_v21, %v736_v21  ;;  %v484_v19 = vld [vmem:[%s3906_s6 + $0x48] sm:$0xff] }
  0x62   : > { %v1179_v31 = vsub.f32 %v891_v14, %v1147_v24  ;;  %v1024_v33 = vmul.f32 %v992_v26, %v992_v26  ;;  %3410 = vlog2.f32 %v672_v17  ;;  %v796_v35 = vmul.f32 %v764_v16, %v700_v61  ;;  %v481_v61 = vld [vmem:[%s3906_s6 + $0x30] sm:$0xff] }
  0x63   : > { %1247 = vrot.lane.b32.xlu1 %v1181_v27, %s3698_s8  ;;  %v1150_v34 = vmul.f32 %v1090_v29, %v1054_v60  ;;  %v575_v37 = vmin.f32 %v543_v22, 1.0  ;;  %v607_v38 = vsub.f32 1.0, %v479_v18  ;;  %v1052_v41 = vmul.f32 %v1020_v25, %v956_v2 }
  0x64   : > { %v3405_v40 = vpop.eup %3404  ;;  %1243 = vrot.lane.b32.xlu0 %v1179_v31, %s3698_s8  ;;  %v800_v42 = vmul.f32 %v768_v32, %v704_v7  ;;  %v703_v43 = vmul.f32 -0.75, %v511_v36  ;;  %v546_v44 = vmax.f32 %v482_v39, 1e-08  ;;  %v1056_v49 = vmul.f32 %v1024_v33, %v960_v30 }
  0x65   : > { %v1182_v45 = vsub.f32 %v894_v28, %v1150_v34  ;;  %v830_v46 = vmul.f32 0.6931472, %v3405_v40  ;;  %v639_v47 = vmax.f32 %v607_v38, 1e-08  ;;  %v735_v48 = vsub.f32 1.0, %v575_v37 }
  0x66   : > { %3412 = vlog2.f32 %v575_v37  ;;  %v578_v51 = vmin.f32 %v546_v44, 1.0  ;;  %v610_v52 = vsub.f32 1.0, %v482_v39  ;;  %v927_v57 = vsub.f32 1.0, %v511_v36  ;;  %v516_v39 = vld [vmem:[%s3908_s7 + $0x48] sm:$0xff] }
  0x67   : > { %v3407_v53 = vpop.eup %3406  ;;  %1249 = vrot.lane.b32.xlu1 %v1182_v45, %s3698_s8  ;;  %v892_v54 = vmul.f32 %v830_v46, %v796_v35  ;;  %v671_v55 = vmin.f32 %v639_v47, 1.0  ;;  %v767_v56 = vmul.f32 %v735_v48, %v735_v48  ;;  %v706_v63 = vmul.f32 -0.75, %v514_v50 }
  0x68   : > { %v1086_v58 = vmul.f32 0.6931472, %v3407_v53  ;;  %v642_v59 = vmax.f32 %v610_v52, 1e-08  ;;  %v738_v60 = vsub.f32 1.0, %v578_v51  ;;  %3414 = vlog2.f32 %v578_v51 }
  0x69   : > { %v991_v62 = vsub.f32 1.0, %v671_v55  ;;  %3416 = vlog2.f32 %v671_v55  ;;  %v930_v0 = vsub.f32 1.0, %v514_v50  ;;  %v545_v5 = vmax.f32 %v481_v61, 1e-08 }
  0x6a   : > { %v3409_v1 = vpop.eup %3408  ;;  %v1148_v2 = vmul.f32 %v1086_v58, %v1052_v41  ;;  %v674_v3 = vmin.f32 %v642_v59, 1.0  ;;  %v770_v4 = vmul.f32 %v738_v60, %v738_v60  ;;  %v799_v7 = vmul.f32 %v767_v56, %v703_v43  ;;  %v515_v58 = vld [vmem:[%s3908_s7 + $0x40] sm:$0xff] }
  0x6b   : > { %v838_v6 = vmul.f32 0.6931472, %v3409_v1  ;;  %v959_v8 = vmul.f32 0.25, %v927_v57  ;;  %v609_v10 = vsub.f32 1.0, %v481_v61  ;;  %v1023_v13 = vmul.f32 %v991_v62, %v991_v62 }
  0x6c   : > { %v3411_v11 = vpop.eup %3410  ;;  %v1180_v12 = vsub.f32 %v892_v54, %v1148_v2  ;;  %v994_v14 = vsub.f32 1.0, %v674_v3  ;;  %3418 = vlog2.f32 %v674_v3  ;;  %v962_v17 = vmul.f32 0.25, %v930_v0  ;;  %v486_v3 = vld [vmem:[%s3906_s6 + $0x58] sm:$0xff] }
  0x6d   : > { %v896_v15 = vmul.f32 %v838_v6, %v800_v42  ;;  %v1094_v16 = vmul.f32 0.6931472, %v3411_v11  ;;  %v577_v18 = vmin.f32 %v545_v5, 1.0  ;;  %v802_v20 = vmul.f32 %v770_v4, %v706_v63 }
  0x6e   : > { %1245 = vrot.lane.b32.xlu0 %v1180_v12, %s3698_s8  ;;  %v1026_v21 = vmul.f32 %v994_v14, %v994_v14  ;;  %v641_v22 = vmax.f32 %v609_v10, 1e-08  ;;  %v929_v23 = vsub.f32 1.0, %v513_v9  ;;  %v548_v26 = vmax.f32 %v484_v19, 1e-08 }
  0x6f   : > { %v1152_v24 = vmul.f32 %v1094_v16, %v1056_v49  ;;  %v737_v25 = vsub.f32 1.0, %v577_v18  ;;  %3420 = vlog2.f32 %v577_v18  ;;  %v1055_v28 = vmul.f32 %v1023_v13, %v959_v8  ;;  %v483_v49 = vld [vmem:[%s3906_s6 + $0x40] sm:$0xff]  ;;  %v518_v8 = vld [vmem:[%s3908_s7 + $0x58] sm:$0xff] }
  0x70   : > { %v3413_v27 = vpop.eup %3412  ;;  %v673_v29 = vmin.f32 %v641_v22, 1.0  ;;  %v705_v30 = vmul.f32 -0.75, %v513_v9  ;;  %v612_v31 = vsub.f32 1.0, %v484_v19  ;;  %v580_v35 = vmin.f32 %v548_v26, 1.0  ;;  %v485_v26 = vld [vmem:[%s3906_s6 + $0x50] sm:$0xff] }
  0x71   : > { %v1184_v32 = vsub.f32 %v896_v15, %v1152_v24  ;;  %v836_v33 = vmul.f32 0.6931472, %v3413_v27  ;;  %v769_v34 = vmul.f32 %v737_v25, %v737_v25  ;;  %v1058_v37 = vmul.f32 %v1026_v21, %v962_v17 }
  0x72   : > { %v3415_v36 = vpop.eup %3414  ;;  %v993_v38 = vsub.f32 1.0, %v673_v29  ;;  %3422 = vlog2.f32 %v673_v29  ;;  %v644_v40 = vmax.f32 %v612_v31, 1e-08  ;;  %v961_v44 = vmul.f32 0.25, %v929_v23 }
  0x73   : > { %v3417_v41 = vpop.eup %3416  ;;  %1253 = vrot.lane.b32.xlu1 %v1184_v32, %s3698_s8  ;;  %v895_v42 = vmul.f32 %v836_v33, %v799_v7  ;;  %v842_v43 = vmul.f32 0.6931472, %v3415_v36  ;;  %v740_v45 = vsub.f32 1.0, %v580_v35  ;;  %3424 = vlog2.f32 %v580_v35 }
  0x74   : > { %v1092_v46 = vmul.f32 0.6931472, %v3417_v41  ;;  %v1025_v47 = vmul.f32 %v993_v38, %v993_v38  ;;  %v676_v48 = vmin.f32 %v644_v40, 1.0  ;;  %v801_v50 = vmul.f32 %v769_v34, %v705_v30 }
  0x75   : > { %v708_v51 = vmul.f32 -0.75, %v516_v39  ;;  %v932_v52 = vsub.f32 1.0, %v516_v39  ;;  %v547_v53 = vmax.f32 %v483_v49, 1e-08  ;;  %v772_v56 = vmul.f32 %v740_v45, %v740_v45 }
  0x76   : > { %v3419_v54 = vpop.eup %3418  ;;  %v1151_v55 = vmul.f32 %v1092_v46, %v1055_v28  ;;  %v996_v57 = vsub.f32 1.0, %v676_v48  ;;  %3426 = vlog2.f32 %v676_v48  ;;  %v898_v59 = vmul.f32 %v842_v43, %v802_v20  ;;  %v517_v43 = vld [vmem:[%s3908_s7 + $0x50] sm:$0xff] }
  0x77   : > { %v1098_v60 = vmul.f32 0.6931472, %v3419_v54  ;;  %v964_v61 = vmul.f32 0.25, %v932_v52  ;;  %v579_v62 = vmin.f32 %v547_v53, 1.0  ;;  %v1057_v0 = vmul.f32 %v1025_v47, %v961_v44  ;;  %v488_v52 = vld [vmem:[%s3906_s6 + $0x68] sm:$0xff] }
  0x78   : > { %v1183_v63 = vsub.f32 %v895_v42, %v1151_v55  ;;  %v1028_v1 = vmul.f32 %v996_v57, %v996_v57  ;;  %v611_v2 = vsub.f32 1.0, %v483_v49  ;;  %v931_v7 = vsub.f32 1.0, %v515_v58 }
  0x79   : > { %v3421_v4 = vpop.eup %3420  ;;  %v1154_v5 = vmul.f32 %v1098_v60, %v1058_v37  ;;  %v739_v6 = vsub.f32 1.0, %v579_v62  ;;  %3428 = vlog2.f32 %v579_v62  ;;  %v804_v10 = vmul.f32 %v772_v56, %v708_v51  ;;  %v520_v56 = vld [vmem:[%s3908_s7 + $0x68] sm:$0xff] }
  0x7a   : > { %1251 = vrot.lane.b32.xlu0 %v1183_v63, %s3698_s8  ;;  %v840_v9 = vmul.f32 0.6931472, %v3421_v4  ;;  %v643_v11 = vmax.f32 %v611_v2, 1e-08  ;;  %v550_v12 = vmax.f32 %v486_v3, 1e-08  ;;  %v1060_v14 = vmul.f32 %v1028_v1, %v964_v61 }
  0x7b   : > { %v1186_v13 = vsub.f32 %v898_v59, %v1154_v5  ;;  %v707_v15 = vmul.f32 -0.75, %v515_v58  ;;  %v614_v16 = vsub.f32 1.0, %v486_v3  ;;  %v771_v19 = vmul.f32 %v739_v6, %v739_v6  ;;  %v487_v5 = vld [vmem:[%s3906_s6 + $0x60] sm:$0xff] }
  0x7c   : > { %v3423_v17 = vpop.eup %3422  ;;  %v675_v18 = vmin.f32 %v643_v11, 1.0  ;;  %v963_v20 = vmul.f32 0.25, %v931_v7  ;;  %v582_v21 = vmin.f32 %v550_v12, 1.0  ;;  %v897_v22 = vmul.f32 %v840_v9, %v801_v50 }
  0x7d   : > { %1257 = vrot.lane.b32.xlu1 %v1186_v13, %s3698_s8  ;;  %v1096_v23 = vmul.f32 0.6931472, %v3423_v17  ;;  %v646_v24 = vmax.f32 %v614_v16, 1e-08  ;;  %v934_v25 = vsub.f32 1.0, %v518_v8  ;;  %v3425_v27 = vpop.eup %3424  ;;  %v803_v35 = vmul.f32 %v771_v19, %v707_v15 }
  0x7e   : > { %v995_v28 = vsub.f32 1.0, %v675_v18  ;;  %3430 = vlog2.f32 %v675_v18  ;;  %v742_v29 = vsub.f32 1.0, %v582_v21  ;;  %v549_v30 = vmax.f32 %v485_v26, 1e-08 }
  0x7f   : > { %v1153_v31 = vmul.f32 %v1096_v23, %v1057_v0  ;;  %v846_v32 = vmul.f32 0.6931472, %v3425_v27  ;;  %v678_v33 = vmin.f32 %v646_v24, 1.0  ;;  %3432 = vlog2.f32 %v582_v21  ;;  %v519_v21 = vld [vmem:[%s3908_s7 + $0x60] sm:$0xff] }
  0x80   : > { %v3427_v34 = vpop.eup %3426  ;;  %v1027_v36 = vmul.f32 %v995_v28, %v995_v28  ;;  %v710_v37 = vmul.f32 -0.75, %v518_v8  ;;  %v581_v38 = vmin.f32 %v549_v30, 1.0  ;;  %v774_v44 = vmul.f32 %v742_v29, %v742_v29 }
  0x81   : > { %v1185_v39 = vsub.f32 %v897_v22, %v1153_v31  ;;  %v900_v40 = vmul.f32 %v846_v32, %v804_v10  ;;  %v1102_v41 = vmul.f32 0.6931472, %v3427_v34  ;;  %v998_v42 = vsub.f32 1.0, %v678_v33  ;;  %v490_v31 = vld [vmem:[%s3906_s6 + $0x78] sm:$0xff] }
  0x82   : > { %v966_v45 = vmul.f32 0.25, %v934_v25  ;;  %3434 = vlog2.f32 %v678_v33  ;;  %v613_v46 = vsub.f32 1.0, %v485_v26  ;;  %v1059_v49 = vmul.f32 %v1027_v36, %v963_v20 }
  0x83   : > { %v3429_v47 = vpop.eup %3428  ;;  %1255 = vrot.lane.b32.xlu0 %v1185_v39, %s3698_s8  ;;  %v1156_v48 = vmul.f32 %v1102_v41, %v1060_v14  ;;  %v1030_v50 = vmul.f32 %v998_v42, %v998_v42  ;;  %v741_v51 = vsub.f32 1.0, %v581_v38  ;;  %3436 = vlog2.f32 %v581_v38 }
  0x84   : > { %v844_v53 = vmul.f32 0.6931472, %v3429_v47  ;;  %v645_v54 = vmax.f32 %v613_v46, 1e-08  ;;  %v933_v55 = vsub.f32 1.0, %v517_v43  ;;  %v709_v58 = vmul.f32 -0.75, %v517_v43 }
  0x85   : > { %v1188_v57 = vsub.f32 %v900_v40, %v1156_v48  ;;  %v773_v59 = vmul.f32 %v741_v51, %v741_v51  ;;  %v552_v60 = vmax.f32 %v488_v52, 1e-08  ;;  %v806_v61 = vmul.f32 %v774_v44, %v710_v37  ;;  %v522_v43 = vld [vmem:[%s3908_s7 + $0x78] sm:$0xff] }
  0x86   : > { %v1062_v62 = vmul.f32 %v1030_v50, %v966_v45  ;;  %v677_v63 = vmin.f32 %v645_v54, 1.0  ;;  %v616_v0 = vsub.f32 1.0, %v488_v52  ;;  %v899_v1 = vmul.f32 %v844_v53, %v803_v35  ;;  %v489_v53 = vld [vmem:[%s3906_s6 + $0x70] sm:$0xff] }
  0x87   : > { %1261 = vrot.lane.b32.xlu1 %v1188_v57, %s3698_s8  ;;  %v965_v2 = vmul.f32 0.25, %v933_v55  ;;  %v584_v3 = vmin.f32 %v552_v60, 1.0  ;;  %v936_v4 = vsub.f32 1.0, %v520_v56  ;;  %v551_v9 = vmax.f32 %v487_v5, 1e-08 }
  0x88   : > { %v3431_v6 = vpop.eup %3430  ;;  %v997_v7 = vsub.f32 1.0, %v677_v63  ;;  %3438 = vlog2.f32 %v677_v63  ;;  %v648_v8 = vmax.f32 %v616_v0, 1e-08  ;;  %v805_v12 = vmul.f32 %v773_v59, %v709_v58 }
  0x89   : > { %v3433_v10 = vpop.eup %3432  ;;  %v1100_v11 = vmul.f32 0.6931472, %v3431_v6  ;;  %v744_v13 = vsub.f32 1.0, %v584_v3  ;;  %3440 = vlog2.f32 %v584_v3  ;;  %v712_v16 = vmul.f32 -0.75, %v520_v56  ;;  %v521_v6 = vld [vmem:[%s3908_s7 + $0x70] sm:$0xff] }
  0x8a   : > { %v850_v14 = vmul.f32 0.6931472, %v3433_v10  ;;  %v680_v15 = vmin.f32 %v648_v8, 1.0  ;;  %v583_v17 = vmin.f32 %v551_v9, 1.0  ;;  %v1029_v19 = vmul.f32 %v997_v7, %v997_v7 }
  0x8b   : > { %v1155_v18 = vmul.f32 %v1100_v11, %v1059_v49  ;;  %v968_v20 = vmul.f32 0.25, %v936_v4  ;;  %v615_v22 = vsub.f32 1.0, %v487_v5  ;;  %v776_v24 = vmul.f32 %v744_v13, %v744_v13  ;;  %v492_v11 = vld [vmem:[%s3906_s6 + $0x88] sm:$0xff] }
  0x8c   : > { %v3435_v23 = vpop.eup %3434  ;;  %v1000_v25 = vsub.f32 1.0, %v680_v15  ;;  %3442 = vlog2.f32 %v680_v15  ;;  %v711_v26 = vmul.f32 -0.75, %v519_v21  ;;  %v902_v28 = vmul.f32 %v850_v14, %v806_v61 }
  0x8d   : > { %v1187_v27 = vsub.f32 %v899_v1, %v1155_v18  ;;  %v1106_v29 = vmul.f32 0.6931472, %v3435_v23  ;;  %v647_v30 = vmax.f32 %v615_v22, 1e-08  ;;  %v3437_v32 = vpop.eup %3436  ;;  %v743_v34 = vsub.f32 1.0, %v583_v17  ;;  %v524_v22 = vld [vmem:[%s3908_s7 + $0x88] sm:$0xff] }
  0x8e   : > { %v1032_v33 = vmul.f32 %v1000_v25, %v1000_v25  ;;  %3444 = vlog2.f32 %v583_v17  ;;  %v935_v35 = vsub.f32 1.0, %v519_v21  ;;  %v848_v37 = vmul.f32 0.6931472, %v3437_v32 }
  0x8f   : > { %1259 = vrot.lane.b32.xlu0 %v1187_v27, %s3698_s8  ;;  %v1158_v36 = vmul.f32 %v1106_v29, %v1062_v62  ;;  %v679_v38 = vmin.f32 %v647_v30, 1.0  ;;  %v554_v39 = vmax.f32 %v490_v31, 1e-08  ;;  %v1061_v40 = vmul.f32 %v1029_v19, %v965_v2 }
  0x90   : > { %v808_v41 = vmul.f32 %v776_v24, %v712_v16  ;;  %v1064_v42 = vmul.f32 %v1032_v33, %v968_v20  ;;  %v618_v44 = vsub.f32 1.0, %v490_v31  ;;  %v775_v46 = vmul.f32 %v743_v34, %v743_v34 }
  0x91   : > { %v1190_v45 = vsub.f32 %v902_v28, %v1158_v36  ;;  %v999_v47 = vsub.f32 1.0, %v679_v38  ;;  %3446 = vlog2.f32 %v679_v38  ;;  %v901_v49 = vmul.f32 %v848_v37, %v805_v12 }
  0x92   : > { %v3439_v48 = vpop.eup %3438  ;;  %v967_v50 = vmul.f32 0.25, %v935_v35  ;;  %v586_v51 = vmin.f32 %v554_v39, 1.0  ;;  %v650_v52 = vmax.f32 %v618_v44, 1e-08  ;;  %v938_v57 = vsub.f32 1.0, %v522_v43 }
  0x93   : > { %v3441_v54 = vpop.eup %3440  ;;  %1265 = vrot.lane.b32.xlu1 %v1190_v45, %s3698_s8  ;;  %v1104_v55 = vmul.f32 0.6931472, %v3439_v48  ;;  %v1031_v56 = vmul.f32 %v999_v47, %v999_v47  ;;  %v553_v58 = vmax.f32 %v489_v53, 1e-08  ;;  %v807_v63 = vmul.f32 %v775_v46, %v711_v26 }
  0x94   : > { %v854_v59 = vmul.f32 0.6931472, %v3441_v54  ;;  %v682_v60 = vmin.f32 %v650_v52, 1.0  ;;  %v746_v61 = vsub.f32 1.0, %v586_v51  ;;  %3448 = vlog2.f32 %v586_v51 }
  0x95   : > { %v1157_v62 = vmul.f32 %v1104_v55, %v1061_v40  ;;  %v714_v0 = vmul.f32 -0.75, %v522_v43  ;;  %v585_v1 = vmin.f32 %v553_v58, 1.0  ;;  %v970_v4 = vmul.f32 0.25, %v938_v57 }
  0x96   : > { %v3443_v2 = vpop.eup %3442  ;;  %v778_v3 = vmul.f32 %v746_v61, %v746_v61  ;;  %v1002_v5 = vsub.f32 1.0, %v682_v60  ;;  %3450 = vlog2.f32 %v682_v60  ;;  %v904_v8 = vmul.f32 %v854_v59, %v808_v41  ;;  %v491_v41 = vld [vmem:[%s3906_s6 + $0x80] sm:$0xff]  ;;  %v494_v60 = vld [vmem:[%s3906_s6 + $0x98] sm:$0xff] }
  0x97   : > { %v1189_v7 = vsub.f32 %v901_v49, %v1157_v62  ;;  %v1110_v9 = vmul.f32 0.6931472, %v3443_v2  ;;  %v617_v10 = vsub.f32 1.0, %v489_v53  ;;  %v1063_v13 = vmul.f32 %v1031_v56, %v967_v50  ;;  %v3961_v53 = vld [vmem:[%s3908_s7 + $0x80] sm:$0xff] }
  0x98   : > { %v3445_v12 = vpop.eup %3444  ;;  %v1034_v14 = vmul.f32 %v1002_v5, %v1002_v5  ;;  %v745_v15 = vsub.f32 1.0, %v585_v1  ;;  %3452 = vlog2.f32 %v585_v1  ;;  %v937_v19 = vsub.f32 1.0, %v521_v6 }
  0x99   : > { %1263 = vrot.lane.b32.xlu0 %v1189_v7, %s3698_s8  ;;  %v1160_v16 = vmul.f32 %v1110_v9, %v1064_v42  ;;  %v852_v17 = vmul.f32 0.6931472, %v3445_v12  ;;  %v649_v18 = vmax.f32 %v617_v10, 1e-08  ;;  %v810_v20 = vmul.f32 %v778_v3, %v714_v0 }
  0x9a   : > { %v713_v21 = vmul.f32 -0.75, %v521_v6  ;;  %v556_v23 = vmax.f32 %v492_v11, 1e-08  ;;  %v620_v24 = vsub.f32 1.0, %v492_v11  ;;  %v1066_v27 = vmul.f32 %v1034_v14, %v970_v4  ;;  %v3968_v11 = vld [vmem:[%s3908_s7 + $0x98] sm:$0xff] }
  0x9b   : > { %v3447_v25 = vpop.eup %3446  ;;  %v1192_v26 = vsub.f32 %v904_v8, %v1160_v16  ;;  %v681_v28 = vmin.f32 %v649_v18, 1.0  ;;  %v777_v29 = vmul.f32 %v745_v15, %v745_v15  ;;  %v903_v30 = vmul.f32 %v852_v17, %v807_v63 }
  0x9c   : > { %v1108_v31 = vmul.f32 0.6931472, %v3447_v25  ;;  %v588_v32 = vmin.f32 %v556_v23, 1.0  ;;  %v652_v33 = vmax.f32 %v620_v24, 1e-08  ;;  %v969_v34 = vmul.f32 0.25, %v937_v19 }
  0x9d   : > { %1269 = vrot.lane.b32.xlu1 %v1192_v26, %s3698_s8  ;;  %v1001_v35 = vsub.f32 1.0, %v681_v28  ;;  %3454 = vlog2.f32 %v681_v28  ;;  %v940_v36 = vsub.f32 1.0, %v524_v22  ;;  %v716_v44 = vmul.f32 -0.75, %v524_v22 }
  0x9e   : > { %v3449_v37 = vpop.eup %3448  ;;  %v1159_v38 = vmul.f32 %v1108_v31, %v1063_v13  ;;  %v684_v39 = vmin.f32 %v652_v33, 1.0  ;;  %v748_v40 = vsub.f32 1.0, %v588_v32  ;;  %3456 = vlog2.f32 %v588_v32  ;;  %v493_v13 = vld [vmem:[%s3906_s6 + $0x90] sm:$0xff] }
  0x9f   : > { %v858_v42 = vmul.f32 0.6931472, %v3449_v37  ;;  %v1033_v43 = vmul.f32 %v1001_v35, %v1001_v35  ;;  %v555_v45 = vmax.f32 %v491_v41, 1e-08  ;;  %v972_v52 = vmul.f32 0.25, %v940_v36  ;;  %v3975_v36 = vld [vmem:[%s3908_s7 + $0x90] sm:$0xff] }
  0xa0   : > { %v3451_v46 = vpop.eup %3450  ;;  %v1191_v47 = vsub.f32 %v903_v30, %v1159_v38  ;;  %v780_v48 = vmul.f32 %v748_v40, %v748_v40  ;;  %v1004_v49 = vsub.f32 1.0, %v684_v39  ;;  %3458 = vlog2.f32 %v684_v39 }
  0xa1   : > { %v906_v50 = vmul.f32 %v858_v42, %v810_v20  ;;  %v1114_v51 = vmul.f32 0.6931472, %v3451_v46  ;;  %v587_v54 = vmin.f32 %v555_v45, 1.0  ;;  %v809_v56 = vmul.f32 %v777_v29, %v713_v21 }
  0xa2   : > { %v3453_v55 = vpop.eup %3452  ;;  %1267 = vrot.lane.b32.xlu0 %v1191_v47, %s3698_s8  ;;  %v1065_v57 = vmul.f32 %v1033_v43, %v969_v34  ;;  %v1036_v58 = vmul.f32 %v1004_v49, %v1004_v49  ;;  %v619_v59 = vsub.f32 1.0, %v491_v41  ;;  %v812_v0 = vmul.f32 %v780_v48, %v716_v44  ;;  %v496_v43 = vld [vmem:[%s3906_s6 + $0xa8] sm:$0xff] }
  0xa3   : > { %v1162_v61 = vmul.f32 %v1114_v51, %v1066_v27  ;;  %v856_v62 = vmul.f32 0.6931472, %v3453_v55  ;;  %v747_v63 = vsub.f32 1.0, %v587_v54  ;;  %3460 = vlog2.f32 %v587_v54  ;;  %v3980_v47 = vld [vmem:[%s3908_s7 + $0xa8] sm:$0xff] }
  0xa4   : > { %v651_v1 = vmax.f32 %v619_v59, 1e-08  ;;  %v939_v2 = vsub.f32 1.0, %v3961_v53  ;;  %v558_v3 = vmax.f32 %v494_v60, 1e-08  ;;  %v1068_v5 = vmul.f32 %v1036_v58, %v972_v52 }
  0xa5   : > { %v1194_v4 = vsub.f32 %v906_v50, %v1162_v61  ;;  %v715_v6 = vmul.f32 -0.75, %v3961_v53  ;;  %v622_v7 = vsub.f32 1.0, %v494_v60  ;;  %v905_v8 = vmul.f32 %v856_v62, %v809_v56  ;;  %v495_v61 = vld [vmem:[%s3906_s6 + $0xa0] sm:$0xff] }
  0xa6   : > { %v683_v9 = vmin.f32 %v651_v1, 1.0  ;;  %v779_v10 = vmul.f32 %v747_v63, %v747_v63  ;;  %v590_v12 = vmin.f32 %v558_v3, 1.0  ;;  %v971_v15 = vmul.f32 0.25, %v939_v2 }
  0xa7   : > { %v3455_v14 = vpop.eup %3454  ;;  %1273 = vrot.lane.b32.xlu1 %v1194_v4, %s3698_s8  ;;  %v654_v16 = vmax.f32 %v622_v7, 1e-08  ;;  %v718_v17 = vmul.f32 -0.75, %v3968_v11  ;;  %v557_v18 = vmax.f32 %v493_v13, 1e-08  ;;  %v942_v25 = vsub.f32 1.0, %v3968_v11 }
  0xa8   : > { %v3457_v19 = vpop.eup %3456  ;;  %v1112_v20 = vmul.f32 0.6931472, %v3455_v14  ;;  %v1003_v21 = vsub.f32 1.0, %v683_v9  ;;  %3462 = vlog2.f32 %v683_v9  ;;  %v750_v22 = vsub.f32 1.0, %v590_v12 }
  0xa9   : > { %v862_v23 = vmul.f32 0.6931472, %v3457_v19  ;;  %v686_v24 = vmin.f32 %v654_v16, 1.0  ;;  %3464 = vlog2.f32 %v590_v12  ;;  %v589_v30 = vmin.f32 %v557_v18, 1.0 }
  0xaa   : > { %v3459_v26 = vpop.eup %3458  ;;  %v1161_v27 = vmul.f32 %v1112_v20, %v1065_v57  ;;  %v1035_v28 = vmul.f32 %v1003_v21, %v1003_v21  ;;  %v782_v29 = vmul.f32 %v750_v22, %v750_v22  ;;  %v811_v35 = vmul.f32 %v779_v10, %v715_v6  ;;  %v3989_v20 = vld [vmem:[%s3908_s7 + $0xa0] sm:$0xff] }
  0xab   : > { %v908_v31 = vmul.f32 %v862_v23, %v812_v0  ;;  %v1118_v32 = vmul.f32 0.6931472, %v3459_v26  ;;  %v1006_v33 = vsub.f32 1.0, %v686_v24  ;;  %3466 = vlog2.f32 %v686_v24  ;;  %v498_v24 = vld [vmem:[%s3906_s6 + $0xb8] sm:$0xff] }
  0xac   : > { %v1193_v34 = vsub.f32 %v905_v8, %v1161_v27  ;;  %v621_v37 = vsub.f32 1.0, %v493_v13  ;;  %v974_v40 = vmul.f32 0.25, %v942_v25  ;;  %v749_v42 = vsub.f32 1.0, %v589_v30 }
  0xad   : > { %v3461_v38 = vpop.eup %3460  ;;  %v1164_v39 = vmul.f32 %v1118_v32, %v1068_v5  ;;  %v1038_v41 = vmul.f32 %v1006_v33, %v1006_v33  ;;  %v1067_v45 = vmul.f32 %v1035_v28, %v971_v15  ;;  %3468 = vlog2.f32 %v589_v30 }
  0xae   : > { %1271 = vrot.lane.b32.xlu0 %v1193_v34, %s3698_s8  ;;  %v860_v44 = vmul.f32 0.6931472, %v3461_v38  ;;  %v653_v46 = vmax.f32 %v621_v37, 1e-08  ;;  %v814_v49 = vmul.f32 %v782_v29, %v718_v17  ;;  %v941_v50 = vsub.f32 1.0, %v3975_v36  ;;  %v3996_v37 = vld [vmem:[%s3908_s7 + $0xb8] sm:$0xff] }
  0xaf   : > { %v1196_v48 = vsub.f32 %v908_v31, %v1164_v39  ;;  %v560_v51 = vmax.f32 %v496_v43, 1e-08  ;;  %v717_v54 = vmul.f32 -0.75, %v3975_v36  ;;  %v781_v55 = vmul.f32 %v749_v42, %v749_v42 }
  0xb0   : > { %v685_v52 = vmin.f32 %v653_v46, 1.0  ;;  %v624_v56 = vsub.f32 1.0, %v496_v43  ;;  %v907_v57 = vmul.f32 %v860_v44, %v811_v35  ;;  %v1070_v58 = vmul.f32 %v1038_v41, %v974_v40 }
  0xb1   : > { %1277 = vrot.lane.b32.xlu1 %v1196_v48, %s3698_s8  ;;  %v592_v59 = vmin.f32 %v560_v51, 1.0  ;;  %v944_v60 = vsub.f32 1.0, %v3980_v47  ;;  %v559_v1 = vmax.f32 %v495_v61, 1e-08  ;;  %v973_v4 = vmul.f32 0.25, %v941_v50  ;;  %v497_v48 = vld [vmem:[%s3906_s6 + $0xb0] sm:$0xff] }
  0xb2   : > { %v3463_v62 = vpop.eup %3462  ;;  %v1005_v63 = vsub.f32 1.0, %v685_v52  ;;  %3470 = vlog2.f32 %v685_v52  ;;  %v656_v0 = vmax.f32 %v624_v56, 1e-08  ;;  %v813_v7 = vmul.f32 %v781_v55, %v717_v54 }
  0xb3   : > { %v3465_v2 = vpop.eup %3464  ;;  %v1116_v3 = vmul.f32 0.6931472, %v3463_v62  ;;  %v752_v5 = vsub.f32 1.0, %v592_v59  ;;  %3472 = vlog2.f32 %v592_v59  ;;  %v591_v9 = vmin.f32 %v559_v1, 1.0  ;;  %v4003_v1 = vld [vmem:[%s3908_s7 + $0xb0] sm:$0xff] }
  0xb4   : > { %v866_v6 = vmul.f32 0.6931472, %v3465_v2  ;;  %v688_v8 = vmin.f32 %v656_v0, 1.0  ;;  %v720_v13 = vmul.f32 -0.75, %v3980_v47  ;;  %v976_v14 = vmul.f32 0.25, %v944_v60 }
  0xb5   : > { %v3467_v10 = vpop.eup %3466  ;;  %v1163_v12 = vmul.f32 %v1116_v3, %v1067_v45  ;;  %v623_v15 = vsub.f32 1.0, %v495_v61  ;;  %v1037_v18 = vmul.f32 %v1005_v63, %v1005_v63  ;;  %v784_v19 = vmul.f32 %v752_v5, %v752_v5 }
  0xb6   : > { %v910_v16 = vmul.f32 %v866_v6, %v814_v49  ;;  %v1122_v17 = vmul.f32 0.6931472, %v3467_v10  ;;  %v1008_v22 = vsub.f32 1.0, %v688_v8  ;;  %3474 = vlog2.f32 %v688_v8 }
  0xb7   : > { %v1195_v21 = vsub.f32 %v907_v57, %v1163_v12  ;;  %v655_v23 = vmax.f32 %v623_v15, 1e-08  ;;  %v3469_v25 = vpop.eup %3468  ;;  %v719_v27 = vmul.f32 -0.75, %v3989_v20  ;;  %v751_v28 = vsub.f32 1.0, %v591_v9 }
  0xb8   : > { %v1166_v26 = vmul.f32 %v1122_v17, %v1070_v58  ;;  %3476 = vlog2.f32 %v591_v9  ;;  %v864_v29 = vmul.f32 0.6931472, %v3469_v25  ;;  %v943_v31 = vsub.f32 1.0, %v3989_v20 }
  0xb9   : > { %1275 = vrot.lane.b32.xlu0 %v1195_v21, %s3698_s8  ;;  %v687_v30 = vmin.f32 %v655_v23, 1.0  ;;  %v562_v32 = vmax.f32 %v498_v24, 1e-08  ;;  %v1069_v34 = vmul.f32 %v1037_v18, %v973_v4  ;;  %v816_v35 = vmul.f32 %v784_v19, %v720_v13 }
  0xba   : > { %v1198_v33 = vsub.f32 %v910_v16, %v1166_v26  ;;  %v626_v38 = vsub.f32 1.0, %v498_v24  ;;  %v1040_v39 = vmul.f32 %v1008_v22, %v1008_v22  ;;  %v783_v40 = vmul.f32 %v751_v28, %v751_v28 }
  0xbb   : > { %v1007_v41 = vsub.f32 1.0, %v687_v30  ;;  %3478 = vlog2.f32 %v687_v30  ;;  %v909_v43 = vmul.f32 %v864_v29, %v813_v7  ;;  %v975_v44 = vmul.f32 0.25, %v943_v31  ;;  %v500_v7 = vld [vmem:[%s3906_s6 + $0xc8] sm:$0xff] }
  0xbc   : > { %v3471_v42 = vpop.eup %3470  ;;  %1281 = vrot.lane.b32.xlu1 %v1198_v33, %s3698_s8  ;;  %v594_v45 = vmin.f32 %v562_v32, 1.0  ;;  %v658_v46 = vmax.f32 %v626_v38, 1e-08  ;;  %v946_v52 = vsub.f32 1.0, %v3996_v37  ;;  %v561_v54 = vmax.f32 %v497_v48, 1e-08 }
  0xbd   : > { %v3473_v49 = vpop.eup %3472  ;;  %v1120_v50 = vmul.f32 0.6931472, %v3471_v42  ;;  %v1039_v51 = vmul.f32 %v1007_v41, %v1007_v41  ;;  %v1072_v59 = vmul.f32 %v1040_v39, %v976_v14  ;;  %v815_v60 = vmul.f32 %v783_v40, %v719_v27  ;;  %v4010_v29 = vld [vmem:[%s3908_s7 + $0xc8] sm:$0xff]  ;;  %v499_v41 = vld [vmem:[%s3906_s6 + $0xc0] sm:$0xff] }
  0xbe   : > { %v870_v55 = vmul.f32 0.6931472, %v3473_v49  ;;  %v690_v56 = vmin.f32 %v658_v46, 1.0  ;;  %v754_v57 = vsub.f32 1.0, %v594_v45  ;;  %3480 = vlog2.f32 %v594_v45 }
  0xbf   : > { %v1165_v58 = vmul.f32 %v1120_v50, %v1069_v34  ;;  %v593_v61 = vmin.f32 %v561_v54, 1.0  ;;  %v1071_v62 = vmul.f32 %v1039_v51, %v975_v44  ;;  %v722_v63 = vmul.f32 -0.75, %v3996_v37 }
  0xc0   : > { %v1010_v0 = vsub.f32 1.0, %v690_v56  ;;  %3482 = vlog2.f32 %v690_v56  ;;  %v3475_v2 = vpop.eup %3474  ;;  %v786_v4 = vmul.f32 %v754_v57, %v754_v57  ;;  %v625_v5 = vsub.f32 1.0, %v497_v48 }
  0xc1   : > { %v1197_v3 = vsub.f32 %v909_v43, %v1165_v58  ;;  %v753_v6 = vsub.f32 1.0, %v593_v61  ;;  %v912_v9 = vmul.f32 %v870_v55, %v816_v35  ;;  %v1126_v10 = vmul.f32 0.6931472, %v3475_v2  ;;  %v502_v58 = vld [vmem:[%s3906_s6 + $0xd8] sm:$0xff] }
  0xc2   : > { %v3477_v8 = vpop.eup %3476  ;;  %v978_v12 = vmul.f32 0.25, %v946_v52  ;;  %3484 = vlog2.f32 %v593_v61  ;;  %v1042_v14 = vmul.f32 %v1010_v0, %v1010_v0  ;;  %v657_v15 = vmax.f32 %v625_v5, 1e-08 }
  0xc3   : > { %1279 = vrot.lane.b32.xlu0 %v1197_v3, %s3698_s8  ;;  %v868_v13 = vmul.f32 0.6931472, %v3477_v8  ;;  %v945_v16 = vsub.f32 1.0, %v4003_v1  ;;  %v1168_v17 = vmul.f32 %v1126_v10, %v1072_v59  ;;  %v721_v18 = vmul.f32 -0.75, %v4003_v1 }
  0xc4   : > { %v564_v19 = vmax.f32 %v500_v7, 1e-08  ;;  %v628_v21 = vsub.f32 1.0, %v500_v7  ;;  %v818_v24 = vmul.f32 %v786_v4, %v722_v63  ;;  %v689_v25 = vmin.f32 %v657_v15, 1.0 }
  0xc5   : > { %v3479_v22 = vpop.eup %3478  ;;  %v911_v23 = vmul.f32 %v868_v13, %v815_v60  ;;  %v785_v26 = vmul.f32 %v753_v6, %v753_v6  ;;  %v1200_v27 = vsub.f32 %v912_v9, %v1168_v17  ;;  %v1074_v32 = vmul.f32 %v1042_v14, %v978_v12  ;;  %v501_v13 = vld [vmem:[%s3906_s6 + $0xd0] sm:$0xff]  ;;  %v4026_v17 = vld [vmem:[%s3908_s7 + $0xd8] sm:$0xff] }
  0xc6   : > { %v1124_v28 = vmul.f32 0.6931472, %v3479_v22  ;;  %v596_v30 = vmin.f32 %v564_v19, 1.0  ;;  %v660_v31 = vmax.f32 %v628_v21, 1e-08  ;;  %v977_v33 = vmul.f32 0.25, %v945_v16 }
  0xc7   : > { %v1009_v34 = vsub.f32 1.0, %v689_v25  ;;  %3486 = vlog2.f32 %v689_v25  ;;  %1285 = vrot.lane.b32.xlu1 %v1200_v27, %s3698_s8  ;;  %v724_v43 = vmul.f32 -0.75, %v4010_v29  ;;  %v948_v44 = vsub.f32 1.0, %v4010_v29 }
  0xc8   : > { %v3481_v35 = vpop.eup %3480  ;;  %v1167_v38 = vmul.f32 %v1124_v28, %v1071_v62  ;;  %v692_v39 = vmin.f32 %v660_v31, 1.0  ;;  %v756_v40 = vsub.f32 1.0, %v596_v30  ;;  %3488 = vlog2.f32 %v596_v30  ;;  %v4019_v62 = vld [vmem:[%s3908_s7 + $0xc0] sm:$0xff] }
  0xc9   : > { %v874_v42 = vmul.f32 0.6931472, %v3481_v35  ;;  %v563_v45 = vmax.f32 %v499_v41, 1e-08  ;;  %v1041_v49 = vmul.f32 %v1009_v34, %v1009_v34  ;;  %v627_v57 = vsub.f32 1.0, %v499_v41 }
  0xca   : > { %v3483_v46 = vpop.eup %3482  ;;  %v1199_v48 = vsub.f32 %v911_v23, %v1167_v38  ;;  %v1012_v50 = vsub.f32 1.0, %v692_v39  ;;  %3490 = vlog2.f32 %v692_v39  ;;  %v788_v54 = vmul.f32 %v756_v40, %v756_v40 }
  0xcb   : > { %v914_v51 = vmul.f32 %v874_v42, %v818_v24  ;;  %v1130_v52 = vmul.f32 0.6931472, %v3483_v46  ;;  %v595_v55 = vmin.f32 %v563_v45, 1.0  ;;  %v980_v60 = vmul.f32 0.25, %v948_v44 }
  0xcc   : > { %v3485_v56 = vpop.eup %3484  ;;  %1283 = vrot.lane.b32.xlu0 %v1199_v48, %s3698_s8  ;;  %v1044_v61 = vmul.f32 %v1012_v50, %v1012_v50  ;;  %v817_v63 = vmul.f32 %v785_v26, %v721_v18  ;;  %v659_v2 = vmax.f32 %v627_v57, 1e-08  ;;  %v566_v3 = vmax.f32 %v502_v58, 1e-08  ;;  %v504_v48 = vld [vmem:[%s3906_s6 + $0xe8] sm:$0xff] }
  0xcd   : > { %v1170_v59 = vmul.f32 %v1130_v52, %v1074_v32  ;;  %3492 = vlog2.f32 %v595_v55  ;;  %v872_v0 = vmul.f32 0.6931472, %v3485_v56  ;;  %v1073_v5 = vmul.f32 %v1041_v49, %v977_v33 }
  0xce   : > { %v820_v6 = vmul.f32 %v788_v54, %v724_v43  ;;  %v630_v7 = vsub.f32 1.0, %v502_v58  ;;  %v691_v8 = vmin.f32 %v659_v2, 1.0  ;;  %v723_v9 = vmul.f32 -0.75, %v4019_v62 }
  0xcf   : > { %v1202_v4 = vsub.f32 %v914_v51, %v1170_v59  ;;  %v755_v10 = vsub.f32 1.0, %v595_v55  ;;  %v598_v12 = vmin.f32 %v566_v3, 1.0  ;;  %v1076_v15 = vmul.f32 %v1044_v61, %v980_v60  ;;  %v4033_v51 = vld [vmem:[%s3908_s7 + $0xd0] sm:$0xff] }
  0xd0   : > { %v947_v16 = vsub.f32 1.0, %v4019_v62  ;;  %v662_v18 = vmax.f32 %v630_v7, 1e-08  ;;  %v565_v19 = vmax.f32 %v501_v13, 1e-08  ;;  %v913_v22 = vmul.f32 %v872_v0, %v817_v63 }
  0xd1   : > { %v3487_v14 = vpop.eup %3486  ;;  %1289 = vrot.lane.b32.xlu1 %v1202_v4, %s3698_s8  ;;  %v1011_v24 = vsub.f32 1.0, %v691_v8  ;;  %3494 = vlog2.f32 %v691_v8  ;;  %v758_v27 = vsub.f32 1.0, %v598_v12  ;;  %v787_v31 = vmul.f32 %v755_v10, %v755_v10  ;;  %v503_v4 = vld [vmem:[%s3906_s6 + $0xe0] sm:$0xff] }
  0xd2   : > { %v3489_v21 = vpop.eup %3488  ;;  %v1128_v23 = vmul.f32 0.6931472, %v3487_v14  ;;  %v694_v26 = vmin.f32 %v662_v18, 1.0  ;;  %3496 = vlog2.f32 %v598_v12  ;;  %v950_v32 = vsub.f32 1.0, %v4026_v17  ;;  %v4040_v14 = vld [vmem:[%s3908_s7 + $0xe8] sm:$0xff] }
  0xd3   : > { %v878_v25 = vmul.f32 0.6931472, %v3489_v21  ;;  %v597_v33 = vmin.f32 %v565_v19, 1.0  ;;  %v979_v40 = vmul.f32 0.25, %v947_v16  ;;  %v1043_v41 = vmul.f32 %v1011_v24, %v1011_v24 }
  0xd4   : > { %v3491_v28 = vpop.eup %3490  ;;  %v1169_v30 = vmul.f32 %v1128_v23, %v1073_v5  ;;  %v1014_v38 = vsub.f32 1.0, %v694_v26  ;;  %3498 = vlog2.f32 %v694_v26  ;;  %v629_v42 = vsub.f32 1.0, %v501_v13 }
  0xd5   : > { %v916_v34 = vmul.f32 %v878_v25, %v820_v6  ;;  %v1134_v35 = vmul.f32 0.6931472, %v3491_v28  ;;  %v726_v45 = vmul.f32 -0.75, %v4026_v17  ;;  %v790_v46 = vmul.f32 %v758_v27, %v758_v27 }
  0xd6   : > { %v1201_v39 = vsub.f32 %v913_v22, %v1169_v30  ;;  %v819_v49 = vmul.f32 %v787_v31, %v723_v9  ;;  %v982_v50 = vmul.f32 0.25, %v950_v32  ;;  %v661_v52 = vmax.f32 %v629_v42, 1e-08 }
  0xd7   : > { %v3493_v43 = vpop.eup %3492  ;;  %v1172_v44 = vmul.f32 %v1134_v35, %v1076_v15  ;;  %3500 = vlog2.f32 %v597_v33  ;;  %v1046_v56 = vmul.f32 %v1014_v38, %v1014_v38  ;;  %v568_v57 = vmax.f32 %v504_v48, 1e-08 }
  0xd8   : > { %1287 = vrot.lane.b32.xlu0 %v1201_v39, %s3698_s8  ;;  %v876_v55 = vmul.f32 0.6931472, %v3493_v43  ;;  %v1075_v58 = vmul.f32 %v1043_v41, %v979_v40  ;;  %v693_v59 = vmin.f32 %v661_v52, 1.0  ;;  %v757_v60 = vsub.f32 1.0, %v597_v33  ;;  %v4047_v43 = vld [vmem:[%s3908_s7 + $0xe0] sm:$0xff] }
  0xd9   : > { %v1204_v54 = vsub.f32 %v916_v34, %v1172_v44  ;;  %v632_v61 = vsub.f32 1.0, %v504_v48  ;;  %v822_v63 = vmul.f32 %v790_v46, %v726_v45  ;;  %v725_v0 = vmul.f32 -0.75, %v4033_v51  ;;  %v506_v34 = vld [vmem:[%s3906_s6 + $0xf8] sm:$0xff] }
  0xda   : > { %v949_v2 = vsub.f32 1.0, %v4033_v51  ;;  %v600_v3 = vmin.f32 %v568_v57, 1.0  ;;  %v1013_v6 = vsub.f32 1.0, %v693_v59  ;;  %3502 = vlog2.f32 %v693_v59 }
  0xdb   : > { %1293 = vrot.lane.b32.xlu1 %v1204_v54, %s3698_s8  ;;  %v3495_v5 = vpop.eup %3494  ;;  %v664_v7 = vmax.f32 %v632_v61, 1e-08  ;;  %v567_v8 = vmax.f32 %v503_v4, 1e-08  ;;  %v915_v10 = vmul.f32 %v876_v55, %v819_v49  ;;  %v1078_v13 = vmul.f32 %v1046_v56, %v982_v50  ;;  %v505_v61 = vld [vmem:[%s3906_s6 + $0xf0] sm:$0xff] }
  0xdc   : > { %v3497_v9 = vpop.eup %3496  ;;  %v1132_v12 = vmul.f32 0.6931472, %v3495_v5  ;;  %3504 = vlog2.f32 %v600_v3  ;;  %v789_v16 = vmul.f32 %v757_v60, %v757_v60  ;;  %v981_v23 = vmul.f32 0.25, %v949_v2 }
  0xdd   : > { %v882_v15 = vmul.f32 0.6931472, %v3497_v9  ;;  %v696_v18 = vmin.f32 %v664_v7, 1.0  ;;  %v599_v19 = vmin.f32 %v567_v8, 1.0  ;;  %v760_v24 = vsub.f32 1.0, %v600_v3  ;;  %v4054_v7 = vld [vmem:[%s3908_s7 + $0xf8] sm:$0xff] }
  0xde   : > { %v3499_v21 = vpop.eup %3498  ;;  %v1171_v22 = vmul.f32 %v1132_v12, %v1075_v58  ;;  %v631_v25 = vsub.f32 1.0, %v503_v4  ;;  %v1045_v28 = vmul.f32 %v1013_v6, %v1013_v6  ;;  %v952_v30 = vsub.f32 1.0, %v4040_v14 }
  0xdf   : > { %v918_v26 = vmul.f32 %v882_v15, %v822_v63  ;;  %v1138_v27 = vmul.f32 0.6931472, %v3499_v21  ;;  %v1016_v32 = vsub.f32 1.0, %v696_v18  ;;  %3506 = vlog2.f32 %v696_v18 }
  0xe0   : > { %v1203_v31 = vsub.f32 %v915_v10, %v1171_v22  ;;  %v663_v33 = vmax.f32 %v631_v25, 1e-08  ;;  %v821_v39 = vmul.f32 %v789_v16, %v725_v0  ;;  %v728_v40 = vmul.f32 -0.75, %v4040_v14 }
  0xe1   : > { %v3501_v35 = vpop.eup %3500  ;;  %v1174_v38 = vmul.f32 %v1138_v27, %v1078_v13  ;;  %3508 = vlog2.f32 %v599_v19  ;;  %v792_v42 = vmul.f32 %v760_v24, %v760_v24  ;;  %v570_v45 = vmax.f32 %v506_v34, 1e-08 }
  0xe2   : > { %1291 = vrot.lane.b32.xlu0 %v1203_v31, %s3698_s8  ;;  %v880_v41 = vmul.f32 0.6931472, %v3501_v35  ;;  %v695_v44 = vmin.f32 %v663_v33, 1.0  ;;  %v984_v48 = vmul.f32 0.25, %v952_v30  ;;  %v759_v49 = vsub.f32 1.0, %v599_v19 }
  0xe3   : > { %v1206_v46 = vsub.f32 %v918_v26, %v1174_v38  ;;  %v634_v50 = vsub.f32 1.0, %v506_v34  ;;  %v1077_v52 = vmul.f32 %v1045_v28, %v981_v23  ;;  %v1048_v54 = vmul.f32 %v1016_v32, %v1016_v32 }
  0xe4   : > { %v727_v55 = vmul.f32 -0.75, %v4047_v43  ;;  %3510 = vlog2.f32 %v695_v44  ;;  %v3503_v56 = vpop.eup %3502  ;;  %v951_v57 = vsub.f32 1.0, %v4047_v43  ;;  %v1015_v58 = vsub.f32 1.0, %v695_v44 }
  0xe5   : > { %1297 = vrot.lane.b32.xlu1 %v1206_v46, %s3698_s8  ;;  %v602_v59 = vmin.f32 %v570_v45, 1.0  ;;  %v666_v60 = vmax.f32 %v634_v50, 1e-08  ;;  %v917_v0 = vmul.f32 %v880_v41, %v821_v39  ;;  %v1136_v2 = vmul.f32 0.6931472, %v3503_v56 }
  0xe6   : > { %v3505_v63 = vpop.eup %3504  ;;  %v824_v3 = vmul.f32 %v792_v42, %v728_v40  ;;  %v569_v4 = vmax.f32 %v505_v61, 1e-08  ;;  %v791_v6 = vmul.f32 %v759_v49, %v759_v49  ;;  %v1080_v13 = vmul.f32 %v1048_v54, %v984_v48  ;;  %v4060_v40 = vld [vmem:[%s3908_s7 + $0xf0] sm:$0xff] }
  0xe7   : > { %v886_v5 = vmul.f32 0.6931472, %v3505_v63  ;;  %v698_v8 = vmin.f32 %v666_v60, 1.0  ;;  %3512 = vlog2.f32 %v602_v59  ;;  %v1173_v9 = vmul.f32 %v1136_v2, %v1077_v52 }
  0xe8   : > { %v762_v10 = vsub.f32 1.0, %v602_v59  ;;  %v601_v12 = vmin.f32 %v569_v4, 1.0  ;;  %v983_v15 = vmul.f32 0.25, %v951_v57  ;;  %v1047_v16 = vmul.f32 %v1015_v58, %v1015_v58  ;;  %v1244_v4 = vpop.permute.xlu0 %1243 }
  0xe9   : > { %3514 = vlog2.f32 %v698_v8  ;;  %v3507_v18 = vpop.eup %3506  ;;  %v1205_v19 = vsub.f32 %v917_v0, %v1173_v9  ;;  %v954_v21 = vsub.f32 1.0, %v4054_v7  ;;  %v1018_v22 = vsub.f32 1.0, %v698_v8 }
  0xea   : > { %v633_v23 = vsub.f32 1.0, %v505_v61  ;;  %v920_v25 = vmul.f32 %v886_v5, %v824_v3  ;;  %v1142_v26 = vmul.f32 0.6931472, %v3507_v18  ;;  %v823_v27 = vmul.f32 %v791_v6, %v727_v55 }
  0xeb   : > { %v3509_v24 = vpop.eup %3508  ;;  %3516 = vlog2.f32 %v601_v12  ;;  %1295 = vrot.lane.b32.xlu0 %v1205_v19, %s3698_s8  ;;  %v730_v30 = vmul.f32 -0.75, %v4054_v7  ;;  %v794_v31 = vmul.f32 %v762_v10, %v762_v10  ;;  %v1079_v34 = vmul.f32 %v1047_v16, %v983_v15  ;;  %v1248_v19 = vpop.permute.xlu1 %1247 }
  0xec   : > { %v884_v28 = vmul.f32 0.6931472, %v3509_v24  ;;  %v665_v32 = vmax.f32 %v633_v23, 1e-08  ;;  %v1176_v33 = vmul.f32 %v1142_v26, %v1080_v13  ;;  %v986_v38 = vmul.f32 0.25, %v954_v21  ;;  %v1246_v16 = vpop.permute.xlu0 %1245 }
  0xed   : > { %v1050_v39 = vmul.f32 %v1018_v22, %v1018_v22  ;;  %v761_v46 = vsub.f32 1.0, %v601_v12  ;;  %v826_v48 = vmul.f32 %v794_v31, %v730_v30  ;;  %v953_v52 = vsub.f32 1.0, %v4060_v40 }
  0xee   : > { %v3511_v35 = vpop.eup %3510  ;;  %v697_v41 = vmin.f32 %v665_v32, 1.0  ;;  %v1208_v42 = vsub.f32 %v920_v25, %v1176_v33  ;;  %v919_v44 = vmul.f32 %v884_v28, %v823_v27  ;;  %v729_v59 = vmul.f32 -0.75, %v4060_v40 }
  0xef   : > { %v1140_v45 = vmul.f32 0.6931472, %v3511_v35  ;;  %v1082_v56 = vmul.f32 %v1050_v39, %v986_v38  ;;  %v793_v60 = vmul.f32 %v761_v46, %v761_v46  ;;  %v985_v2 = vmul.f32 0.25, %v953_v52  ;;  %v1250_v26 = vpop.permute.xlu1 %1249 }
  0xf0   : > { %3518 = vlog2.f32 %v697_v41  ;;  %1301 = vrot.lane.b32.xlu1 %v1208_v42, %s3698_s8  ;;  %v1017_v54 = vsub.f32 1.0, %v697_v41  ;;  %v1341_v21 = vsel %vm1339_vm0, %v1246_v16, 0.0  ;;  %v1340_v23 = vsel %vm1339_vm0, %v1244_v4, 0.0  ;;  %v1252_v31 = vpop.permute.xlu0 %1251  ;;  %v4116_v16 = vld [vmem:[%s3908_s7 + $0x28] sm:$0xff] }
  0xf1   : > { %v3513_v49 = vpop.eup %3512  ;;  %v1175_v50 = vmul.f32 %v1140_v45, %v1079_v34  ;;  %v825_v6 = vmul.f32 %v793_v60, %v729_v59  ;;  %v1342_v24 = vadd.f32 %v1341_v21, %v1340_v23  ;;  %v1343_v25 = vsel %vm1339_vm0, %v1248_v19, 0.0  ;;  %v4089_v59 = vld [vmem:[%s3908_s7 + $0x20] sm:$0xff] }
  0xf2   : > { %v890_v55 = vmul.f32 0.6931472, %v3513_v49  ;;  %v1049_v3 = vmul.f32 %v1017_v54, %v1017_v54  ;;  %v1345_v28 = vsel %vm1339_vm0, %v1250_v26, 0.0  ;;  %v1347_v33 = vsel %vm1339_vm0, %v1252_v31, 0.0  ;;  %v4077_v49 = vld [vmem:[%s3908_s7 + $0x8] sm:$0xff]  ;;  %v4127_v26 = vld [vmem:[%s3908_s7 + $0x38] sm:$0xff] }
  0xf3   : > { %v3515_v57 = vpop.eup %3514  ;;  %v1207_v58 = vsub.f32 %v919_v44, %v1175_v50  ;;  %v1344_v27 = vadd.f32 %v1343_v25, %v1342_v24  ;;  %v1254_v32 = vpop.permute.xlu1 %1253  ;;  %v1947_v50 = vsel %vm1943_vm1, %v4077_v49, -inf  ;;  %v1956_v60 = vsel %vm1943_vm1, %v4089_v59, -inf  ;;  %v4133_v31 = vld [vmem:[%s3908_s7 + $0x50] sm:$0xff] }
  0xf4   : > { %v922_v61 = vmul.f32 %v890_v55, %v826_v48  ;;  %v1146_v63 = vmul.f32 0.6931472, %v3515_v57  ;;  %v1081_v10 = vmul.f32 %v1049_v3, %v985_v2  ;;  %v1349_v35 = vsel %vm1339_vm0, %v1254_v32, 0.0  ;;  %v4083_v55 = vld [vmem:[%s3908_s7] sm:$0xff]  ;;  %v4099_v3 = vld [vmem:[%s3908_s7 + $0x30] sm:$0xff] }
  0xf5   : > { %v3517_v0 = vpop.eup %3516  ;;  %1299 = vrot.lane.b32.xlu0 %v1207_v58, %s3698_s8  ;;  %v1346_v30 = vadd.f32 %v1345_v28, %v1344_v27  ;;  %v1256_v39 = vpop.permute.xlu0 %1255  ;;  %v1962_v4 = vsel %vm1943_vm1, %v4099_v3, -inf  ;;  %v1965_v27 = vsel %vm1943_vm1, %v4127_v26, -inf  ;;  %v1974_v32 = vsel %vm1943_vm1, %v4133_v31, -inf }
  0xf6   : > { %v1178_v5 = vmul.f32 %v1146_v63, %v1082_v56  ;;  %v888_v8 = vmul.f32 0.6931472, %v3517_v0  ;;  %v1351_v42 = vsel %vm1339_vm0, %v1256_v39, 0.0  ;;  %v1944_v56 = vsel %vm1943_vm1, %v4083_v55, -inf }
  0xf7   : > { %v1348_v34 = vadd.f32 %v1347_v33, %v1346_v30  ;;  %v1258_v41 = vpop.permute.xlu1 %1257 }
  0xf8   : > { %v1210_v9 = vsub.f32 %v922_v61, %v1178_v5  ;;  %v921_v13 = vmul.f32 %v888_v8, %v825_v6  ;;  %v1353_v45 = vsel %vm1339_vm0, %v1258_v41, 0.0  ;;  %v4094_v61 = vld [vmem:[%s3908_s7 + $0x10] sm:$0xff]  ;;  %v4105_v8 = vld [vmem:[%s3908_s7 + $0x18] sm:$0xff] }
  0xf9   : > { %v1350_v38 = vadd.f32 %v1349_v35, %v1348_v34  ;;  %v1950_v63 = vsel %vm1943_vm1, %v4094_v61, -inf  ;;  %v4138_v35 = vld [vmem:[%s3908_s7 + $0x58] sm:$0xff] }
  0xfa   : > { %v3519_v12 = vpop.eup %3518  ;;  %1305 = vrot.lane.b32.xlu1 %v1210_v9, %s3698_s8  ;;  %v1953_v9 = vsel %vm1943_vm1, %v4105_v8, -inf }
  0xfb   : > { %v1144_v15 = vmul.f32 0.6931472, %v3519_v12  ;;  %v1352_v44 = vadd.f32 %v1351_v42, %v1350_v38  ;;  %v1262_v52 = vpop.permute.xlu1 %1261  ;;  %v1977_v38 = vsel %vm1943_vm1, %v4138_v35, -inf }
  0xfc   : > { %v1357_v58 = vsel %vm1339_vm0, %v1262_v52, 0.0  ;;  %v4150_v52 = vld [vmem:[%s3908_s7 + $0x68] sm:$0xff] }
  0xfd   : > { %v1177_v18 = vmul.f32 %v1144_v15, %v1081_v10  ;;  %v1354_v46 = vadd.f32 %v1353_v45, %v1352_v44  ;;  %v4145_v45 = vld [vmem:[%s3908_s7 + $0x60] sm:$0xff] }
  0xff   : > { %v1209_v22 = vsub.f32 %v921_v13, %v1177_v18  ;;  %v4111_v13 = vld [vmem:[%s3908_s7 + $0x40] sm:$0xff]  ;;  %v1959_v18 = vsel %vm1943_vm1, %v4116_v16, -inf }
 0x100   : > { %v1968_v15 = vsel %vm1943_vm1, %v4111_v13, -inf }
 0x101   : > { %1303 = vrot.lane.b32.xlu0 %v1209_v22, %s3698_s8  ;;  %v1260_v48 = vpop.permute.xlu0 %1259  ;;  %v4121_v22 = vld [vmem:[%s3908_s7 + $0x48] sm:$0xff] }
 0x102   : > { %v1355_v54 = vsel %vm1339_vm0, %v1260_v48, 0.0  ;;  %v1971_v23 = vsel %vm1943_vm1, %v4121_v22, -inf }
 0x103   : > { %v1356_v57 = vadd.f32 %v1355_v54, %v1354_v46  ;;  %v1980_v46 = vsel %vm1943_vm1, %v4145_v45, -inf  ;;  %v1983_v54 = vsel %vm1943_vm1, %v4150_v52, -inf }
 0x105   : > { %v1358_v0 = vadd.f32 %v1357_v58, %v1356_v57  ;;  %v1266_v5 = vpop.permute.xlu1 %1265 }
 0x106   : > { %v1361_v12 = vsel %vm1339_vm0, %v1266_v5, 0.0 }
 0x10b   : > { %v1264_v2 = vpop.permute.xlu0 %1263 }
 0x10c   : > { %v1359_v6 = vsel %vm1339_vm0, %v1264_v2, 0.0 }
 0x10d   : > { %v1360_v10 = vadd.f32 %v1359_v6, %v1358_v0  ;;  %v4157_v0 = vld [vmem:[%s3908_s7 + $0x78] sm:$0xff] }
 0x10e   : > { %v1989_v2 = vsel %vm1943_vm1, %v4157_v0, -inf }
 0x10f   : > { %v1362_v19 = vadd.f32 %v1361_v12, %v1360_v10  ;;  %v1270_v24 = vpop.permute.xlu1 %1269 }
 0x110   : > { %v1365_v30 = vsel %vm1339_vm0, %v1270_v24, 0.0 }
 0x114   : > { %v1268_v21 = vpop.permute.xlu0 %1267 }
 0x115   : > { %v1363_v25 = vsel %vm1339_vm0, %v1268_v21, 0.0 }
 0x116   : > { %v1364_v28 = vadd.f32 %v1363_v25, %v1362_v19  ;;  %v4170_v19 = vld [vmem:[%s3908_s7 + $0x88] sm:$0xff] }
 0x117   : > { %v1995_v21 = vsel %vm1943_vm1, %v4170_v19, -inf }
 0x118   : > { %v1366_v33 = vadd.f32 %v1365_v30, %v1364_v28 }
 0x119   : > { %v1274_v39 = vpop.permute.xlu1 %1273 }
 0x11a   : > { %v1369_v44 = vsel %vm1339_vm0, %v1274_v39, 0.0 }
 0x11e   : > { %1948 = vmax.xlane.f32.xlu1 %v1947_v50 }
 0x120   : > { %1945 = vmax.xlane.f32.xlu0 %v1944_v56  ;;  %v1272_v34 = vpop.permute.xlu0 %1271 }
 0x121   : > { %v1367_v41 = vsel %vm1339_vm0, %v1272_v34, 0.0 }
 0x122   : > { %1957 = vmax.xlane.f32.xlu1 %v1956_v60  ;;  %v1368_v42 = vadd.f32 %v1367_v41, %v1366_v33  ;;  %v5513_v60 = vlaneseq }
 0x123   : > { %v1278_v56 = vpop.permute.xlu1 %1277 }
 0x124   : > { %1951 = vmax.xlane.f32.xlu0 %v1950_v63  ;;  %v1370_v48 = vadd.f32 %v1369_v44, %v1368_v42  ;;  %v1373_v63 = vsel %vm1339_vm0, %v1278_v56, 0.0  ;;  %v4162_v6 = vand.u32 127, %v5513_v60  ;;  %v2007_v44 = vsel %vm1943_vm1, %v3980_v47, -inf }
 0x126   : > { %1963 = vmax.xlane.f32.xlu1 %v1962_v4  ;;  %5539 = vst [vmem:[#allocation7_spill] sm:$0xff] %v4162_v6 }
 0x128   : > { %1954 = vmax.xlane.f32.xlu0 %v1953_v9  ;;  %v1992_v9 = vsel %vm1943_vm1, %v3961_v53, -inf  ;;  %v1998_v53 = vsel %vm1943_vm1, %v3975_v36, -inf }
 0x12a   : > { %1969 = vmax.xlane.f32.xlu1 %v1968_v15 }
 0x12b   : > { %v1276_v50 = vpop.permute.xlu0 %1275 }
 0x12c   : > { %1960 = vmax.xlane.f32.xlu0 %v1959_v18  ;;  %v1371_v57 = vsel %vm1339_vm0, %v1276_v50, 0.0 }
 0x12d   : > { %v1372_v58 = vadd.f32 %v1371_v57, %v1370_v48  ;;  %v2016_v57 = vsel %vm1943_vm1, %v4019_v62, -inf }
 0x12e   : > { %1972 = vmax.xlane.f32.xlu1 %v1971_v23  ;;  %v1282_v10 = vpop.permute.xlu1 %1281 }
 0x12f   : > { %v1374_v4 = vadd.f32 %v1373_v63, %v1372_v58  ;;  %v1377_v18 = vsel %vm1339_vm0, %v1282_v10, 0.0  ;;  %v2013_v10 = vsel %vm1943_vm1, %v3996_v37, -inf }
 0x130   : > { %1966 = vmax.xlane.f32.xlu0 %v1965_v27 }
 0x132   : > { %1975 = vmax.xlane.f32.xlu1 %v1974_v32  ;;  %v2001_v32 = vsel %vm1943_vm1, %v3968_v11, -inf  ;;  %v2010_v11 = vsel %vm1943_vm1, %v4003_v1, -inf  ;;  %v2022_v1 = vsel %vm1943_vm1, %v4033_v51, -inf }
 0x135   : > { %v1280_v5 = vpop.permute.xlu0 %1279 }
 0x136   : > { %1978 = vmax.xlane.f32.xlu1 %v1977_v38  ;;  %v1375_v12 = vsel %vm1339_vm0, %v1280_v5, 0.0  ;;  %v2004_v38 = vsel %vm1943_vm1, %v3989_v20, -inf }
 0x137   : > { %v1376_v15 = vadd.f32 %v1375_v12, %v1374_v4  ;;  %v2028_v12 = vsel %vm1943_vm1, %v4047_v43, -inf }
 0x139   : > { %v1378_v23 = vadd.f32 %v1377_v18, %v1376_v15  ;;  %v1286_v25 = vpop.permute.xlu1 %1285 }
 0x13a   : > { %1981 = vmax.xlane.f32.xlu1 %v1980_v46  ;;  %v1381_v30 = vsel %vm1339_vm0, %v1286_v25, 0.0 }
 0x13e   : > { %1984 = vmax.xlane.f32.xlu1 %v1983_v54  ;;  %v1284_v24 = vpop.permute.xlu0 %1283 }
 0x13f   : > { %v1379_v27 = vsel %vm1339_vm0, %v1284_v24, 0.0  ;;  %v2034_v24 = vsel %vm1943_vm1, %v4060_v40, -inf }
 0x140   : > { %v1380_v28 = vadd.f32 %v1379_v27, %v1378_v23 }
 0x142   : > { %1990 = vmax.xlane.f32.xlu1 %v1989_v2  ;;  %v1382_v33 = vadd.f32 %v1381_v30, %v1380_v28  ;;  %v4193_v2 = vld [vmem:[%s3908_s7 + $0x70] sm:$0xff] }
 0x143   : > { %v1290_v39 = vpop.permute.xlu1 %1289  ;;  %v1986_v47 = vsel %vm1943_vm1, %v4193_v2, -inf }
 0x144   : > { %v1385_v42 = vsel %vm1339_vm0, %v1290_v39, 0.0  ;;  %v2031_v39 = vsel %vm1943_vm1, %v4040_v14, -inf }
 0x146   : > { %2072 = vrot.lane.b32.xlu0 %v4162_v6, %s3699_s9  ;;  %1993 = vmax.xlane.f32.xlu1 %v1992_v9 }
 0x14a   : > { %1996 = vmax.xlane.f32.xlu1 %v1995_v21  ;;  %v1288_v34 = vpop.permute.xlu0 %1287  ;;  %v2019_v21 = vsel %vm1943_vm1, %v4010_v29, -inf }
 0x14b   : > { %v1383_v41 = vsel %vm1339_vm0, %v1288_v34, 0.0 }
 0x14c   : > { %v1384_v36 = vadd.f32 %v1383_v41, %v1382_v33  ;;  %v2037_v41 = vsel %vm1943_vm1, %v4054_v7, -inf }
 0x14d   : > { %v1294_v50 = vpop.permute.xlu1 %1293 }
 0x14e   : > { %1999 = vmax.xlane.f32.xlu1 %v1998_v53  ;;  %v1386_v46 = vadd.f32 %v1385_v42, %v1384_v36  ;;  %v1389_v56 = vsel %vm1339_vm0, %v1294_v50, 0.0 }
 0x152   : > { %2002 = vmax.xlane.f32.xlu1 %v2001_v32 }
 0x154   : > { %v1292_v48 = vpop.permute.xlu0 %1291 }
 0x155   : > { %v1387_v20 = vsel %vm1339_vm0, %v1292_v48, 0.0 }
 0x156   : > { %2005 = vmax.xlane.f32.xlu1 %v2004_v38  ;;  %v1388_v54 = vadd.f32 %v1387_v20, %v1386_v46  ;;  %v2025_v38 = vsel %vm1943_vm1, %v4026_v17, -inf }
 0x157   : > { %v1298_v4 = vpop.permute.xlu1 %1297 }
 0x158   : > { %v1390_v58 = vadd.f32 %v1389_v56, %v1388_v54  ;;  %v1393_v62 = vsel %vm1339_vm0, %v1298_v4, 0.0 }
 0x15a   : > { %2008 = vmax.xlane.f32.xlu1 %v2007_v44 }
 0x15d   : > { %v1296_v63 = vpop.permute.xlu0 %1295 }
 0x15e   : > { %2011 = vmax.xlane.f32.xlu1 %v2010_v11  ;;  %v1391_v5 = vsel %vm1339_vm0, %v1296_v63, 0.0 }
 0x15f   : > { %v1392_v9 = vadd.f32 %v1391_v5, %v1390_v58 }
 0x161   : > { %v1394_v15 = vadd.f32 %v1393_v62, %v1392_v9 }
 0x162   : > { %2017 = vmax.xlane.f32.xlu1 %v2016_v57  ;;  %v1302_v23 = vpop.permute.xlu1 %1301 }
 0x163   : > { %v1397_v25 = vsel %vm1339_vm0, %v1302_v23, 0.0 }
 0x165   : > { %1987 = vmax.xlane.f32.xlu0 %v1986_v47 }
 0x166   : > { %2023 = vmax.xlane.f32.xlu1 %v2022_v1 }
 0x167   : > { %v1300_v18 = vpop.permute.xlu0 %1299 }
 0x168   : > { %v1395_v53 = vsel %vm1339_vm0, %v1300_v18, 0.0 }
 0x169   : > { %2014 = vmax.xlane.f32.xlu0 %v2013_v10  ;;  %v1396_v37 = vadd.f32 %v1395_v53, %v1394_v15 }
 0x16a   : > { %2029 = vmax.xlane.f32.xlu1 %v2028_v12 }
 0x16b   : > { %v1398_v27 = vadd.f32 %v1397_v25, %v1396_v37 }
 0x16c   : > { %v1306_v28 = vpop.permute.xlu1 %1305 }
 0x16d   : > { %2020 = vmax.xlane.f32.xlu0 %v2019_v21  ;;  %v1401_v33 = vsel %vm1339_vm0, %v1306_v28, 0.0 }
 0x16e   : > { %2035 = vmax.xlane.f32.xlu1 %v2034_v24 }
 0x173   : > { %v1304_v30 = vpop.permute.xlu0 %1303 }
 0x174   : > { %v1399_v32 = vsel %vm1339_vm0, %v1304_v30, 0.0 }
 0x175   : > { %v1400_v29 = vadd.f32 %v1399_v32, %v1398_v27 }
 0x177   : > { %v1402_v34 = vadd.f32 %v1401_v33, %v1400_v29 }
 0x179   : > { %1403 = vadd.xlane.f32.xlu0 %v1402_v34 }
 0x17d   : > { %2026 = vmax.xlane.f32.xlu0 %v2025_v38 }
 0x181   : > { %2032 = vmax.xlane.f32.xlu0 %v2031_v39 }
 0x185   : > { %2038 = vmax.xlane.f32.xlu0 %v2037_v41 }
 0x1ab   : > { %v1949_v36 = vpop.xlane.xlu1 %1948 }
 0x1ac   : > { %vm2041_vm3 = vcmp.eq.f32.partialorder %v4077_v49, %v1949_v36 }
 0x1ad   : > { %v1946_v42 = vpop.xlane.xlu0 %1945 }
 0x1ae   : > { %vm2040_vm2 = vcmp.eq.f32.partialorder %v4083_v55, %v1946_v42 }
 0x1af   : > { %v1958_v44 = vpop.xlane.xlu1 %1957 }
 0x1b0   : > { %vm2044_vm6 = vcmp.eq.f32.partialorder %v4089_v59, %v1958_v44 }
 0x1b1   : > { %v1952_v46 = vpop.xlane.xlu0 %1951 }
 0x1b2   : > { %vm2042_vm4 = vcmp.eq.f32.partialorder %v4094_v61, %v1952_v46 }
 0x1b3   : > { %v1964_v48 = vpop.xlane.xlu1 %1963 }
 0x1b4   : > { %vm2046_vm8 = vcmp.eq.f32.partialorder %v4099_v3, %v1964_v48 }
 0x1b5   : > { %v1955_v11 = vpop.xlane.xlu0 %1954 }
 0x1b6   : > { %vm2043_vm5 = vcmp.eq.f32.partialorder %v4105_v8, %v1955_v11 }
 0x1b7   : > { %v1970_v50 = vpop.xlane.xlu1 %1969 }
 0x1b8   : > { %vm2048_vm10 = vcmp.eq.f32.partialorder %v4111_v13, %v1970_v50 }
 0x1b9   : > { %v1961_v20 = vpop.xlane.xlu0 %1960 }
 0x1ba   : > { %vm2045_vm7 = vcmp.eq.f32.partialorder %v4116_v16, %v1961_v20 }
 0x1bb   : > { %v1973_v54 = vpop.xlane.xlu1 %1972 }
 0x1bc   : > { %vm2049_vm11 = vcmp.eq.f32.partialorder %v4121_v22, %v1973_v54 }
 0x1bd   : > { %v1967_v56 = vpop.xlane.xlu0 %1966 }
 0x1be   : > { %vm2047_vm9 = vcmp.eq.f32.partialorder %v4127_v26, %v1967_v56 }
 0x1bf   : > { %v1976_v17 = vpop.xlane.xlu1 %1975 }
 0x1c0   : > { %vm2050_vm12 = vcmp.eq.f32.partialorder %v4133_v31, %v1976_v17 }
 0x1c1   : > { %v4221_v57 = vpop.permute.xlu0 %2072 }
 0x1c2   : > { %v2075_v58 = vsel %vm2041_vm3, %v4221_v57, 3  ;;  %v2074_v63 = vsel %vm2040_vm2, %v4221_v57, 3  ;;  %v2077_v55 = vsel %vm2043_vm5, %v4221_v57, 3  ;;  %v2076_v49 = vsel %vm2042_vm4, %v4221_v57, 3 }
 0x1c3   : > { %v4228_v47 = vsel %vm1943_vm1, %v2075_v58, 2147483647  ;;  %v4231_v1 = vsel %vm1943_vm1, %v2074_v63, 2147483647  ;;  %v1979_v4 = vpop.xlane.xlu1 %1978  ;;  %v4240_v5 = vsel %vm1943_vm1, %v2077_v55, 2147483647 }
 0x1c4   : > { %v2123_v61 = vshra.s32 %v4228_v47, 16  ;;  %v2108_v8 = vshra.s32 %v4231_v1, 16  ;;  %v4243_v9 = vsel %vm1943_vm1, %v2076_v49, 2147483647  ;;  %v2079_v10 = vsel %vm2045_vm7, %v4221_v57, 3 }
 0x1c5   : > { %v2153_v59 = vshra.s32 %v4240_v5, 16  ;;  %v2138_v16 = vshra.s32 %v4243_v9, 16  ;;  %v4255_v18 = vsel %vm1943_vm1, %v2079_v10, 2147483647  ;;  %v2078_v21 = vsel %vm2044_vm6, %v4221_v57, 3 }
 0x1c6   : > { %v4247_v62 = vcvt.s32.f32 %v2123_v61  ;;  %v4249_v12 = vcvt.s32.f32 %v2108_v8  ;;  %v4261_v23 = vsel %vm1943_vm1, %v2078_v21, 2147483647  ;;  %v2081_v24 = vsel %vm2047_vm9, %v4221_v57, 3 }
 0x1c7   : > { %v1982_v15 = vpop.xlane.xlu1 %1981  ;;  %v4266_v26 = vcvt.s32.f32 %v2153_v59  ;;  %v4268_v53 = vcvt.s32.f32 %v2138_v16  ;;  %v2183_v37 = vshra.s32 %v4255_v18, 16  ;;  %v2168_v25 = vshra.s32 %v4261_v23, 16 }
 0x1c8   : > { %2126 = vmin.xlane.f32.xlu0 %v4247_v62  ;;  %2111 = vmin.xlane.f32.xlu1 %v4249_v12  ;;  %v2080_v27 = vsel %vm2046_vm8, %v4221_v57, 3  ;;  %v4276_v30 = vsel %vm1943_vm1, %v2081_v24, 2147483647  ;;  %v2083_v22 = vsel %vm2049_vm11, %v4221_v57, 3  ;;  %vm2051_vm13 = vcmp.eq.f32.partialorder %v4138_v35, %v1979_v4 }
 0x1c9   : > { %v4279_v13 = vsel %vm1943_vm1, %v2080_v27, 2147483647  ;;  %v2082_v3 = vsel %vm2048_vm10, %v4221_v57, 3  ;;  %v4287_v32 = vcvt.s32.f32 %v2183_v37  ;;  %v4289_v33 = vcvt.s32.f32 %v2168_v25  ;;  %v3537_v25 = vld [vmem:[%s3908_s7 + $0x98] sm:$0xff] }
 0x1ca   : > { %v2213_v29 = vshra.s32 %v4276_v30, 16  ;;  %v2198_v34 = vshra.s32 %v4279_v13, 16  ;;  %v4294_v39 = vsel %vm1943_vm1, %v2083_v22, 2147483647  ;;  %v4297_v41 = vsel %vm1943_vm1, %v2082_v3, 2147483647 }
 0x1cb   : > { %v1985_v28 = vpop.xlane.xlu1 %1984  ;;  %v2084_v31 = vsel %vm2050_vm12, %v4221_v57, 3  ;;  %v2085_v35 = vsel %vm2051_vm13, %v4221_v57, 3  ;;  %vm2052_vm14 = vcmp.eq.f32.partialorder %v4145_v45, %v1982_v15  ;;  %v2243_v44 = vshra.s32 %v4294_v39, 16 }
 0x1cc   : > { %2156 = vmin.xlane.f32.xlu0 %v4266_v26  ;;  %2141 = vmin.xlane.f32.xlu1 %v4268_v53  ;;  %vm2053_vm15 = vcmp.eq.f32.partialorder %v4150_v52, %v1985_v28  ;;  %v4305_v36 = vcvt.s32.f32 %v2213_v29  ;;  %v4307_v42 = vcvt.s32.f32 %v2198_v34  ;;  %v2228_v46 = vshra.s32 %v4297_v41, 16 }
 0x1cd   : > { %v4312_v11 = vsel %vm1943_vm1, %v2085_v35, 2147483647  ;;  %v4315_v50 = vsel %vm1943_vm1, %v2084_v31, 2147483647  ;;  %v2086_v20 = vsel %vm2052_vm14, %v4221_v57, 3  ;;  %v2087_v45 = vsel %vm2053_vm15, %v4221_v57, 3 }
 0x1ce   : > { %v4322_v52 = vcvt.s32.f32 %v2243_v44  ;;  %v4324_v54 = vcvt.s32.f32 %v2228_v46  ;;  %v2273_v56 = vshra.s32 %v4312_v11, 16  ;;  %v2258_v17 = vshra.s32 %v4315_v50, 16  ;;  %v3538_v35 = vld [vmem:[%s3908_s7 + $0xa8] sm:$0xff] }
 0x1cf   : > { %v1991_v38 = vpop.xlane.xlu1 %1990  ;;  %v4329_v63 = vsel %vm1943_vm1, %v2087_v45, 2147483647  ;;  %v4332_v4 = vsel %vm1943_vm1, %v2086_v20, 2147483647 }
 0x1d0   : > { %2186 = vmin.xlane.f32.xlu0 %v4287_v32  ;;  %2171 = vmin.xlane.f32.xlu1 %v4289_v33  ;;  %vm2055_vm2 = vcmp.eq.f32.partialorder %v4157_v0, %v1991_v38  ;;  %v4338_v0 = vcvt.s32.f32 %v2273_v56  ;;  %v4340_v49 = vcvt.s32.f32 %v2258_v17  ;;  %v2303_v61 = vshra.s32 %v4329_v63, 16  ;;  %v3539_v17 = vld [vmem:[%s3908_s7 + $0x80] sm:$0xff] }
 0x1d1   : > { %v2089_v55 = vsel %vm2055_vm2, %v4221_v57, 3  ;;  %v2288_v8 = vshra.s32 %v4332_v4, 16 }
 0x1d2   : > { %v4345_v59 = vsel %vm1943_vm1, %v2089_v55, 2147483647 }
 0x1d3   : > { %v1994_v48 = vpop.xlane.xlu1 %1993  ;;  %v4352_v15 = vcvt.s32.f32 %v2288_v8  ;;  %v2333_v21 = vshra.s32 %v4345_v59, 16  ;;  %v3540_v8 = vld [vmem:[%s3908_s7 + $0x90] sm:$0xff] }
 0x1d4   : > { %2216 = vmin.xlane.f32.xlu0 %v4305_v36  ;;  %2201 = vmin.xlane.f32.xlu1 %v4307_v42  ;;  %vm2056_vm6 = vcmp.eq.f32.partialorder %v3539_v17, %v1994_v48 }
 0x1d5   : > { %v4362_v28 = vcvt.s32.f32 %v2333_v21  ;;  %v2090_v55 = vsel %vm2056_vm6, %v4221_v57, 3 }
 0x1d7   : > { %v1997_v58 = vpop.xlane.xlu1 %1996 }
 0x1d8   : > { %2246 = vmin.xlane.f32.xlu0 %v4322_v52  ;;  %2231 = vmin.xlane.f32.xlu1 %v4324_v54  ;;  %vm2057_vm3 = vcmp.eq.f32.partialorder %v4170_v19, %v1997_v58  ;;  %v4350_v19 = vcvt.s32.f32 %v2303_v61 }
 0x1d9   : > { %v2091_v16 = vsel %vm2057_vm3, %v4221_v57, 3 }
 0x1da   : > { %v4356_v37 = vsel %vm1943_vm1, %v2091_v16, 2147483647 }
 0x1db   : > { %v2000_v10 = vpop.xlane.xlu1 %1999  ;;  %v2363_v22 = vshra.s32 %v4356_v37, 16 }
 0x1dc   : > { %2276 = vmin.xlane.f32.xlu0 %v4338_v0  ;;  %2261 = vmin.xlane.f32.xlu1 %v4340_v49  ;;  %vm2058_vm7 = vcmp.eq.f32.partialorder %v3540_v8, %v2000_v10  ;;  %v3542_v10 = vld [vmem:[%s3908_s7 + $0xb8] sm:$0xff]  ;;  %v3544_v8 = vld [vmem:[%s3908_s7 + $0xc8] sm:$0xff] }
 0x1dd   : > { %v4370_v38 = vcvt.s32.f32 %v2363_v22  ;;  %v2092_v48 = vsel %vm2058_vm7, %v4221_v57, 3 }
 0x1df   : > { %v2003_v24 = vpop.xlane.xlu1 %2002 }
 0x1e0   : > { %2306 = vmin.xlane.f32.xlu0 %v4350_v19  ;;  %2291 = vmin.xlane.f32.xlu1 %v4352_v15  ;;  %vm2059_vm4 = vcmp.eq.f32.partialorder %v3537_v25, %v2003_v24  ;;  %v4394_v24 = vsel %vm1943_vm1, %v2090_v55, 2147483647 }
 0x1e1   : > { %v2093_v27 = vsel %vm2059_vm4, %v4221_v57, 3 }
 0x1e2   : > { %v4366_v3 = vsel %vm1943_vm1, %v2093_v27, 2147483647 }
 0x1e3   : > { %v2006_v29 = vpop.xlane.xlu1 %2005  ;;  %v2393_v34 = vshra.s32 %v4366_v3, 16 }
 0x1e4   : > { %2336 = vmin.xlane.f32.xlu0 %v4362_v28 }
 0x1e5   : > { %v4374_v44 = vcvt.s32.f32 %v2393_v34  ;;  %v3541_v34 = vld [vmem:[%s3908_s7 + $0xa0] sm:$0xff] }
 0x1e6   : > { %vm2060_vm9 = vcmp.eq.f32.partialorder %v3541_v34, %v2006_v29 }
 0x1e7   : > { %v2009_v31 = vpop.xlane.xlu1 %2008  ;;  %v2094_v17 = vsel %vm2060_vm9, %v4221_v57, 3 }
 0x1e8   : > { %2366 = vmin.xlane.f32.xlu0 %v4370_v38  ;;  %vm2061_vm5 = vcmp.eq.f32.partialorder %v3538_v35, %v2009_v31  ;;  %v2348_v35 = vshra.s32 %v4394_v24, 16 }
 0x1e9   : > { %v2095_v46 = vsel %vm2061_vm5, %v4221_v57, 3 }
 0x1ea   : > { %v4378_v20 = vsel %vm1943_vm1, %v2095_v46, 2147483647 }
 0x1eb   : > { %v2423_v45 = vshra.s32 %v4378_v20, 16  ;;  %v2012_v58 = vpop.xlane.xlu1 %2011 }
 0x1ec   : > { %2396 = vmin.xlane.f32.xlu0 %v4374_v44 }
 0x1ed   : > { %v4382_v56 = vcvt.s32.f32 %v2423_v45  ;;  %v4408_v45 = vsel %vm1943_vm1, %v2092_v48, 2147483647 }
 0x1ee   : > { %v2378_v48 = vshra.s32 %v4408_v45, 16 }
 0x1ef   : > { %v2018_v25 = vpop.xlane.xlu1 %2017 }
 0x1f0   : > { %2426 = vmin.xlane.f32.xlu0 %v4382_v56 }
 0x1f2   : > { %v1988_v61 = vpop.xlane.xlu0 %1987 }
 0x1f3   : > { %vm2054_vm8 = vcmp.eq.f32.partialorder %v4193_v2, %v1988_v61  ;;  %v3543_v61 = vld [vmem:[%s3908_s7 + $0xb0] sm:$0xff] }
 0x1f4   : > { %v2088_v16 = vsel %vm2054_vm8, %v4221_v57, 3  ;;  %vm2062_vm11 = vcmp.eq.f32.partialorder %v3543_v61, %v2012_v58 }
 0x1f5   : > { %v4391_v21 = vsel %vm1943_vm1, %v2088_v16, 2147483647  ;;  %v2024_v16 = vpop.xlane.xlu1 %2023  ;;  %v2096_v60 = vsel %vm2062_vm11, %v4221_v57, 3 }
 0x1f6   : > { %v2015_v27 = vpop.xlane.xlu0 %2014  ;;  %v2318_v22 = vshra.s32 %v4391_v21, 16  ;;  %vm2066_vm14 = vcmp.eq.f32.partialorder %v4033_v51, %v2024_v16 }
 0x1f7   : > { %vm2063_vm10 = vcmp.eq.f32.partialorder %v3542_v10, %v2015_v27 }
 0x1f8   : > { %v2097_v2 = vsel %vm2063_vm10, %v4221_v57, 3  ;;  %v4401_v31 = vcvt.s32.f32 %v2318_v22  ;;  %v4416_v22 = vcvt.s32.f32 %v2348_v35  ;;  %v3545_v35 = vld [vmem:[%s3908_s7 + $0xc0] sm:$0xff] }
 0x1f9   : > { %v4405_v46 = vsel %vm1943_vm1, %v2097_v2, 2147483647  ;;  %v4425_v2 = vsel %vm1943_vm1, %v2094_v17, 2147483647  ;;  %vm2064_vm13 = vcmp.eq.f32.partialorder %v3545_v35, %v2018_v25 }
 0x1fa   : > { %5540 = vst [vmem:[#allocation8_spill] sm:$0xff] %v4405_v46  ;;  %2321 = vmin.xlane.f32.xlu1 %v4401_v31  ;;  %v2021_v55 = vpop.xlane.xlu0 %2020  ;;  %v2453_v29 = vshra.s32 %v4405_v46, 16  ;;  %v2408_v61 = vshra.s32 %v4425_v2, 16  ;;  %v2098_v17 = vsel %vm2064_vm13, %v4221_v57, 3  ;;  %v3546_v46 = vld [vmem:[%s3908_s7 + $0xd8] sm:$0xff] }
 0x1fb   : > { %vm2065_vm12 = vcmp.eq.f32.partialorder %v3544_v8, %v2021_v55  ;;  %v4432_v55 = vcvt.s32.f32 %v2378_v48  ;;  %v4438_v8 = vsel %vm1943_vm1, %v2096_v60, 2147483647  ;;  %v4448_v48 = vsel %vm1943_vm1, %v2098_v17, 2147483647 }
 0x1fc   : > { %v2099_v27 = vsel %vm2065_vm12, %v4221_v57, 3  ;;  %v4418_v34 = vcvt.s32.f32 %v2453_v29  ;;  %v4444_v6 = vcvt.s32.f32 %v2408_v61  ;;  %v2438_v25 = vshra.s32 %v4438_v8, 16  ;;  %5544 = vst [vmem:[#allocation12_spill] sm:$0xff] %v4448_v48 }
 0x1fd   : > { %v4422_v10 = vsel %vm1943_vm1, %v2099_v27, 2147483647  ;;  %v2030_v27 = vpop.xlane.xlu1 %2029  ;;  %v2100_v60 = vsel %vm2066_vm14, %v4221_v57, 3  ;;  %v2468_v51 = vshra.s32 %v4448_v48, 16 }
 0x1fe   : > { %5541 = vst [vmem:[#allocation9_spill] sm:$0xff] %v4418_v34  ;;  %5542 = vst [vmem:[#allocation10_spill] sm:$0xff] %v4422_v10  ;;  %2351 = vmin.xlane.f32.xlu1 %v4416_v22  ;;  %2456 = vmin.xlane.f32.xlu0 %v4418_v34  ;;  %v2483_v58 = vshra.s32 %v4422_v10, 16  ;;  %vm2068_vm15 = vcmp.eq.f32.partialorder %v4047_v43, %v2030_v27  ;;  %v4457_v16 = vsel %vm1943_vm1, %v2100_v60, 2147483647 }
 0x1ff   : > { %5546 = vst [vmem:[#allocation14_spill] sm:$0xff] %v4457_v16  ;;  %v2102_v17 = vsel %vm2068_vm15, %v4221_v57, 3  ;;  %v2498_v48 = vshra.s32 %v4457_v16, 16 }
 0x200   : > { %v4434_v29 = vcvt.s32.f32 %v2483_v58  ;;  %v4468_v60 = vsel %vm1943_vm1, %v2102_v17, 2147483647 }
 0x201   : > { %v2036_v10 = vpop.xlane.xlu1 %2035 }
 0x202   : > { %5543 = vst [vmem:[#allocation11_spill] sm:$0xff] %v4434_v29  ;;  %2381 = vmin.xlane.f32.xlu1 %v4432_v55  ;;  %2486 = vmin.xlane.f32.xlu0 %v4434_v29  ;;  %v4453_v29 = vcvt.s32.f32 %v2438_v25  ;;  %vm2070_vm2 = vcmp.eq.f32.partialorder %v4060_v40, %v2036_v10  ;;  %v4464_v25 = vcvt.s32.f32 %v2468_v51  ;;  %v4478_v51 = vcvt.s32.f32 %v2498_v48 }
 0x204   : > { %5545 = vst [vmem:[#allocation13_spill] sm:$0xff] %v4453_v29 }
 0x206   : > { %2411 = vmin.xlane.f32.xlu1 %v4444_v6  ;;  %v1404_v58 = vpop.xlane.xlu0 %1403 }
 0x207   : > { %v1405_v35 = vrot.slane %v1404_v58, 4 }
 0x209   : > { %v1406_v61 = vadd.f32 %v1405_v35, %v1404_v58 }
 0x20a   : > { %2441 = vmin.xlane.f32.xlu1 %v4453_v29  ;;  %v2027_v34 = vpop.xlane.xlu0 %2026  ;;  %v2104_v29 = vsel %vm2070_vm2, %v4221_v57, 3 }
 0x20b   : > { %vm2067_vm3 = vcmp.eq.f32.partialorder %v3546_v46, %v2027_v34  ;;  %v1407_v43 = vrot.slane %v1406_v61, 2 }
 0x20c   : > { %v2101_v27 = vsel %vm2067_vm3, %v4221_v57, 3 }
 0x20d   : > { %v4471_v58 = vsel %vm1943_vm1, %v2101_v27, 2147483647  ;;  %v1408_v35 = vadd.f32 %v1407_v43, %v1406_v61  ;;  %v2528_v27 = vshra.s32 %v4468_v60, 16  ;;  %v4484_v61 = vsel %vm1943_vm1, %v2104_v29, 2147483647 }
 0x20e   : > { %2471 = vmin.xlane.f32.xlu1 %v4464_v25  ;;  %v2033_v40 = vpop.xlane.xlu0 %2032  ;;  %v2513_v46 = vshra.s32 %v4471_v58, 16 }
 0x20f   : > { %vm2069_vm4 = vcmp.eq.f32.partialorder %v4040_v14, %v2033_v40  ;;  %v1409_v34 = vrot.slane %v1408_v35, 1 }
 0x210   : > { %v2103_v10 = vsel %vm2069_vm4, %v4221_v57, 3  ;;  %v4480_v17 = vcvt.s32.f32 %v2513_v46  ;;  %v4494_v46 = vcvt.s32.f32 %v2528_v27  ;;  %v2122_v27 = vand.u32 65535, %v4228_v47 }
 0x211   : > { %v1410_v43 = vadd.f32 %v1409_v34, %v1408_v35  ;;  %v4487_v16 = vsel %vm1943_vm1, %v2103_v10, 2147483647  ;;  %v2558_v35 = vshra.s32 %v4484_v61, 16  ;;  %v2167_v47 = vand.u32 65535, %v4261_v23 }
 0x212   : > { %5547 = vst [vmem:[#allocation15_spill] sm:$0xff] %v4487_v16  ;;  %2501 = vmin.xlane.f32.xlu1 %v4478_v51  ;;  %2516 = vmin.xlane.f32.xlu0 %v4480_v17  ;;  %v2039_v14 = vpop.xlane.xlu0 %2038  ;;  %v2543_v40 = vshra.s32 %v4487_v16, 16  ;;  %v2197_v23 = vand.u32 65535, %v4279_v13  ;;  %v2242_v13 = vand.u32 65535, %v4294_v39  ;;  %v2272_v39 = vand.u32 65535, %v4312_v11 }
 0x213   : > { %vm2071_vm5 = vcmp.eq.f32.partialorder %v4054_v7, %v2039_v14  ;;  %3344 = vpush %v1410_v43  ;;  %v4505_v16 = vcvt.s32.f32 %v2558_v35  ;;  %v2137_v43 = vand.u32 65535, %v4243_v9  ;;  %v2152_v35 = vand.u32 65535, %v4240_v5 }
 0x214   : > { %v2105_v48 = vsel %vm2071_vm5, %v4221_v57, 3  ;;  %v4496_v29 = vcvt.s32.f32 %v2543_v40  ;;  %v2107_v57 = vand.u32 65535, %v4231_v1  ;;  %v2182_v5 = vand.u32 65535, %v4255_v18 }
 0x215   : > { %v4500_v34 = vsel %vm1943_vm1, %v2105_v48, 2147483647  ;;  %v2212_v18 = vand.u32 65535, %v4276_v30 }
 0x216   : > { %5548 = vst [vmem:[#allocation16_spill] sm:$0xff] %v4500_v34  ;;  %2531 = vmin.xlane.f32.xlu1 %v4494_v46  ;;  %2546 = vmin.xlane.f32.xlu0 %v4496_v29  ;;  %v2573_v10 = vshra.s32 %v4500_v34, 16  ;;  %v2109_v48 = vcvt.s32.f32 %v2107_v57  ;;  %v2124_v34 = vcvt.s32.f32 %v2122_v27  ;;  %v2139_v57 = vcvt.s32.f32 %v2137_v43 }
 0x217   : > { %v2154_v27 = vcvt.s32.f32 %v2152_v35  ;;  %v2169_v43 = vcvt.s32.f32 %v2167_v47  ;;  %v2184_v35 = vcvt.s32.f32 %v2182_v5  ;;  %v2214_v30 = vcvt.s32.f32 %v2212_v18  ;;  %v3548_v18 = vld [vmem:[%s3906_s6 + $0x8] sm:$0xff] }
 0x218   : > { %v4507_v7 = vcvt.s32.f32 %v2573_v10 }
 0x21a   : > { %5549 = vst [vmem:[#allocation17_spill] sm:$0xff] %v4507_v7  ;;  %2561 = vmin.xlane.f32.xlu1 %v4505_v16  ;;  %2576 = vmin.xlane.f32.xlu0 %v4507_v7 }
 0x244   : > { %s3345_s17 = spop %3344 }
 0x255   : > { %v4514_v14 = vpop.xlane.xlu1 %2111  ;;  %v4516_v40 = vpop.xlane.xlu0 %2126 }
 0x256   : > { %vm2113_vm1 = vcmp.eq.f32.partialorder %v4249_v12, %v4514_v14  ;;  %vm2128_vm6 = vcmp.eq.f32.partialorder %v4247_v62, %v4516_v40 }
 0x257   : > { %v2114_v10 = vsel %vm2113_vm1, %v2109_v48, inf  ;;  %v2129_v1 = vsel %vm2128_vm6, %v2124_v34, inf }
 0x258   : > { %2115 = vmin.xlane.f32.xlu1 %v2114_v10  ;;  %2130 = vmin.xlane.f32.xlu0 %v2129_v1  ;;  %v2227_v10 = vand.u32 65535, %v4297_v41  ;;  %v2257_v41 = vand.u32 65535, %v4315_v50 }
 0x259   : > { %v4524_v9 = vpop.xlane.xlu1 %2141  ;;  %v4526_v7 = vpop.xlane.xlu0 %2156 }
 0x25a   : > { %vm2143_vm7 = vcmp.eq.f32.partialorder %v4268_v53, %v4524_v9  ;;  %vm2158_vm8 = vcmp.eq.f32.partialorder %v4266_v26, %v4526_v7 }
 0x25b   : > { %v2144_v62 = vsel %vm2143_vm7, %v2139_v57, inf  ;;  %v2159_v12 = vsel %vm2158_vm8, %v2154_v27, inf  ;;  %v2199_v57 = vcvt.s32.f32 %v2197_v23  ;;  %v2259_v23 = vcvt.s32.f32 %v2257_v41  ;;  %v3551_v41 = vld [vmem:[%s3906_s6 + $0x20] sm:$0xff] }
 0x25c   : > { %2145 = vmin.xlane.f32.xlu1 %v2144_v62  ;;  %2160 = vmin.xlane.f32.xlu0 %v2159_v12  ;;  %v2229_v62 = vcvt.s32.f32 %v2227_v10  ;;  %v2244_v12 = vcvt.s32.f32 %v2242_v13 }
 0x25d   : > { %v4534_v34 = vpop.xlane.xlu1 %2171  ;;  %v4536_v48 = vpop.xlane.xlu0 %2186 }
 0x25e   : > { %vm2173_vm9 = vcmp.eq.f32.partialorder %v4289_v33, %v4534_v34  ;;  %vm2188_vm10 = vcmp.eq.f32.partialorder %v4287_v32, %v4536_v48 }
 0x25f   : > { %v2174_v26 = vsel %vm2173_vm9, %v2169_v43, inf  ;;  %v2189_v53 = vsel %vm2188_vm10, %v2184_v35, inf  ;;  %v2274_v43 = vcvt.s32.f32 %v2272_v39  ;;  %v3547_v35 = vld [vmem:[%s3906_s6] sm:$0xff]  ;;  %v3550_v39 = vld [vmem:[%s3906_s6 + $0x18] sm:$0xff] }
 0x260   : > { %2175 = vmin.xlane.f32.xlu1 %v2174_v26  ;;  %2190 = vmin.xlane.f32.xlu0 %v2189_v53  ;;  %v3549_v26 = vld [vmem:[%s3906_s6 + $0x10] sm:$0xff]  ;;  %v2287_v53 = vand.u32 65535, %v4332_v4  ;;  %v2317_v4 = vand.u32 65535, %v4391_v21  ;;  %v2332_v21 = vand.u32 65535, %v4345_v59 }
 0x261   : > { %v4545_v1 = vpop.xlane.xlu1 %2201  ;;  %v4547_v47 = vpop.xlane.xlu0 %2216 }
 0x262   : > { %vm2203_vm11 = vcmp.eq.f32.partialorder %v4307_v42, %v4545_v1  ;;  %vm2218_vm12 = vcmp.eq.f32.partialorder %v4305_v36, %v4547_v47  ;;  %v2289_v10 = vcvt.s32.f32 %v2287_v53 }
 0x263   : > { %v2204_v32 = vsel %vm2203_vm11, %v2199_v57, inf  ;;  %v2219_v33 = vsel %vm2218_vm12, %v2214_v30, inf }
 0x264   : > { %2205 = vmin.xlane.f32.xlu1 %v2204_v32  ;;  %2220 = vmin.xlane.f32.xlu0 %v2219_v33 }
 0x265   : > { %v4555_v27 = vpop.xlane.xlu1 %2231  ;;  %v4557_v5 = vpop.xlane.xlu0 %2246 }
 0x266   : > { %vm2233_vm13 = vcmp.eq.f32.partialorder %v4324_v54, %v4555_v27  ;;  %vm2248_vm14 = vcmp.eq.f32.partialorder %v4322_v52, %v4557_v5 }
 0x267   : > { %v2234_v36 = vsel %vm2233_vm13, %v2229_v62, inf  ;;  %v2249_v42 = vsel %vm2248_vm14, %v2244_v12, inf }
 0x268   : > { %2235 = vmin.xlane.f32.xlu1 %v2234_v36  ;;  %2250 = vmin.xlane.f32.xlu0 %v2249_v42  ;;  %v2347_v36 = vand.u32 65535, %v4394_v24 }
 0x269   : > { %v4563_v11 = vpop.xlane.xlu1 %2261  ;;  %v4565_v50 = vpop.xlane.xlu0 %2276 }
 0x26a   : > { %vm2263_vm15 = vcmp.eq.f32.partialorder %v4340_v49, %v4563_v11  ;;  %vm2278_vm2 = vcmp.eq.f32.partialorder %v4338_v0, %v4565_v50  ;;  %v2302_v0 = vand.u32 65535, %v4329_v63  ;;  %v2319_v63 = vcvt.s32.f32 %v2317_v4  ;;  %v3555_v4 = vld [vmem:[%s3906_s6 + $0x40] sm:$0xff] }
 0x26b   : > { %v2264_v54 = vsel %vm2263_vm15, %v2259_v23, inf  ;;  %v2279_v52 = vsel %vm2278_vm2, %v2274_v43, inf  ;;  %v2362_v23 = vand.u32 65535, %v4356_v37  ;;  %v2349_v59 = vcvt.s32.f32 %v2347_v36  ;;  %v3558_v36 = vld [vmem:[%s3906_s6 + $0x58] sm:$0xff] }
 0x26c   : > { %2265 = vmin.xlane.f32.xlu1 %v2264_v54  ;;  %2280 = vmin.xlane.f32.xlu0 %v2279_v52  ;;  %v2304_v32 = vcvt.s32.f32 %v2302_v0  ;;  %v2392_v37 = vand.u32 65535, %v4366_v3  ;;  %v3554_v0 = vld [vmem:[%s3906_s6 + $0x38] sm:$0xff] }
 0x26d   : > { %v4578_v49 = vpop.xlane.xlu1 %2291  ;;  %v4583_v13 = vpop.xlane.xlu0 %2306  ;;  %v2364_v52 = vcvt.s32.f32 %v2362_v23 }
 0x26e   : > { %vm2293_vm3 = vcmp.eq.f32.partialorder %v4352_v15, %v4578_v49  ;;  %vm2308_vm4 = vcmp.eq.f32.partialorder %v4350_v19, %v4583_v13  ;;  %v3552_v19 = vld [vmem:[%s3906_s6 + $0x28] sm:$0xff]  ;;  %v2394_v3 = vcvt.s32.f32 %v2392_v37 }
 0x26f   : > { %v2294_v57 = vsel %vm2293_vm3, %v2289_v10, inf  ;;  %v2309_v33 = vsel %vm2308_vm4, %v2304_v32, inf  ;;  %v2422_v10 = vand.u32 65535, %v4378_v20  ;;  %v2437_v32 = vand.u32 65535, %v4438_v8 }
 0x271   : > { %v4599_v62 = vpop.xlane.xlu0 %2336  ;;  %v2424_v20 = vcvt.s32.f32 %v2422_v10 }
 0x272   : > { %vm2338_vm1 = vcmp.eq.f32.partialorder %v4362_v28, %v4599_v62  ;;  %v2377_v28 = vand.u32 65535, %v4408_v45  ;;  %v2407_v45 = vand.u32 65535, %v4425_v2 }
 0x275   : > { %v4609_v43 = vpop.xlane.xlu0 %2366 }
 0x276   : > { %vm2368_vm7 = vcmp.eq.f32.partialorder %v4370_v38, %v4609_v43  ;;  %v2379_v38 = vcvt.s32.f32 %v2377_v28 }
 0x27d   : > { %2714 = vrot.lane.b32.xlu1 %v3547_v35, %s3700_s14  ;;  %v2369_v35 = vsel %vm2368_vm7, %v2364_v52, inf  ;;  %v5554_v52 = vld [vmem:[#allocation10_spill] sm:$0xff] }
 0x282   : > { %2716 = vrot.lane.b32.xlu0 %v3548_v18, %s3700_s14  ;;  %v3553_v18 = vld [vmem:[%s3906_s6 + $0x30] sm:$0xff] }
 0x286   : > { %2718 = vrot.lane.b32.xlu0 %v3549_v26, %s3700_s14 }
 0x287   : > { %v4588_v30 = vpop.xlane.xlu1 %2321 }
 0x288   : > { %vm2323_vm5 = vcmp.eq.f32.partialorder %v4401_v31, %v4588_v30  ;;  %v2334_v31 = vcvt.s32.f32 %v2332_v21  ;;  %v3557_v21 = vld [vmem:[%s3906_s6 + $0x50] sm:$0xff] }
 0x289   : > { %v2324_v15 = vsel %vm2323_vm5, %v2319_v63, inf }
 0x28a   : > { %v2339_v12 = vsel %vm2338_vm1, %v2334_v31, inf  ;;  %v5552_v31 = vld [vmem:[#allocation9_spill] sm:$0xff] }
 0x28b   : > { %v4604_v42 = vpop.xlane.xlu1 %2351 }
 0x28c   : > { %vm2353_vm6 = vcmp.eq.f32.partialorder %v4416_v22, %v4604_v42  ;;  %v4619_v22 = vpop.xlane.xlu0 %2396 }
 0x28d   : > { %v2354_v54 = vsel %vm2353_vm6, %v2349_v59, inf  ;;  %vm2398_vm9 = vcmp.eq.f32.partialorder %v4374_v44, %v4619_v22  ;;  %v2409_v44 = vcvt.s32.f32 %v2407_v45  ;;  %v5553_v59 = vld [vmem:[#allocation12_spill] sm:$0xff]  ;;  %v5555_v45 = vld [vmem:[#allocation11_spill] sm:$0xff] }
 0x28f   : > { %v4614_v24 = vpop.xlane.xlu1 %2381 }
 0x290   : > { %vm2383_vm8 = vcmp.eq.f32.partialorder %v4432_v55, %v4614_v24  ;;  %v2399_v55 = vsel %vm2398_vm9, %v2394_v3, inf  ;;  %v3560_v3 = vld [vmem:[%s3906_s6 + $0x68] sm:$0xff]  ;;  %vm2842_vm9 = vcmask 23552  }
 0x291   : > { %v2384_v26 = vsel %vm2383_vm8, %v2379_v38, inf }
 0x293   : > { %v4626_v53 = vpop.xlane.xlu1 %2411 }
 0x294   : > { %vm2413_vm10 = vcmp.eq.f32.partialorder %v4444_v6, %v4626_v53  ;;  %v3556_v6 = vld [vmem:[%s3906_s6 + $0x48] sm:$0xff] }
 0x295   : > { %v2414_v2 = vsel %vm2413_vm10, %v2409_v44, inf  ;;  %v2512_v44 = vand.u32 65535, %v4471_v58  ;;  %v2527_v58 = vand.u32 65535, %v4468_v60 }
 0x2a1   : > { %2295 = vmin.xlane.f32.xlu1 %v2294_v57  ;;  %v4633_v57 = vpop.xlane.xlu0 %2426 }
 0x2a2   : > { %vm2428_vm11 = vcmp.eq.f32.partialorder %v4382_v56, %v4633_v57  ;;  %v2439_v56 = vcvt.s32.f32 %v2437_v32  ;;  %v3561_v32 = vld [vmem:[%s3906_s6 + $0x70] sm:$0xff] }
 0x2a3   : > { %v2429_v63 = vsel %vm2428_vm11, %v2424_v20, inf }
 0x2a5   : > { %2310 = vmin.xlane.f32.xlu0 %v2309_v33  ;;  %v4640_v33 = vpop.xlane.xlu1 %2441 }
 0x2a9   : > { %2325 = vmin.xlane.f32.xlu0 %v2324_v15  ;;  %v5550_v15 = vld [vmem:[#allocation13_spill] sm:$0xff] }
 0x2aa   : > { %vm2443_vm12 = vcmp.eq.f32.partialorder %v5550_v15, %v4640_v33  ;;  %v3562_v15 = vld [vmem:[%s3906_s6 + $0x78] sm:$0xff] }
 0x2ab   : > { %v2444_v8 = vsel %vm2443_vm12, %v2439_v56, inf }
 0x2b2   : > { %2720 = vrot.lane.b32.xlu1 %v3550_v39, %s3700_s14  ;;  %v5551_v39 = vld [vmem:[#allocation8_spill] sm:$0xff] }
 0x2bf   : > { %2722 = vrot.lane.b32.xlu0 %v3551_v41, %s3700_s14  ;;  %v2452_v41 = vand.u32 65535, %v5551_v39 }
 0x2c1   : > { %v2454_v23 = vcvt.s32.f32 %v2452_v41  ;;  %v5557_v41 = vld [vmem:[#allocation15_spill] sm:$0xff] }
 0x2c3   : > { %2724 = vrot.lane.b32.xlu0 %v3552_v19, %s3700_s14  ;;  %v4647_v19 = vpop.xlane.xlu0 %2456 }
 0x2c4   : > { %vm2458_vm13 = vcmp.eq.f32.partialorder %v5552_v31, %v4647_v19 }
 0x2c5   : > { %v2459_v28 = vsel %vm2458_vm13, %v2454_v23, inf  ;;  %v2557_v23 = vand.u32 65535, %v4484_v61  ;;  %v5559_v61 = vld [vmem:[#allocation17_spill] sm:$0xff] }
 0x2c7   : > { %v4661_v37 = vpop.xlane.xlu0 %2486 }
 0x2c8   : > { %vm2488_vm15 = vcmp.eq.f32.partialorder %v5555_v45, %v4661_v37 }
 0x2d6   : > { %2340 = vmin.xlane.f32.xlu1 %v2339_v12  ;;  %v4653_v12 = vpop.xlane.xlu1 %2471 }
 0x2d7   : > { %vm2473_vm14 = vcmp.eq.f32.partialorder %v4464_v25, %v4653_v12 }
 0x2e2   : > { %2355 = vmin.xlane.f32.xlu0 %v2354_v54  ;;  %v2467_v54 = vand.u32 65535, %v5553_v59 }
 0x2e4   : > { %v2469_v38 = vcvt.s32.f32 %v2467_v54  ;;  %v5558_v54 = vld [vmem:[#allocation16_spill] sm:$0xff] }
 0x2e6   : > { %2370 = vmin.xlane.f32.xlu0 %v2369_v35  ;;  %v2482_v35 = vand.u32 65535, %v5554_v52 }
 0x2e7   : > { %2726 = vrot.lane.b32.xlu1 %v3553_v18, %s3700_s14  ;;  %v3559_v18 = vld [vmem:[%s3906_s6 + $0x60] sm:$0xff] }
 0x2e8   : > { %v2484_v25 = vcvt.s32.f32 %v2482_v35  ;;  %v2559_v35 = vcvt.s32.f32 %v2557_v23  ;;  %v3578_v23 = vld [vmem:[%s3906_s6 + $0xf8] sm:$0xff] }
 0x2ea   : > { %2385 = vmin.xlane.f32.xlu0 %v2384_v26  ;;  %v2474_v26 = vsel %vm2473_vm14, %v2469_v38, inf  ;;  %v3566_v38 = vld [vmem:[%s3906_s6 + $0x98] sm:$0xff] }
 0x2eb   : > { %2728 = vrot.lane.b32.xlu1 %v3554_v0, %s3700_s14  ;;  %v4667_v0 = vpop.xlane.xlu1 %2501 }
 0x2ec   : > { %vm2503_vm2 = vcmp.eq.f32.partialorder %v4478_v51, %v4667_v0  ;;  %v2514_v51 = vcvt.s32.f32 %v2512_v44  ;;  %v3570_v44 = vld [vmem:[%s3906_s6 + $0xc0] sm:$0xff] }
 0x2ee   : > { %2400 = vmin.xlane.f32.xlu0 %v2399_v55  ;;  %v5556_v55 = vld [vmem:[#allocation14_spill] sm:$0xff] }
 0x2ef   : > { %2730 = vrot.lane.b32.xlu1 %v3555_v4, %s3700_s14  ;;  %v2497_v10 = vand.u32 65535, %v5556_v55  ;;  %v2489_v4 = vsel %vm2488_vm15, %v2484_v25, inf  ;;  %v3568_v25 = vld [vmem:[%s3906_s6 + $0xa8] sm:$0xff] }
 0x2f2   : > { %2415 = vmin.xlane.f32.xlu0 %v2414_v2  ;;  %v4675_v2 = vpop.xlane.xlu0 %2516 }
 0x2f3   : > { %2732 = vrot.lane.b32.xlu1 %v3556_v6, %s3700_s14  ;;  %v2499_v6 = vcvt.s32.f32 %v2497_v10  ;;  %vm2518_vm3 = vcmp.eq.f32.partialorder %v4480_v17, %v4675_v2  ;;  %v2529_v17 = vcvt.s32.f32 %v2527_v58  ;;  %v3569_v10 = vld [vmem:[%s3906_s6 + $0xb8] sm:$0xff]  ;;  %v3573_v58 = vld [vmem:[%s3906_s6 + $0xb0] sm:$0xff] }
 0x2f4   : > { %v2519_v39 = vsel %vm2518_vm3, %v2514_v51, inf  ;;  %v3572_v51 = vld [vmem:[%s3906_s6 + $0xd0] sm:$0xff] }
 0x2f5   : > { %v2504_v20 = vsel %vm2503_vm2, %v2499_v6, inf  ;;  %v3571_v6 = vld [vmem:[%s3906_s6 + $0xc8] sm:$0xff] }
 0x2f6   : > { %2430 = vmin.xlane.f32.xlu0 %v2429_v63  ;;  %v4681_v63 = vpop.xlane.xlu1 %2531  ;;  %v4689_v56 = vpop.xlane.xlu0 %2546 }
 0x2f7   : > { %2734 = vrot.lane.b32.xlu1 %v3557_v21, %s3700_s14  ;;  %vm2533_vm4 = vcmp.eq.f32.partialorder %v4494_v46, %v4681_v63  ;;  %v2542_v21 = vand.u32 65535, %v5557_v41  ;;  %vm2548_vm5 = vcmp.eq.f32.partialorder %v4496_v29, %v4689_v56  ;;  %v3565_v29 = vld [vmem:[%s3906_s6 + $0x90] sm:$0xff]  ;;  %v3574_v41 = vld [vmem:[%s3906_s6 + $0xd8] sm:$0xff] }
 0x2f8   : > { %v2534_v31 = vsel %vm2533_vm4, %v2529_v17, inf  ;;  %v3576_v17 = vld [vmem:[%s3906_s6 + $0xe8] sm:$0xff] }
 0x2f9   : > { %v2544_v46 = vcvt.s32.f32 %v2542_v21  ;;  %v3575_v21 = vld [vmem:[%s3906_s6 + $0xe0] sm:$0xff] }
 0x2fa   : > { %2445 = vmin.xlane.f32.xlu0 %v2444_v8  ;;  %v3563_v8 = vld [vmem:[%s3906_s6 + $0x80] sm:$0xff]  ;;  %v4695_v60 = vpop.xlane.xlu1 %2561  ;;  %v4703_v52 = vpop.xlane.xlu0 %2576 }
 0x2fb   : > { %2736 = vrot.lane.b32.xlu1 %v3558_v36, %s3700_s14  ;;  %v3564_v36 = vld [vmem:[%s3906_s6 + $0x88] sm:$0xff]  ;;  %v2549_v59 = vsel %vm2548_vm5, %v2544_v46, inf  ;;  %vm2563_vm1 = vcmp.eq.f32.partialorder %v4505_v16, %v4695_v60  ;;  %vm2578_vm6 = vcmp.eq.f32.partialorder %v5559_v61, %v4703_v52 }
 0x2fe   : > { %2460 = vmin.xlane.f32.xlu0 %v2459_v28  ;;  %v2572_v28 = vand.u32 65535, %v5558_v54  ;;  %v2131_v45 = vpop.xlane.xlu0 %2130 }
 0x2ff   : > { %2738 = vrot.lane.b32.xlu1 %v3559_v18, %s3700_s14  ;;  %v2564_v18 = vsel %vm2563_vm1, %v2559_v35, inf }
 0x300   : > { %v2574_v16 = vcvt.s32.f32 %v2572_v28  ;;  %v2118_v28 = vcvt.f32.s32 %v4514_v14  ;;  %v2132_v14 = vcvt.f32.s32 %v2131_v45 }
 0x302   : > { %2475 = vmin.xlane.f32.xlu0 %v2474_v26  ;;  %v2579_v26 = vsel %vm2578_vm6, %v2574_v16, inf  ;;  %v2161_v55 = vpop.xlane.xlu0 %2160  ;;  %v2148_v16 = vcvt.f32.s32 %v4524_v9 }
 0x303   : > { %2740 = vrot.lane.b32.xlu1 %v3560_v3, %s3700_s14  ;;  %v3567_v3 = vld [vmem:[%s3906_s6 + $0xa0] sm:$0xff] }
 0x306   : > { %2490 = vmin.xlane.f32.xlu0 %v2489_v4  ;;  %v4717_v4 = vpop.xlane.xlu0 %2190 }
 0x307   : > { %2742 = vrot.lane.b32.xlu1 %v3561_v32, %s3700_s14  ;;  %v2116_v32 = vpop.xlane.xlu1 %2115 }
 0x30a   : > { %2505 = vmin.xlane.f32.xlu0 %v2504_v20  ;;  %v4723_v20 = vpop.xlane.xlu0 %2220 }
 0x30b   : > { %2744 = vrot.lane.b32.xlu1 %v3562_v15, %s3700_s14  ;;  %v2146_v15 = vpop.xlane.xlu1 %2145 }
 0x30e   : > { %2520 = vmin.xlane.f32.xlu0 %v2519_v39  ;;  %v4729_v39 = vpop.xlane.xlu0 %2250 }
 0x30f   : > { %2746 = vrot.lane.b32.xlu1 %v3563_v8, %s3700_s14  ;;  %v2176_v8 = vpop.xlane.xlu1 %2175 }
 0x312   : > { %2535 = vmin.xlane.f32.xlu0 %v2534_v31  ;;  %v3577_v31 = vld [vmem:[%s3906_s6 + $0xf0] sm:$0xff] }
 0x313   : > { %2748 = vrot.lane.b32.xlu1 %v3564_v36, %s3700_s14  ;;  %v4739_v36 = vpop.xlane.xlu0 %2280  ;;  %v4741_v46 = vpop.xlane.xlu1 %2205 }
 0x316   : > { %2550 = vmin.xlane.f32.xlu0 %v2549_v59 }
 0x317   : > { %2750 = vrot.lane.b32.xlu1 %v3565_v29, %s3700_s14  ;;  %v2717_v59 = vpop.permute.xlu0 %2716  ;;  %v4745_v54 = vpop.xlane.xlu1 %2235  ;;  %v3701_v29 = vmov 4  }
 0x318   : > { %3390 = vset.pattern.permute.xlu0 %v3701_v29  ;;  %3391 = vset.pattern.permute.xlu1 %v3701_v29 }
 0x31a   : > { %2565 = vmin.xlane.f32.xlu0 %v2564_v18  ;;  %v2117_v18 = vcvt.f32.s32 %v2116_v32 }
 0x31b   : > { %2752 = vrot.lane.b32.xlu1 %v3566_v38, %s3700_s14  ;;  %v2719_v35 = vpop.permute.xlu0 %2718  ;;  %v4748_v61 = vpop.xlane.xlu1 %2265  ;;  %v2119_v38 = vshll.u32 %v2118_v28, 16  ;;  %v2177_v28 = vcvt.f32.s32 %v2176_v8 }
 0x31e   : > { %2580 = vmin.xlane.f32.xlu0 %v2579_v26 }
 0x31f   : > { %2754 = vrot.lane.b32.xlu1 %v3567_v3, %s3700_s14  ;;  %v2120_v3 = vadd.s32 %v2119_v38, %v2117_v18 }
 0x323   : > { %2756 = vrot.lane.b32.xlu1 %v3568_v25, %s3700_s14  ;;  %v2147_v25 = vcvt.f32.s32 %v2146_v15 }
 0x327   : > { %2760 = vrot.lane.b32.xlu1 %v3569_v10, %s3700_s14  ;;  %v2133_v10 = vcvt.f32.s32 %v4516_v40  ;;  %v3702_v40 = vmov 0.0  }
 0x329   : > { %v2134_v32 = vshll.u32 %v2133_v10, 16 }
 0x32b   : > { %2762 = vrot.lane.b32.xlu1 %v3570_v44, %s3700_s14  ;;  %v2149_v44 = vshll.u32 %v2148_v16, 16  ;;  %v2135_v15 = vadd.s32 %v2134_v32, %v2132_v14  ;;  %v2208_v16 = vcvt.f32.s32 %v4545_v1  ;;  %v2207_v14 = vcvt.f32.s32 %v4741_v46 }
 0x32c   : > { %v2238_v46 = vcvt.f32.s32 %v4555_v27 }
 0x32e   : > { %v2239_v27 = vshll.u32 %v2238_v46, 16  ;;  %v2298_v46 = vcvt.f32.s32 %v4578_v49 }
 0x32f   : > { %2764 = vrot.lane.b32.xlu1 %v3571_v6, %s3700_s14  ;;  %v2163_v6 = vcvt.f32.s32 %v4526_v7 }
 0x331   : > { %v2164_v9 = vshll.u32 %v2163_v6, 16  ;;  %v2223_v6 = vcvt.f32.s32 %v4547_v47  ;;  %v2222_v47 = vcvt.f32.s32 %v4723_v20  ;;  %v2237_v20 = vcvt.f32.s32 %v4745_v54 }
 0x332   : > { %v4751_v26 = vpop.xlane.xlu0 %2310 }
 0x333   : > { %2766 = vrot.lane.b32.xlu1 %v3572_v51, %s3700_s14  ;;  %v2715_v51 = vpop.permute.xlu1 %2714 }
 0x334   : > { %2758 = vrot.lane.b32.xlu0 %v3573_v58, %s3700_s14  ;;  %v2150_v58 = vadd.s32 %v2149_v44, %v2147_v25 }
 0x337   : > { %2768 = vrot.lane.b32.xlu1 %v3574_v41, %s3700_s14  ;;  %v2162_v41 = vcvt.f32.s32 %v2161_v55  ;;  %v4761_v7 = vpop.xlane.xlu1 %2295  ;;  %v2192_v55 = vcvt.f32.s32 %v4717_v4 }
 0x338   : > { %2770 = vrot.lane.b32.xlu0 %v3575_v21, %s3700_s14  ;;  %v5560_v21 = vld [vmem:[#allocation7_spill] sm:$0xff] }
 0x339   : > { %vm2586_vm7 = vcmp.eq.s32.totalorder %v5560_v21, %v2120_v3  ;;  %v2165_v45 = vadd.s32 %v2164_v9, %v2162_v41  ;;  %vm2588_vm8 = vcmp.eq.s32.totalorder %v5560_v21, %v2150_v58  ;;  %vm2587_vm10 = vcmp.eq.s32.totalorder %v5560_v21, %v2135_v15 }
 0x33a   : > { %v3306_v29 = vsel %vm2586_vm7, 1.0, %v3702_v40  ;;  %v3307_v1 = vsel %vm2587_vm10, 1.0, %v3702_v40 }
 0x33b   : > { %2772 = vrot.lane.b32.xlu1 %v3576_v17, %s3700_s14  ;;  %v2178_v17 = vcvt.f32.s32 %v4534_v34  ;;  %v2810_v18 = vmul.f32 %v3306_v29, %v2715_v51  ;;  %vm2589_vm11 = vcmp.eq.s32.totalorder %v5560_v21, %v2165_v45  ;;  %v2721_v44 = vpop.permute.xlu1 %2720  ;;  %v2209_v51 = vshll.u32 %v2208_v16, 16 }
 0x33c   : > { %2774 = vrot.lane.b32.xlu0 %v3577_v31, %s3700_s14  ;;  %v4757_v31 = vpop.xlane.xlu0 %2325  ;;  %v3309_v58 = vsel %vm2589_vm11, 1.0, %v3702_v40  ;;  %v2811_v41 = vmul.f32 %v3307_v1, %v2717_v59  ;;  %v2267_v1 = vcvt.f32.s32 %v4748_v61 }
 0x33d   : > { %v2179_v38 = vshll.u32 %v2178_v17, 16  ;;  %v2843_v4 = vsel %vm2842_vm9, %v2810_v18, 0.0  ;;  %v2813_v32 = vmul.f32 %v3309_v58, %v2721_v44  ;;  %v2210_v9 = vadd.s32 %v2209_v51, %v2207_v14 }
 0x33e   : > { %v2846_v59 = vsel %vm2842_vm9, %v2811_v41, 0.0  ;;  %v2268_v44 = vcvt.f32.s32 %v4563_v11 }
 0x33f   : > { %2776 = vrot.lane.b32.xlu1 %v3578_v23, %s3700_s14  ;;  %v2193_v23 = vcvt.f32.s32 %v4536_v48  ;;  %v2180_v3 = vadd.s32 %v2179_v38, %v2177_v28  ;;  %v3308_v48 = vsel %vm2588_vm8, 1.0, %v3702_v40  ;;  %vm2592_vm14 = vcmp.eq.s32.totalorder %v5560_v21, %v2210_v9 }
 0x340   : > { %v2723_v8 = vpop.permute.xlu0 %2722  ;;  %v2812_v10 = vmul.f32 %v3308_v48, %v2719_v35  ;;  %v3312_v48 = vsel %vm2592_vm14, 1.0, %v3702_v40  ;;  %v2269_v41 = vshll.u32 %v2268_v44, 16  ;;  %v2327_v44 = vcvt.f32.s32 %v4757_v31 }
 0x341   : > { %v2194_v34 = vshll.u32 %v2193_v23, 16  ;;  %vm2590_vm12 = vcmp.eq.s32.totalorder %v5560_v21, %v2180_v3  ;;  %v2224_v23 = vshll.u32 %v2223_v6, 16 }
 0x342   : > { %v2849_v35 = vsel %vm2842_vm9, %v2812_v10, 0.0  ;;  %v3310_v15 = vsel %vm2590_vm12, 1.0, %v3702_v40  ;;  %v2252_v10 = vcvt.f32.s32 %v4729_v39  ;;  %v2283_v39 = vcvt.f32.s32 %v4565_v50 }
 0x343   : > { %v2195_v25 = vadd.s32 %v2194_v34, %v2192_v55  ;;  %v2814_v29 = vmul.f32 %v3310_v15, %v2723_v8  ;;  %v2852_v55 = vsel %vm2842_vm9, %v2813_v32, 0.0  ;;  %v2225_v38 = vadd.s32 %v2224_v23, %v2222_v47 }
 0x344   : > { %v2725_v17 = vpop.permute.xlu0 %2724  ;;  %v2253_v34 = vcvt.f32.s32 %v4557_v5  ;;  %v2270_v9 = vadd.s32 %v2269_v41, %v2267_v1  ;;  %v2282_v47 = vcvt.f32.s32 %v4739_v36  ;;  %v2284_v61 = vshll.u32 %v2283_v39, 16 }
 0x345   : > { %vm2591_vm13 = vcmp.eq.s32.totalorder %v5560_v21, %v2195_v25  ;;  %v2855_v16 = vsel %vm2842_vm9, %v2814_v29, 0.0  ;;  %v2240_v25 = vadd.s32 %v2239_v27, %v2237_v20  ;;  %vm2593_vm15 = vcmp.eq.s32.totalorder %v5560_v21, %v2225_v38 }
 0x346   : > { %v3311_v28 = vsel %vm2591_vm13, 1.0, %v3702_v40  ;;  %v2254_v54 = vshll.u32 %v2253_v34, 16  ;;  %v3313_v14 = vsel %vm2593_vm15, 1.0, %v3702_v40  ;;  %vm2596_vm4 = vcmp.eq.s32.totalorder %v5560_v21, %v2270_v9 }
 0x347   : > { %v2815_v45 = vmul.f32 %v3311_v28, %v2725_v17  ;;  %vm2594_vm2 = vcmp.eq.s32.totalorder %v5560_v21, %v2240_v25  ;;  %v2299_v36 = vshll.u32 %v2298_v46, 16  ;;  %v2313_v38 = vcvt.f32.s32 %v4583_v13 }
 0x348   : > { %v2255_v51 = vadd.s32 %v2254_v54, %v2252_v10  ;;  %v3316_v49 = vsel %vm2596_vm4, 1.0, %v3702_v40 }
 0x349   : > { %v2858_v3 = vsel %vm2842_vm9, %v2815_v45, 0.0  ;;  %v2285_v45 = vadd.s32 %v2284_v61, %v2282_v47 }
 0x34a   : > { %vm2595_vm3 = vcmp.eq.s32.totalorder %v5560_v21, %v2255_v51 }
 0x34b   : > { %v3315_v28 = vsel %vm2595_vm3, 1.0, %v3702_v40  ;;  %vm2597_vm5 = vcmp.eq.s32.totalorder %v5560_v21, %v2285_v45 }
 0x34c   : > { %v3317_v10 = vsel %vm2597_vm5, 1.0, %v3702_v40 }
 0x35b   : > { %2844 = vadd.xlane.f32.xlu0 %v2843_v4 }
 0x35f   : > { %2850 = vadd.xlane.f32.xlu0 %v2849_v35  ;;  %v3314_v35 = vsel %vm2594_vm2, 1.0, %v3702_v40 }
 0x363   : > { %v4783_v18 = vpop.xlane.xlu1 %2340  ;;  %2847 = vadd.xlane.f32.xlu1 %v2846_v59  ;;  %2853 = vadd.xlane.f32.xlu0 %v2852_v55  ;;  %v2297_v59 = vcvt.f32.s32 %v4761_v7  ;;  %v2314_v7 = vshll.u32 %v2313_v38, 16 }
 0x364   : > { %v2342_v41 = vcvt.f32.s32 %v4783_v18  ;;  %v2373_v18 = vcvt.f32.s32 %v4609_v43 }
 0x367   : > { %v2727_v8 = vpop.permute.xlu1 %2726  ;;  %2856 = vadd.xlane.f32.xlu1 %v2855_v16  ;;  %2859 = vadd.xlane.f32.xlu0 %v2858_v3  ;;  %v2300_v16 = vadd.s32 %v2299_v36, %v2297_v59  ;;  %v2312_v3 = vcvt.f32.s32 %v4751_v26  ;;  %v2343_v26 = vcvt.f32.s32 %v4599_v62  ;;  %v2388_v36 = vcvt.f32.s32 %v4614_v24 }
 0x368   : > { %v2816_v4 = vmul.f32 %v3312_v48, %v2727_v8  ;;  %v2328_v8 = vcvt.f32.s32 %v4588_v30 }
 0x369   : > { %v2315_v54 = vadd.s32 %v2314_v7, %v2312_v3  ;;  %vm2598_vm1 = vcmp.eq.s32.totalorder %v5560_v21, %v2300_v16  ;;  %v2344_v31 = vshll.u32 %v2343_v26, 16 }
 0x36a   : > { %v2861_v5 = vsel %vm2842_vm9, %v2816_v4, 0.0  ;;  %v3318_v30 = vsel %vm2598_vm1, 1.0, %v3702_v40 }
 0x36b   : > { %v2729_v6 = vpop.permute.xlu1 %2728  ;;  %2862 = vadd.xlane.f32.xlu1 %v2861_v5  ;;  %vm2599_vm6 = vcmp.eq.s32.totalorder %v5560_v21, %v2315_v54  ;;  %v2345_v47 = vadd.s32 %v2344_v31, %v2342_v41 }
 0x36c   : > { %v2817_v58 = vmul.f32 %v3313_v14, %v2729_v6  ;;  %v2329_v6 = vshll.u32 %v2328_v8, 16 }
 0x36d   : > { %vm2601_vm8 = vcmp.eq.s32.totalorder %v5560_v21, %v2345_v47 }
 0x36e   : > { %v2864_v32 = vsel %vm2842_vm9, %v2817_v58, 0.0  ;;  %v2330_v58 = vadd.s32 %v2329_v6, %v2327_v44  ;;  %v3321_v38 = vsel %vm2601_vm8, 1.0, %v3702_v40  ;;  %v2418_v44 = vcvt.f32.s32 %v4626_v53 }
 0x36f   : > { %v2731_v11 = vpop.permute.xlu1 %2730  ;;  %2865 = vadd.xlane.f32.xlu0 %v2864_v32  ;;  %v4801_v17 = vpop.xlane.xlu0 %2355  ;;  %v2358_v32 = vcvt.f32.s32 %v4604_v42 }
 0x370   : > { %v2818_v23 = vmul.f32 %v3314_v35, %v2731_v11  ;;  %v3319_v11 = vsel %vm2599_vm6, 1.0, %v3702_v40  ;;  %vm2600_vm7 = vcmp.eq.s32.totalorder %v5560_v21, %v2330_v58  ;;  %v2419_v58 = vshll.u32 %v2418_v44, 16 }
 0x371   : > { %v2359_v46 = vshll.u32 %v2358_v32, 16 }
 0x372   : > { %v2867_v15 = vsel %vm2842_vm9, %v2818_v23, 0.0  ;;  %v2357_v23 = vcvt.f32.s32 %v4801_v17  ;;  %v2374_v17 = vshll.u32 %v2373_v18, 16 }
 0x373   : > { %v2733_v50 = vpop.permute.xlu1 %2732  ;;  %2868 = vadd.xlane.f32.xlu1 %v2867_v15  ;;  %v4808_v29 = vpop.xlane.xlu0 %2370 }
 0x374   : > { %v2819_v55 = vmul.f32 %v3315_v28, %v2733_v50  ;;  %v3320_v50 = vsel %vm2600_vm7, 1.0, %v3702_v40  ;;  %v2360_v45 = vadd.s32 %v2359_v46, %v2357_v23  ;;  %v2372_v59 = vcvt.f32.s32 %v4808_v29 }
 0x375   : > { %v2403_v29 = vcvt.f32.s32 %v4619_v22 }
 0x376   : > { %v2870_v20 = vsel %vm2842_vm9, %v2819_v55, 0.0  ;;  %vm2602_vm10 = vcmp.eq.s32.totalorder %v5560_v21, %v2360_v45 }
 0x377   : > { %v2735_v27 = vpop.permute.xlu1 %2734  ;;  %2871 = vadd.xlane.f32.xlu0 %v2870_v20  ;;  %v4815_v34 = vpop.xlane.xlu0 %2385  ;;  %v3322_v24 = vsel %vm2602_vm10, 1.0, %v3702_v40 }
 0x378   : > { %v2820_v48 = vmul.f32 %v3316_v49, %v2735_v27  ;;  %v2375_v27 = vadd.s32 %v2374_v17, %v2372_v59  ;;  %v2387_v16 = vcvt.f32.s32 %v4815_v34  ;;  %v2404_v34 = vshll.u32 %v2403_v29, 16 }
 0x379   : > { %v2493_v17 = vcvt.f32.s32 %v4661_v37  ;;  %v2538_v37 = vcvt.f32.s32 %v4681_v63 }
 0x37a   : > { %v2873_v25 = vsel %vm2842_vm9, %v2820_v48, 0.0  ;;  %v2389_v48 = vshll.u32 %v2388_v36, 16  ;;  %vm2603_vm11 = vcmp.eq.s32.totalorder %v5560_v21, %v2375_v27  ;;  %v2448_v36 = vcvt.f32.s32 %v4640_v33 }
 0x37b   : > { %v2737_v13 = vpop.permute.xlu1 %2736  ;;  %2874 = vadd.xlane.f32.xlu1 %v2873_v25  ;;  %v4822_v4 = vpop.xlane.xlu0 %2400  ;;  %v3323_v26 = vsel %vm2603_vm11, 1.0, %v3702_v40 }
 0x37c   : > { %v2821_v5 = vmul.f32 %v3317_v10, %v2737_v13  ;;  %v2390_v13 = vadd.s32 %v2389_v48, %v2387_v16  ;;  %v2402_v10 = vcvt.f32.s32 %v4822_v4  ;;  %v2433_v4 = vcvt.f32.s32 %v4633_v57 }
 0x37d   : > { %v2494_v48 = vshll.u32 %v2493_v17, 16 }
 0x37e   : > { %v2876_v14 = vsel %vm2842_vm9, %v2821_v5, 0.0  ;;  %vm2604_vm12 = vcmp.eq.s32.totalorder %v5560_v21, %v2390_v13 }
 0x37f   : > { %v2739_v51 = vpop.permute.xlu1 %2738  ;;  %2877 = vadd.xlane.f32.xlu0 %v2876_v14  ;;  %v4829_v1 = vpop.xlane.xlu0 %2415  ;;  %v2405_v14 = vadd.s32 %v2404_v34, %v2402_v10  ;;  %v3324_v53 = vsel %vm2604_vm12, 1.0, %v3702_v40 }
 0x380   : > { %v2822_v39 = vmul.f32 %v3318_v30, %v2739_v51  ;;  %v2417_v30 = vcvt.f32.s32 %v4829_v1  ;;  %v2434_v1 = vshll.u32 %v2433_v4, 16 }
 0x381   : > { %vm2605_vm13 = vcmp.eq.s32.totalorder %v5560_v21, %v2405_v14 }
 0x382   : > { %v2879_v62 = vsel %vm2842_vm9, %v2822_v39, 0.0  ;;  %v2420_v32 = vadd.s32 %v2419_v58, %v2417_v30  ;;  %v3325_v23 = vsel %vm2605_vm13, 1.0, %v3702_v40 }
 0x383   : > { %v2741_v35 = vpop.permute.xlu1 %2740  ;;  %2880 = vadd.xlane.f32.xlu1 %v2879_v62  ;;  %v4836_v9 = vpop.xlane.xlu0 %2430 }
 0x384   : > { %v2823_v61 = vmul.f32 %v3319_v11, %v2741_v35  ;;  %v2432_v62 = vcvt.f32.s32 %v4836_v9  ;;  %v2463_v11 = vcvt.f32.s32 %v4647_v19  ;;  %vm2606_vm14 = vcmp.eq.s32.totalorder %v5560_v21, %v2420_v32 }
 0x385   : > { %v3326_v45 = vsel %vm2606_vm14, 1.0, %v3702_v40 }
 0x386   : > { %v2882_v15 = vsel %vm2842_vm9, %v2823_v61, 0.0  ;;  %v2435_v18 = vadd.s32 %v2434_v1, %v2432_v62  ;;  %v2464_v9 = vshll.u32 %v2463_v11, 16 }
 0x387   : > { %v2743_v42 = vpop.permute.xlu1 %2742  ;;  %2883 = vadd.xlane.f32.xlu0 %v2882_v15  ;;  %v4843_v28 = vpop.xlane.xlu0 %2445 }
 0x388   : > { %v2824_v55 = vmul.f32 %v3320_v50, %v2743_v42  ;;  %vm2607_vm15 = vcmp.eq.s32.totalorder %v5560_v21, %v2435_v18  ;;  %v2447_v16 = vcvt.f32.s32 %v4843_v28 }
 0x38a   : > { %v2885_v43 = vsel %vm2842_vm9, %v2824_v55, 0.0 }
 0x38b   : > { %v2745_v20 = vpop.permute.xlu1 %2744  ;;  %2886 = vadd.xlane.f32.xlu1 %v2885_v43  ;;  %v2461_v49 = vpop.xlane.xlu0 %2460 }
 0x38c   : > { %v2825_v3 = vmul.f32 %v3321_v38, %v2745_v20  ;;  %v2462_v46 = vcvt.f32.s32 %v2461_v49  ;;  %v2478_v38 = vcvt.f32.s32 %v4653_v12  ;;  %v3327_v49 = vsel %vm2607_vm15, 1.0, %v3702_v40 }
 0x38e   : > { %v2888_v7 = vsel %vm2842_vm9, %v2825_v3, 0.0  ;;  %v2465_v59 = vadd.s32 %v2464_v9, %v2462_v46  ;;  %v2479_v12 = vshll.u32 %v2478_v38, 16  ;;  %v2568_v9 = vcvt.f32.s32 %v4695_v60 }
 0x38f   : > { %v2747_v8 = vpop.permute.xlu1 %2746  ;;  %2889 = vadd.xlane.f32.xlu0 %v2888_v7  ;;  %v4855_v25 = vpop.xlane.xlu0 %2475  ;;  %v2449_v7 = vshll.u32 %v2448_v36, 16 }
 0x390   : > { %v2826_v54 = vmul.f32 %v3322_v24, %v2747_v8  ;;  %vm2609_vm2 = vcmp.eq.s32.totalorder %v5560_v21, %v2465_v59  ;;  %v2477_v33 = vcvt.f32.s32 %v4855_v25  ;;  %v2508_v24 = vcvt.f32.s32 %v4667_v0 }
 0x391   : > { %v3329_v10 = vsel %vm2609_vm2, 1.0, %v3702_v40 }
 0x392   : > { %v2891_v22 = vsel %vm2842_vm9, %v2826_v54, 0.0  ;;  %v2450_v54 = vadd.s32 %v2449_v7, %v2447_v16  ;;  %v2509_v30 = vshll.u32 %v2508_v24, 16  ;;  %v4929_v24 = vld [vmem:[%s3908_s7 + $0xa0] sm:$0xff] }
 0x393   : > { %v2749_v5 = vpop.permute.xlu1 %2748  ;;  %2892 = vadd.xlane.f32.xlu1 %v2891_v22  ;;  %v2491_v6 = vpop.xlane.xlu0 %2490 }
 0x394   : > { %v2827_v51 = vmul.f32 %v3323_v26, %v2749_v5  ;;  %v2492_v3 = vcvt.f32.s32 %v2491_v6  ;;  %v2539_v5 = vshll.u32 %v2538_v37, 16  ;;  %v2480_v26 = vadd.s32 %v2479_v12, %v2477_v33  ;;  %v4925_v12 = vld [vmem:[%s3908_s7 + $0x40] sm:$0xff] }
 0x395   : > { %v2523_v6 = vcvt.f32.s32 %v4675_v2  ;;  %vm2608_vm4 = vcmp.eq.s32.totalorder %v5560_v21, %v2450_v54  ;;  %v4945_v54 = vld [vmem:[%s3908_s7 + $0x8] sm:$0xff] }
 0x396   : > { %v2894_v41 = vsel %vm2842_vm9, %v2827_v51, 0.0  ;;  %v2495_v34 = vadd.s32 %v2494_v48, %v2492_v3  ;;  %vm2610_vm5 = vcmp.eq.s32.totalorder %v5560_v21, %v2480_v26  ;;  %v2583_v26 = vcvt.f32.s32 %v4703_v52  ;;  %v4976_v52 = vld [vmem:[%s3908_s7 + $0x38] sm:$0xff] }
 0x397   : > { %v2751_v39 = vpop.permute.xlu1 %2750  ;;  %2895 = vadd.xlane.f32.xlu0 %v2894_v41  ;;  %v4867_v31 = vpop.xlane.xlu0 %2505  ;;  %v2524_v41 = vshll.u32 %v2523_v6, 16 }
 0x398   : > { %v2828_v35 = vmul.f32 %v3324_v53, %v2751_v39  ;;  %v2507_v63 = vcvt.f32.s32 %v4867_v31  ;;  %vm2611_vm3 = vcmp.eq.s32.totalorder %v5560_v21, %v2495_v34  ;;  %v2553_v39 = vcvt.f32.s32 %v4689_v56  ;;  %v4949_v34 = vld [vmem:[%s3908_s7 + $0xd8] sm:$0xff] }
 0x399   : > { %v3331_v2 = vsel %vm2611_vm3, 1.0, %v3702_v40  ;;  %v3328_v31 = vsel %vm2608_vm4, 1.0, %v3702_v40  ;;  %5561 = vst [vmem:[#allocation13_spill] sm:$0xff] %v4949_v34  ;;  %v2584_v6 = vshll.u32 %v2583_v26, 16 }
 0x39a   : > { %v2897_v57 = vsel %vm2842_vm9, %v2828_v35, 0.0  ;;  %v2510_v58 = vadd.s32 %v2509_v30, %v2507_v63  ;;  %v4971_v30 = vld [vmem:[%s3908_s7 + $0x30] sm:$0xff] }
 0x39b   : > { %v2753_v47 = vpop.permute.xlu1 %2752  ;;  %2898 = vadd.xlane.f32.xlu1 %v2897_v57  ;;  %v4874_v61 = vpop.xlane.xlu0 %2520  ;;  %v3330_v57 = vsel %vm2610_vm5, 1.0, %v3702_v40 }
 0x39c   : > { %v2829_v15 = vmul.f32 %v3325_v23, %v2753_v47  ;;  %v2522_v4 = vcvt.f32.s32 %v4874_v61  ;;  %vm2612_vm6 = vcmp.eq.s32.totalorder %v5560_v21, %v2510_v58  ;;  %v2554_v61 = vshll.u32 %v2553_v39, 16  ;;  %v4981_v58 = vld [vmem:[%s3908_s7 + $0x48] sm:$0xff]  ;;  %v4990_v39 = vld [vmem:[%s3908_s7 + $0x58] sm:$0xff] }
 0x39e   : > { %v2900_v42 = vsel %vm2842_vm9, %v2829_v15, 0.0  ;;  %v2525_v1 = vadd.s32 %v2524_v41, %v2522_v4 }
 0x39f   : > { %v2755_v50 = vpop.permute.xlu1 %2754  ;;  %2901 = vadd.xlane.f32.xlu0 %v2900_v42  ;;  %v2536_v19 = vpop.xlane.xlu0 %2535 }
 0x3a0   : > { %v2830_v55 = vmul.f32 %v3326_v45, %v2755_v50  ;;  %v2537_v44 = vcvt.f32.s32 %v2536_v19  ;;  %v3332_v45 = vsel %vm2612_vm6, 1.0, %v3702_v40  ;;  %vm2613_vm7 = vcmp.eq.s32.totalorder %v5560_v21, %v2525_v1 }
 0x3a1   : > { %v3333_v38 = vsel %vm2613_vm7, 1.0, %v3702_v40 }
 0x3a2   : > { %v2903_v43 = vsel %vm2842_vm9, %v2830_v55, 0.0  ;;  %v2540_v51 = vadd.s32 %v2539_v5, %v2537_v44  ;;  %v4953_v44 = vld [vmem:[%s3908_s7 + $0x10] sm:$0xff]  ;;  %v4961_v5 = vld [vmem:[%s3908_s7 + $0x20] sm:$0xff] }
 0x3a3   : > { %v2757_v20 = vpop.permute.xlu1 %2756  ;;  %2904 = vadd.xlane.f32.xlu1 %v2903_v43  ;;  %v2551_v27 = vpop.xlane.xlu0 %2550  ;;  %v2569_v43 = vshll.u32 %v2568_v9, 16  ;;  %v5048_v9 = vld [vmem:[%s3908_s7 + $0xc8] sm:$0xff] }
 0x3a4   : > { %v2831_v29 = vmul.f32 %v3327_v49, %v2757_v20  ;;  %vm2614_vm1 = vcmp.eq.s32.totalorder %v5560_v21, %v2540_v51  ;;  %v2552_v11 = vcvt.f32.s32 %v2551_v27 }
 0x3a5   : > { %v3334_v46 = vsel %vm2614_vm1, 1.0, %v3702_v40 }
 0x3a6   : > { %v2906_v8 = vsel %vm2842_vm9, %v2831_v29, 0.0  ;;  %v2555_v50 = vadd.s32 %v2554_v61, %v2552_v11  ;;  %v5022_v11 = vld [vmem:[%s3908_s7 + $0x90] sm:$0xff] }
 0x3a7   : > { %v2761_v13 = vpop.permute.xlu1 %2760  ;;  %2907 = vadd.xlane.f32.xlu0 %v2906_v8  ;;  %v2566_v28 = vpop.xlane.xlu0 %2565 }
 0x3a8   : > { %v2833_v22 = vmul.f32 %v3329_v10, %v2761_v13  ;;  %v2567_v19 = vcvt.f32.s32 %v2566_v28  ;;  %vm2615_vm8 = vcmp.eq.s32.totalorder %v5560_v21, %v2555_v50  ;;  %v4933_v13 = vld [vmem:[%s3908_s7 + $0xb0] sm:$0xff]  ;;  %v4937_v10 = vld [vmem:[%s3908_s7] sm:$0xff] }
 0x3a9   : > { %v3335_v16 = vsel %vm2615_vm8, 1.0, %v3702_v40  ;;  %v4941_v28 = vld [vmem:[%s3908_s7 + $0xc0] sm:$0xff]  ;;  %v5054_v50 = vld [vmem:[%s3908_s7 + $0xd0] sm:$0xff] }
 0x3aa   : > { %v2912_v25 = vsel %vm2842_vm9, %v2833_v22, 0.0  ;;  %v2570_v20 = vadd.s32 %v2569_v43, %v2567_v19  ;;  %v4957_v22 = vld [vmem:[%s3908_s7 + $0x18] sm:$0xff]  ;;  %5562 = vst [vmem:[#allocation8_spill] sm:$0xff] %v5054_v50 }
 0x3ab   : > { %v2763_v14 = vpop.permute.xlu1 %2762  ;;  %2913 = vadd.xlane.f32.xlu0 %v2912_v25  ;;  %v4895_v0 = vpop.xlane.xlu0 %2580  ;;  %v4967_v25 = vld [vmem:[%s3908_s7 + $0x28] sm:$0xff] }
 0x3ac   : > { %v2834_v47 = vmul.f32 %v3330_v57, %v2763_v14  ;;  %vm2616_vm10 = vcmp.eq.s32.totalorder %v5560_v21, %v2570_v20  ;;  %v2582_v63 = vcvt.f32.s32 %v4895_v0 }
 0x3ad   : > { %v3336_v7 = vsel %vm2616_vm10, 1.0, %v3702_v40 }
 0x3ae   : > { %v2915_v55 = vsel %vm2842_vm9, %v2834_v47, 0.0  ;;  %v2585_v14 = vadd.s32 %v2584_v6, %v2582_v63  ;;  %v5028_v47 = vld [vmem:[%s3908_s7 + $0x98] sm:$0xff] }
 0x3af   : > { %v2765_v53 = vpop.permute.xlu1 %2764  ;;  %v2759_v32 = vpop.permute.xlu0 %2758 }
 0x3b0   : > { %v2835_v62 = vmul.f32 %v3331_v2, %v2765_v53  ;;  %v2832_v35 = vmul.f32 %v3328_v31, %v2759_v32  ;;  %vm2617_vm11 = vcmp.eq.s32.totalorder %v5560_v21, %v2585_v14  ;;  %v4986_v21 = vld [vmem:[%s3908_s7 + $0x50] sm:$0xff]  ;;  %v4998_v53 = vld [vmem:[%s3908_s7 + $0x68] sm:$0xff]  ;;  %v5006_v31 = vld [vmem:[%s3908_s7 + $0x78] sm:$0xff] }
 0x3b1   : > { %v3337_v0 = vsel %vm2617_vm11, 1.0, %v3702_v40  ;;  %v4994_v40 = vld [vmem:[%s3908_s7 + $0x60] sm:$0xff]  ;;  %v5002_v2 = vld [vmem:[%s3908_s7 + $0x70] sm:$0xff] }
 0x3b2   : > { %v2918_v23 = vsel %vm2842_vm9, %v2835_v62, 0.0  ;;  %v2909_v56 = vsel %vm2842_vm9, %v2832_v35, 0.0  ;;  %v5012_v62 = vld [vmem:[%s3908_s7 + $0x80] sm:$0xff]  ;;  %v5016_v35 = vld [vmem:[%s3908_s7 + $0x88] sm:$0xff] }
 0x3b3   : > { %v2767_v18 = vpop.permute.xlu1 %2766  ;;  %2919 = vadd.xlane.f32.xlu0 %v2918_v23  ;;  %2910 = vadd.xlane.f32.xlu1 %v2909_v56  ;;  %v2771_v15 = vpop.permute.xlu0 %2770  ;;  %v5034_v56 = vld [vmem:[%s3908_s7 + $0xa8] sm:$0xff] }
 0x3b4   : > { %v2838_v42 = vmul.f32 %v3334_v46, %v2771_v15  ;;  %v2836_v59 = vmul.f32 %v3332_v45, %v2767_v18  ;;  %v5040_v18 = vld [vmem:[%s3908_s7 + $0xb8] sm:$0xff] }
 0x3b6   : > { %v2927_v17 = vsel %vm2842_vm9, %v2838_v42, 0.0  ;;  %v2921_v49 = vsel %vm2842_vm9, %v2836_v59, 0.0  ;;  %v5062_v59 = vld [vmem:[%s3908_s7 + $0xe0] sm:$0xff] }
 0x3b7   : > { %v2769_v36 = vpop.permute.xlu1 %2768  ;;  %2916 = vadd.xlane.f32.xlu1 %v2915_v55  ;;  %2928 = vadd.xlane.f32.xlu0 %v2927_v17  ;;  %v2775_v48 = vpop.permute.xlu0 %2774  ;;  %5563 = vst [vmem:[#allocation9_spill] sm:$0xff] %v5062_v59 }
 0x3b8   : > { %v2837_v60 = vmul.f32 %v3333_v38, %v2769_v36  ;;  %v2840_v37 = vmul.f32 %v3336_v7, %v2775_v48  ;;  %v5070_v36 = vld [vmem:[%s3908_s7 + $0xe8] sm:$0xff]  ;;  %v5076_v38 = vld [vmem:[%s3908_s7 + $0xf0] sm:$0xff] }
 0x3b9   : > { %5564 = vst [vmem:[#allocation12_spill] sm:$0xff] %v5070_v36  ;;  %5565 = vst [vmem:[#allocation10_spill] sm:$0xff] %v5076_v38 }
 0x3ba   : > { %v2924_v29 = vsel %vm2842_vm9, %v2837_v60, 0.0  ;;  %v2933_v8 = vsel %vm2842_vm9, %v2840_v37, 0.0 }
 0x3bb   : > { %v2773_v27 = vpop.permute.xlu1 %2772  ;;  %2922 = vadd.xlane.f32.xlu1 %v2921_v49  ;;  %v5084_v49 = vld [vmem:[%s3908_s7 + $0xf8] sm:$0xff] }
 0x3bc   : > { %v2839_v3 = vmul.f32 %v3335_v16, %v2773_v27  ;;  %5567 = vst [vmem:[#allocation14_spill] sm:$0xff] %v5084_v49 }
 0x3be   : > { %v2930_v33 = vsel %vm2842_vm9, %v2839_v3, 0.0 }
 0x3bf   : > { %2925 = vadd.xlane.f32.xlu1 %v2924_v29  ;;  %v2777_v51 = vpop.permute.xlu1 %2776 }
 0x3c0   : > { %v2841_v4 = vmul.f32 %v3337_v0, %v2777_v51  ;;  %v3612_v51 = vld [vmem:[%s3906_s6 + $0x8] sm:$0xff] }
 0x3c1   : > { %v1413_v0 = vsub.f32 %v3612_v51, %v4945_v54 }
 0x3c2   : > { %v2936_v41 = vsel %vm2842_vm9, %v2841_v4, 0.0  ;;  %vm1796_vm9 = vcmask 15360  }
 0x3c3   : > { %2931 = vadd.xlane.f32.xlu1 %v2930_v33 }
 0x3c7   : > { %2934 = vadd.xlane.f32.xlu1 %v2933_v8  ;;  %v3611_v8 = vld [vmem:[%s3906_s6] sm:$0xff] }
 0x3c8   : > { %v1412_v26 = vsub.f32 %v3611_v8, %v4937_v10 }
 0x3ca   : > { %v1444_v14 = vand.u32 2147483647, %v1412_v26 }
 0x3cd   : > { %1518 = vperm.xlu0 %3390, %v4925_v12  }
 0x3d1   : > { %1578 = vperm.xlu0 %3390, %v4929_v24  }
 0x3d5   : > { %1588 = vperm.xlu0 %3390, %v4933_v13  }
 0x3d8   : > { %1478 = vperm.xlu1 %3391, %v4937_v10  }
 0x3d9   : > { %1598 = vperm.xlu0 %3390, %v4941_v28  }
 0x3dc   : > { %1483 = vperm.xlu1 %3391, %v4945_v54  }
 0x3dd   : > { %1613 = vperm.xlu0 %3390, %v4949_v34  }
 0x3e0   : > { %1488 = vperm.xlu1 %3391, %v4953_v44  }
 0x3e4   : > { %1493 = vperm.xlu1 %3391, %v4957_v22  }
 0x3e8   : > { %1498 = vperm.xlu1 %3391, %v4961_v5   ;;  %v5043_v46 = vpop.xlane.xlu0 %2844 }
 0x3ec   : > { %1503 = vperm.xlu1 %3391, %v4967_v25   ;;  %v5057_v45 = vpop.xlane.xlu0 %2850 }
 0x3f0   : > { %1508 = vperm.xlu1 %3391, %v4971_v30   ;;  %v5009_v32 = vpop.xlane.xlu1 %2847  ;;  %v5065_v55 = vpop.xlane.xlu0 %2853 }
 0x3f4   : > { %1513 = vperm.xlu1 %3391, %v4976_v52   ;;  %v5019_v1 = vpop.xlane.xlu1 %2856  ;;  %v5079_v20 = vpop.xlane.xlu0 %2859 }
 0x3f8   : > { %1523 = vperm.xlu1 %3391, %v4981_v58   ;;  %v5025_v57 = vpop.xlane.xlu1 %2862 }
 0x3fc   : > { %2937 = vadd.xlane.f32.xlu0 %v2936_v41  ;;  %1528 = vperm.xlu1 %3391, %v4986_v21   ;;  %v5087_v27 = vpop.xlane.xlu0 %2865 }
 0x400   : > { %1533 = vperm.xlu1 %3391, %v4990_v39   ;;  %v5031_v23 = vpop.xlane.xlu1 %2868 }
 0x404   : > { %1538 = vperm.xlu1 %3391, %v4994_v40   ;;  %v5091_v3 = vpop.xlane.xlu0 %2871 }
 0x408   : > { %1543 = vperm.xlu1 %3391, %v4998_v53   ;;  %v5037_v61 = vpop.xlane.xlu1 %2874 }
 0x40c   : > { %1548 = vperm.xlu1 %3391, %v5002_v2   ;;  %v5095_v48 = vpop.xlane.xlu0 %2877 }
 0x410   : > { %1553 = vperm.xlu1 %3391, %v5006_v31   ;;  %v5045_v15 = vpop.xlane.xlu1 %2880 }
 0x414   : > { %1558 = vperm.xlu1 %3391, %v5012_v62   ;;  %v5099_v37 = vpop.xlane.xlu0 %2883 }
 0x418   : > { %1563 = vperm.xlu1 %3391, %v5016_v35   ;;  %v5051_v42 = vpop.xlane.xlu1 %2886 }
 0x41c   : > { %1568 = vperm.xlu1 %3391, %v5022_v11   ;;  %v5105_v63 = vpop.xlane.xlu0 %2889 }
 0x420   : > { %1573 = vperm.xlu1 %3391, %v5028_v47   ;;  %v5059_v19 = vpop.xlane.xlu1 %2892 }
 0x424   : > { %1583 = vperm.xlu1 %3391, %v5034_v56   ;;  %v5111_v4 = vpop.xlane.xlu0 %2895 }
 0x428   : > { %1593 = vperm.xlu1 %3391, %v5040_v18   ;;  %v5067_v17 = vpop.xlane.xlu1 %2898 }
 0x42c   : > { %1603 = vperm.xlu1 %3391, %v5048_v9  }
 0x430   : > { %1608 = vperm.xlu1 %3391, %v5054_v50   ;;  %v5073_v43 = vpop.xlane.xlu1 %2904 }
 0x434   : > { %1618 = vperm.xlu1 %3391, %v5062_v59  }
 0x438   : > { %1623 = vperm.xlu1 %3391, %v5070_v36  }
 0x43c   : > { %1628 = vperm.xlu1 %3391, %v5076_v38   ;;  %v3614_v38 = vld [vmem:[%s3906_s6 + $0x18] sm:$0xff] }
 0x43d   : > { %v1415_v51 = vsub.f32 %v3614_v38, %v4957_v22 }
 0x440   : > { %v5081_v60 = vpop.xlane.xlu1 %2910  ;;  %1633 = vperm.xlu1 %3391, %v5084_v49   ;;  %v3613_v49 = vld [vmem:[%s3906_s6 + $0x10] sm:$0xff] }
 0x441   : > { %5566 = vst [vmem:[#allocation11_spill] sm:$0xff] %v5081_v60  ;;  %v3615_v60 = vld [vmem:[%s3906_s6 + $0x20] sm:$0xff] }
 0x442   : > { %v1416_v59 = vsub.f32 %v3615_v60, %v4961_v5  ;;  %v3616_v60 = vld [vmem:[%s3906_s6 + $0x28] sm:$0xff] }
 0x444   : > { %v5089_v16 = vpop.xlane.xlu1 %2916 }
 0x445   : > { %5568 = vst [vmem:[#allocation15_spill] sm:$0xff] %v5089_v16  ;;  %v5115_v16 = vpop.xlane.xlu0 %2901 }
 0x448   : > { %v5093_v29 = vpop.xlane.xlu1 %2922 }
 0x449   : > { %5569 = vst [vmem:[#allocation16_spill] sm:$0xff] %v5093_v29  ;;  %v1445_v29 = vand.u32 2147483647, %v1413_v0  ;;  %v5120_v36 = vpop.xlane.xlu0 %2907 }
 0x44a   : > { %5573 = vst [vmem:[#allocation19_spill] sm:$0xff] %v5120_v36 }
 0x44c   : > { %v5097_v7 = vpop.xlane.xlu1 %2925 }
 0x44d   : > { %5570 = vst [vmem:[#allocation17_spill] sm:$0xff] %v5097_v7  ;;  %v5130_v36 = vpop.xlane.xlu0 %2913 }
 0x450   : > { %v5101_v33 = vpop.xlane.xlu1 %2931 }
 0x451   : > { %5571 = vst [vmem:[#allocation7_spill] sm:$0xff] %v5101_v33  ;;  %v1414_v33 = vsub.f32 %v3613_v49, %v4953_v44 }
 0x454   : > { %v5107_v6 = vpop.xlane.xlu1 %2934 }
 0x455   : > { %5572 = vst [vmem:[#allocation18_spill] sm:$0xff] %v5107_v6  ;;  %v1446_v6 = vand.u32 2147483647, %v1414_v33 }
 0x458   : > { %v1479_v41 = vpop.permute.xlu1 %1478 }
 0x459   : > { %v1636_v7 = vmul.f32 %v1479_v41, %v1444_v14 }
 0x45b   : > { %1700 = vrot.lane.b32.xlu1 %v1636_v7, %s3703_s15  ;;  %v1869_v14 = vsel %vm1796_vm9, %v1636_v7, 0.0 }
 0x45c   : > { %v1484_v8 = vpop.permute.xlu1 %1483 }
 0x45d   : > { %v1637_v26 = vmul.f32 %v1484_v8, %v1445_v29  ;;  %v2939_v29 = vsub.f32 0.0, %v5043_v46  ;;  %v1447_v8 = vand.u32 2147483647, %v1415_v51  ;;  %v1417_v46 = vsub.f32 %v3616_v60, %v4967_v25  ;;  %v5139_v51 = vpop.xlane.xlu0 %2919 }
 0x45f   : > { %v1870_v0 = vsel %vm1796_vm9, %v1637_v26, 0.0  ;;  %1702 = vrot.lane.b32.xlu1 %v1637_v26, %s3703_s15  ;;  %v1448_v26 = vand.u32 2147483647, %v1416_v59 }
 0x460   : > { %v1871_v49 = vadd.f32 %v1870_v0, %v1869_v14  ;;  %v1489_v41 = vpop.permute.xlu1 %1488  ;;  %v2971_v14 = vmul.f32 %v4937_v10, %v2939_v29  ;;  %v2940_v0 = vsub.f32 0.0, %v5009_v32  ;;  %v1449_v32 = vand.u32 2147483647, %v1417_v46 }
 0x461   : > { %v1638_v33 = vmul.f32 %v1489_v41, %v1446_v6 }
 0x462   : > { %v2972_v10 = vmul.f32 %v4945_v54, %v2940_v0  ;;  %v3619_v54 = vld [vmem:[%s3906_s6 + $0x38] sm:$0xff]  ;;  %v5151_v0 = vpop.xlane.xlu0 %2928 }
 0x463   : > { %v1872_v38 = vsel %vm1796_vm9, %v1638_v33, 0.0  ;;  %1704 = vrot.lane.b32.xlu1 %v1638_v33, %s3703_s15 }
 0x464   : > { %v1873_v7 = vadd.f32 %v1872_v38, %v1871_v49  ;;  %v1494_v34 = vpop.permute.xlu1 %1493 }
 0x465   : > { %v1639_v50 = vmul.f32 %v1494_v34, %v1447_v8  ;;  %v3617_v34 = vld [vmem:[%s3906_s6 + $0x30] sm:$0xff]  ;;  %v3618_v8 = vld [vmem:[%s3906_s6 + $0x40] sm:$0xff] }
 0x466   : > { %v1418_v29 = vsub.f32 %v3617_v34, %v4971_v30 }
 0x467   : > { %v1874_v6 = vsel %vm1796_vm9, %v1639_v50, 0.0  ;;  %1706 = vrot.lane.b32.xlu0 %v1639_v50, %s3703_s15  ;;  %3035 = vrot.lane.b32.xlu1 %v2971_v14, %s3698_s8  ;;  %v1420_v50 = vsub.f32 %v3618_v8, %v4925_v12 }
 0x468   : > { %v1875_v49 = vadd.f32 %v1874_v6, %v1873_v7  ;;  %v1499_v59 = vpop.permute.xlu1 %1498  ;;  %v2941_v7 = vsub.f32 0.0, %v5057_v45  ;;  %v1450_v6 = vand.u32 2147483647, %v1418_v29  ;;  %v3620_v45 = vld [vmem:[%s3906_s6 + $0x48] sm:$0xff]  ;;  %v1519_v29 = vpop.permute.xlu0 %1518 }
 0x469   : > { %v1640_v41 = vmul.f32 %v1499_v59, %v1448_v26  ;;  %v1419_v26 = vsub.f32 %v3619_v54, %v4976_v52  ;;  %v1452_v59 = vand.u32 2147483647, %v1420_v50 }
 0x46b   : > { %v1876_v33 = vsel %vm1796_vm9, %v1640_v41, 0.0  ;;  %3037 = vrot.lane.b32.xlu1 %v2972_v10, %s3698_s8  ;;  %v1451_v8 = vand.u32 2147483647, %v1419_v26  ;;  %v1644_v54 = vmul.f32 %v1519_v29, %v1452_v59 }
 0x46c   : > { %v1877_v38 = vadd.f32 %v1876_v33, %v1875_v49  ;;  %v1504_v14 = vpop.permute.xlu1 %1503  ;;  %v2973_v49 = vmul.f32 %v4953_v44, %v2941_v7  ;;  %v3621_v7 = vld [vmem:[%s3906_s6 + $0x50] sm:$0xff] }
 0x46d   : > { %v1641_v60 = vmul.f32 %v1504_v14, %v1449_v32  ;;  %v1421_v32 = vsub.f32 %v3620_v45, %v4981_v58  ;;  %v1884_v26 = vsel %vm1796_vm9, %v1644_v54, 0.0  ;;  %v3622_v45 = vld [vmem:[%s3906_s6 + $0x58] sm:$0xff] }
 0x46f   : > { %v1878_v46 = vsel %vm1796_vm9, %v1641_v60, 0.0  ;;  %1708 = vrot.lane.b32.xlu1 %v1640_v41, %s3703_s15  ;;  %v2942_v41 = vsub.f32 0.0, %v5065_v55  ;;  %v1453_v44 = vand.u32 2147483647, %v1421_v32  ;;  %v1423_v32 = vsub.f32 %v3622_v45, %v4990_v39 }
 0x470   : > { %v1879_v10 = vadd.f32 %v1878_v46, %v1877_v38  ;;  %v1509_v34 = vpop.permute.xlu1 %1508 }
 0x471   : > { %v1642_v33 = vmul.f32 %v1509_v34, %v1450_v6  ;;  %v1422_v6 = vsub.f32 %v3621_v7, %v4986_v21  ;;  %v2974_v59 = vmul.f32 %v4957_v22, %v2942_v41 }
 0x473   : > { %v1880_v14 = vsel %vm1796_vm9, %v1642_v33, 0.0  ;;  %1712 = vrot.lane.b32.xlu0 %v1642_v33, %s3703_s15  ;;  %3039 = vrot.lane.b32.xlu1 %v2973_v49, %s3698_s8 }
 0x474   : > { %v1881_v50 = vadd.f32 %v1880_v14, %v1879_v10  ;;  %v1514_v38 = vpop.permute.xlu1 %1513  ;;  %v2943_v10 = vsub.f32 0.0, %v5019_v1 }
 0x475   : > { %v1643_v46 = vmul.f32 %v1514_v38, %v1451_v8  ;;  %v1454_v8 = vand.u32 2147483647, %v1422_v6  ;;  %v1455_v38 = vand.u32 2147483647, %v1423_v32  ;;  %v3625_v32 = vld [vmem:[%s3906_s6 + $0x70] sm:$0xff] }
 0x477   : > { %v1882_v34 = vsel %vm1796_vm9, %v1643_v46, 0.0  ;;  %1714 = vrot.lane.b32.xlu0 %v1643_v46, %s3703_s15  ;;  %1710 = vrot.lane.b32.xlu1 %v1641_v60, %s3703_s15  ;;  %v2944_v60 = vsub.f32 0.0, %v5079_v20  ;;  %v3623_v46 = vld [vmem:[%s3906_s6 + $0x60] sm:$0xff] }
 0x478   : > { %v1883_v49 = vadd.f32 %v1882_v34, %v1881_v50  ;;  %v1524_v55 = vpop.permute.xlu1 %1523  ;;  %v2975_v50 = vmul.f32 %v4961_v5, %v2943_v10  ;;  %v2946_v10 = vsub.f32 0.0, %v5087_v27 }
 0x479   : > { %v1645_v33 = vmul.f32 %v1524_v55, %v1453_v44  ;;  %v1424_v44 = vsub.f32 %v3623_v46, %v4994_v40 }
 0x47a   : > { %v1885_v29 = vadd.f32 %v1884_v26, %v1883_v49  ;;  %v2945_v26 = vsub.f32 0.0, %v5025_v57 }
 0x47b   : > { %v1886_v14 = vsel %vm1796_vm9, %v1645_v33, 0.0  ;;  %3041 = vrot.lane.b32.xlu1 %v2974_v59, %s3698_s8  ;;  %1716 = vrot.lane.b32.xlu0 %v1644_v54, %s3703_s15  ;;  %v2976_v54 = vmul.f32 %v4967_v25, %v2944_v60  ;;  %v1456_v5 = vand.u32 2147483647, %v1424_v44  ;;  %v3624_v59 = vld [vmem:[%s3906_s6 + $0x68] sm:$0xff]  ;;  %v2978_v60 = vmul.f32 %v4976_v52, %v2946_v10 }
 0x47c   : > { %v1887_v22 = vadd.f32 %v1886_v14, %v1885_v29  ;;  %v1529_v41 = vpop.permute.xlu1 %1528  ;;  %v1425_v49 = vsub.f32 %v3624_v59, %v4998_v53  ;;  %v1426_v29 = vsub.f32 %v3625_v32, %v5002_v2  ;;  %v2948_v44 = vsub.f32 0.0, %v5091_v3  ;;  %v3628_v10 = vld [vmem:[%s3906_s6 + $0x88] sm:$0xff] }
 0x47d   : > { %v1646_v1 = vmul.f32 %v1529_v41, %v1454_v8  ;;  %v2977_v8 = vmul.f32 %v4971_v30, %v2945_v26  ;;  %v2947_v41 = vsub.f32 0.0, %v5031_v23 }
 0x47e   : > { %v1457_v57 = vand.u32 2147483647, %v1425_v49  ;;  %v1458_v30 = vand.u32 2147483647, %v1426_v29  ;;  %v2949_v49 = vsub.f32 0.0, %v5037_v61  ;;  %v3629_v29 = vld [vmem:[%s3906_s6 + $0x90] sm:$0xff] }
 0x47f   : > { %v1888_v7 = vsel %vm1796_vm9, %v1646_v1, 0.0  ;;  %3043 = vrot.lane.b32.xlu1 %v2975_v50, %s3698_s8  ;;  %1718 = vrot.lane.b32.xlu0 %v1645_v33, %s3703_s15 }
 0x480   : > { %v1889_v6 = vadd.f32 %v1888_v7, %v1887_v22  ;;  %v1534_v20 = vpop.permute.xlu1 %1533 }
 0x481   : > { %v1647_v34 = vmul.f32 %v1534_v20, %v1455_v38  ;;  %v3627_v20 = vld [vmem:[%s3906_s6 + $0x80] sm:$0xff] }
 0x482   : > { %v1428_v26 = vsub.f32 %v3627_v20, %v5012_v62 }
 0x483   : > { %v1890_v55 = vsel %vm1796_vm9, %v1647_v34, 0.0  ;;  %3045 = vrot.lane.b32.xlu1 %v2976_v54, %s3698_s8  ;;  %1720 = vrot.lane.b32.xlu0 %v1646_v1, %s3703_s15  ;;  %v3626_v1 = vld [vmem:[%s3906_s6 + $0x78] sm:$0xff]  ;;  %v2979_v54 = vmul.f32 %v4925_v12, %v2947_v41 }
 0x484   : > { %v1891_v33 = vadd.f32 %v1890_v55, %v1889_v6  ;;  %v1539_v25 = vpop.permute.xlu1 %1538  ;;  %v1427_v38 = vsub.f32 %v3626_v1, %v5006_v31  ;;  %v1460_v12 = vand.u32 2147483647, %v1428_v26 }
 0x485   : > { %v1648_v45 = vmul.f32 %v1539_v25, %v1456_v5  ;;  %v2980_v5 = vmul.f32 %v4981_v58, %v2948_v44  ;;  %v3632_v44 = vld [vmem:[%s3906_s6 + $0xb0] sm:$0xff] }
 0x486   : > { %v1459_v23 = vand.u32 2147483647, %v1427_v38  ;;  %v3631_v38 = vld [vmem:[%s3906_s6 + $0x98] sm:$0xff] }
 0x487   : > { %v1892_v14 = vsel %vm1796_vm9, %v1648_v45, 0.0  ;;  %3047 = vrot.lane.b32.xlu1 %v2977_v8, %s3698_s8  ;;  %1722 = vrot.lane.b32.xlu0 %v1647_v34, %s3703_s15  ;;  %v2950_v8 = vsub.f32 0.0, %v5095_v48  ;;  %v3630_v48 = vld [vmem:[%s3906_s6 + $0xa0] sm:$0xff] }
 0x488   : > { %v1893_v22 = vadd.f32 %v1892_v14, %v1891_v33  ;;  %v1544_v27 = vpop.permute.xlu1 %1543  ;;  %v1429_v33 = vsub.f32 %v3628_v10, %v5016_v35  ;;  %v1430_v14 = vsub.f32 %v3629_v29, %v5022_v11 }
 0x489   : > { %v1649_v50 = vmul.f32 %v1544_v27, %v1457_v57  ;;  %v2981_v57 = vmul.f32 %v4986_v21, %v2949_v49  ;;  %v1432_v27 = vsub.f32 %v3630_v48, %v4929_v24 }
 0x48a   : > { %v1461_v32 = vand.u32 2147483647, %v1429_v33  ;;  %v1462_v1 = vand.u32 2147483647, %v1430_v14 }
 0x48b   : > { %v1894_v46 = vsel %vm1796_vm9, %v1649_v50, 0.0  ;;  %3049 = vrot.lane.b32.xlu1 %v2978_v60, %s3698_s8  ;;  %1724 = vrot.lane.b32.xlu0 %v1648_v45, %s3703_s15 }
 0x48c   : > { %v1895_v7 = vadd.f32 %v1894_v46, %v1893_v22  ;;  %v1549_v52 = vpop.permute.xlu1 %1548  ;;  %v2982_v22 = vmul.f32 %v4990_v39, %v2950_v8  ;;  %v1431_v46 = vsub.f32 %v3631_v38, %v5028_v47  ;;  %v2952_v39 = vsub.f32 0.0, %v5099_v37 }
 0x48d   : > { %v1650_v6 = vmul.f32 %v1549_v52, %v1458_v30  ;;  %v2955_v38 = vsub.f32 0.0, %v5059_v19 }
 0x48e   : > { %v2984_v37 = vmul.f32 %v4998_v53, %v2952_v39 }
 0x48f   : > { %v1896_v34 = vsel %vm1796_vm9, %v1650_v6, 0.0  ;;  %3051 = vrot.lane.b32.xlu1 %v2979_v54, %s3698_s8  ;;  %1726 = vrot.lane.b32.xlu0 %v1649_v50, %s3703_s15  ;;  %v2951_v50 = vsub.f32 0.0, %v5045_v15  ;;  %v1464_v54 = vand.u32 2147483647, %v1432_v27  ;;  %v1579_v15 = vpop.permute.xlu0 %1578 }
 0x490   : > { %v1897_v59 = vadd.f32 %v1896_v34, %v1895_v7  ;;  %v1554_v3 = vpop.permute.xlu1 %1553  ;;  %v1434_v7 = vsub.f32 %v3632_v44, %v4933_v13  ;;  %v1463_v34 = vand.u32 2147483647, %v1431_v46 }
 0x491   : > { %v1651_v55 = vmul.f32 %v1554_v3, %v1459_v23  ;;  %v2983_v20 = vmul.f32 %v4994_v40, %v2951_v50 }
 0x492   : > { %v1466_v3 = vand.u32 2147483647, %v1434_v7 }
 0x493   : > { %v1898_v25 = vsel %vm1796_vm9, %v1651_v55, 0.0  ;;  %3053 = vrot.lane.b32.xlu1 %v2980_v5, %s3698_s8  ;;  %1728 = vrot.lane.b32.xlu0 %v1650_v6, %s3703_s15  ;;  %v3633_v5 = vld [vmem:[%s3906_s6 + $0xa8] sm:$0xff] }
 0x494   : > { %v1899_v58 = vadd.f32 %v1898_v25, %v1897_v59  ;;  %v1559_v45 = vpop.permute.xlu1 %1558  ;;  %v1433_v59 = vsub.f32 %v3633_v5, %v5034_v56  ;;  %v1656_v25 = vmul.f32 %v1579_v15, %v1464_v54  ;;  %v3636_v5 = vld [vmem:[%s3906_s6 + $0xc8] sm:$0xff] }
 0x495   : > { %v1652_v61 = vmul.f32 %v1559_v45, %v1460_v12  ;;  %v3634_v12 = vld [vmem:[%s3906_s6 + $0xc0] sm:$0xff]  ;;  %v3635_v45 = vld [vmem:[%s3906_s6 + $0xb8] sm:$0xff] }
 0x496   : > { %v1436_v40 = vsub.f32 %v3634_v12, %v4941_v28 }
 0x497   : > { %v1900_v60 = vsel %vm1796_vm9, %v1652_v61, 0.0  ;;  %3055 = vrot.lane.b32.xlu1 %v2981_v57, %s3698_s8  ;;  %1730 = vrot.lane.b32.xlu0 %v1651_v55, %s3703_s15  ;;  %v2953_v55 = vsub.f32 0.0, %v5051_v42  ;;  %v1435_v57 = vsub.f32 %v3635_v45, %v5040_v18  ;;  %v2954_v42 = vsub.f32 0.0, %v5105_v63  ;;  %v5577_v45 = vld [vmem:[#allocation9_spill] sm:$0xff] }
 0x498   : > { %v1901_v41 = vadd.f32 %v1900_v60, %v1899_v58  ;;  %v1564_v21 = vpop.permute.xlu1 %1563  ;;  %v1465_v58 = vand.u32 2147483647, %v1433_v59  ;;  %v1468_v29 = vand.u32 2147483647, %v1436_v40  ;;  %v1437_v59 = vsub.f32 %v3636_v5, %v5048_v9  ;;  %v5585_v5 = vld [vmem:[#allocation18_spill] sm:$0xff] }
 0x499   : > { %v1653_v30 = vmul.f32 %v1564_v21, %v1461_v32  ;;  %v2985_v53 = vmul.f32 %v5002_v2, %v2953_v55  ;;  %v5574_v55 = vld [vmem:[#allocation8_spill] sm:$0xff] }
 0x49b   : > { %v1902_v52 = vsel %vm1796_vm9, %v1653_v30, 0.0  ;;  %3057 = vrot.lane.b32.xlu1 %v2982_v22, %s3698_s8  ;;  %1732 = vrot.lane.b32.xlu0 %v1652_v61, %s3703_s15  ;;  %v1589_v61 = vpop.permute.xlu0 %1588  ;;  %v1908_v22 = vsel %vm1796_vm9, %v1656_v25, 0.0 }
 0x49c   : > { %v1903_v6 = vadd.f32 %v1902_v52, %v1901_v41  ;;  %v1569_v23 = vpop.permute.xlu1 %1568  ;;  %v1658_v48 = vmul.f32 %v1589_v61, %v1466_v3  ;;  %v1467_v41 = vand.u32 2147483647, %v1435_v57 }
 0x49d   : > { %v1654_v26 = vmul.f32 %v1569_v23, %v1462_v1 }
 0x49e   : > { %v1912_v46 = vsel %vm1796_vm9, %v1658_v48, 0.0 }
 0x49f   : > { %v1904_v49 = vsel %vm1796_vm9, %v1654_v26, 0.0  ;;  %3059 = vrot.lane.b32.xlu1 %v2983_v20, %s3698_s8  ;;  %1734 = vrot.lane.b32.xlu0 %v1653_v30, %s3703_s15  ;;  %v2986_v30 = vmul.f32 %v5006_v31, %v2954_v42  ;;  %v1599_v2 = vpop.permute.xlu0 %1598  ;;  %v2987_v31 = vmul.f32 %v5012_v62, %v2955_v38 }
 0x4a0   : > { %v1905_v10 = vadd.f32 %v1904_v49, %v1903_v6  ;;  %v1574_v33 = vpop.permute.xlu1 %1573  ;;  %v1660_v44 = vmul.f32 %v1599_v2, %v1468_v29  ;;  %v2956_v6 = vsub.f32 0.0, %v5111_v4  ;;  %v2958_v4 = vsub.f32 0.0, %v5115_v16  ;;  %v5575_v16 = vld [vmem:[#allocation13_spill] sm:$0xff] }
 0x4a1   : > { %v1655_v8 = vmul.f32 %v1574_v33, %v1463_v34  ;;  %v1469_v49 = vand.u32 2147483647, %v1437_v59  ;;  %v5576_v33 = vld [vmem:[#allocation19_spill] sm:$0xff]  ;;  %v2969_v59 = vsub.f32 0.0, %v5585_v5 }
 0x4a2   : > { %v1916_v19 = vsel %vm1796_vm9, %v1660_v44, 0.0  ;;  %v2988_v20 = vmul.f32 %v5016_v35, %v2956_v6  ;;  %v2990_v35 = vmul.f32 %v5028_v47, %v2958_v4 }
 0x4a3   : > { %v1906_v32 = vsel %vm1796_vm9, %v1655_v8, 0.0  ;;  %3061 = vrot.lane.b32.xlu1 %v2984_v37, %s3698_s8  ;;  %1736 = vrot.lane.b32.xlu0 %v1654_v26, %s3703_s15  ;;  %v2957_v26 = vsub.f32 0.0, %v5067_v17  ;;  %v2959_v17 = vsub.f32 0.0, %v5073_v43  ;;  %v3637_v37 = vld [vmem:[%s3906_s6 + $0xd0] sm:$0xff]  ;;  %v3639_v43 = vld [vmem:[%s3906_s6 + $0xe0] sm:$0xff]  ;;  %v1614_v29 = vpop.permute.xlu0 %1613 }
 0x4a4   : > { %v1907_v14 = vadd.f32 %v1906_v32, %v1905_v10  ;;  %v1584_v60 = vpop.permute.xlu1 %1583  ;;  %v1438_v12 = vsub.f32 %v3637_v37, %v5574_v55  ;;  %v1440_v57 = vsub.f32 %v3639_v43, %v5577_v45  ;;  %v5578_v32 = vld [vmem:[#allocation11_spill] sm:$0xff] }
 0x4a5   : > { %v1657_v27 = vmul.f32 %v1584_v60, %v1465_v58  ;;  %v2989_v62 = vmul.f32 %v5022_v11, %v2957_v26  ;;  %v3638_v11 = vld [vmem:[%s3906_s6 + $0xd8] sm:$0xff]  ;;  %v2991_v10 = vmul.f32 %v4929_v24, %v2959_v17  ;;  %v2961_v24 = vsub.f32 0.0, %v5578_v32 }
 0x4a6   : > { %v1909_v21 = vadd.f32 %v1908_v22, %v1907_v14  ;;  %v1439_v40 = vsub.f32 %v3638_v11, %v5575_v16  ;;  %v1470_v47 = vand.u32 2147483647, %v1438_v12  ;;  %v1472_v60 = vand.u32 2147483647, %v1440_v57  ;;  %v5586_v12 = vld [vmem:[#allocation7_spill] sm:$0xff] }
 0x4a7   : > { %v1910_v50 = vsel %vm1796_vm9, %v1657_v27, 0.0  ;;  %3063 = vrot.lane.b32.xlu1 %v2985_v53, %s3698_s8  ;;  %1738 = vrot.lane.b32.xlu0 %v1655_v8, %s3703_s15  ;;  %v2962_v22 = vsub.f32 0.0, %v5130_v36  ;;  %v2968_v11 = vsub.f32 0.0, %v5586_v12 }
 0x4a8   : > { %v1911_v1 = vadd.f32 %v1910_v50, %v1909_v21  ;;  %v1594_v63 = vpop.permute.xlu1 %1593  ;;  %v1471_v53 = vand.u32 2147483647, %v1439_v40  ;;  %v3641_v50 = vld [vmem:[%s3906_s6 + $0xf0] sm:$0xff]  ;;  %v2938_v40 = vpop.xlane.xlu0 %2937 }
 0x4a9   : > { %v1659_v7 = vmul.f32 %v1594_v63, %v1467_v41  ;;  %v5579_v41 = vld [vmem:[#allocation12_spill] sm:$0xff]  ;;  %v5581_v63 = vld [vmem:[#allocation15_spill] sm:$0xff] }
 0x4aa   : > { %v1913_v52 = vadd.f32 %v1912_v46, %v1911_v1  ;;  %v2994_v1 = vmul.f32 %v5040_v18, %v2962_v22  ;;  %v2963_v36 = vsub.f32 0.0, %v5581_v63  ;;  %v5582_v18 = vld [vmem:[#allocation14_spill] sm:$0xff] }
 0x4ab   : > { %v1914_v39 = vsel %vm1796_vm9, %v1659_v7, 0.0  ;;  %3065 = vrot.lane.b32.xlu1 %v2986_v30, %s3698_s8  ;;  %1740 = vrot.lane.b32.xlu0 %v1656_v25, %s3703_s15  ;;  %v2960_v25 = vsub.f32 0.0, %v5576_v33  ;;  %v5580_v30 = vld [vmem:[#allocation10_spill] sm:$0xff] }
 0x4ac   : > { %v1915_v54 = vadd.f32 %v1914_v39, %v1913_v52  ;;  %v1604_v15 = vpop.permute.xlu1 %1603  ;;  %v1442_v2 = vsub.f32 %v3641_v50, %v5580_v30  ;;  %v2995_v52 = vmul.f32 %v4941_v28, %v2963_v36 }
 0x4ad   : > { %v5290_v8 = vmul.f32 %v1604_v15, %v1469_v49  ;;  %v2992_v61 = vmul.f32 %v5034_v56, %v2960_v25  ;;  %v3640_v56 = vld [vmem:[%s3906_s6 + $0xe8] sm:$0xff]  ;;  %v3001_v49 = vmul.f32 %v5580_v30, %v2969_v59 }
 0x4ae   : > { %v5266_v23 = vadd.f32 %v1916_v19, %v1915_v54  ;;  %v1441_v21 = vsub.f32 %v3640_v56, %v5579_v41  ;;  %v3642_v54 = vld [vmem:[%s3906_s6 + $0xf8] sm:$0xff]  ;;  %v5583_v19 = vld [vmem:[#allocation16_spill] sm:$0xff] }
 0x4af   : > { %3067 = vrot.lane.b32.xlu1 %v2987_v31, %s3698_s8  ;;  %1742 = vrot.lane.b32.xlu0 %v1657_v27, %s3703_s15  ;;  %v5306_v27 = vmul.f32 %v1614_v29, %v1471_v53  ;;  %v1443_v15 = vsub.f32 %v3642_v54, %v5582_v18  ;;  %v1918_v56 = vsel %vm1796_vm9, %v5290_v8, 0.0 }
 0x4b0   : > { %v1609_v34 = vpop.permute.xlu1 %1608 }
 0x4b1   : > { %v5299_v42 = vmul.f32 %v1609_v34, %v1470_v47  ;;  %v2970_v47 = vsub.f32 0.0, %v2938_v40  ;;  %v1922_v36 = vsel %vm1796_vm9, %v5306_v27, 0.0 }
 0x4b3   : > { %3069 = vrot.lane.b32.xlu1 %v2988_v20, %s3698_s8  ;;  %1744 = vrot.lane.b32.xlu0 %v1658_v48, %s3703_s15  ;;  %v2993_v48 = vmul.f32 %v4933_v13, %v2961_v24  ;;  %v1473_v13 = vand.u32 2147483647, %v1441_v21  ;;  %v2965_v20 = vsub.f32 0.0, %v5583_v19  ;;  %v1919_v21 = vadd.f32 %v1918_v56, %v5266_v23 }
 0x4b4   : > { %v1619_v3 = vpop.permute.xlu1 %1618 }
 0x4b5   : > { %v5317_v38 = vmul.f32 %v1619_v3, %v1472_v60  ;;  %v2997_v28 = vmul.f32 %v5574_v55, %v2965_v20 }
 0x4b7   : > { %3071 = vrot.lane.b32.xlu1 %v2989_v62, %s3698_s8  ;;  %1746 = vrot.lane.b32.xlu0 %v1659_v7, %s3703_s15  ;;  %v2964_v7 = vsub.f32 0.0, %v5139_v51  ;;  %v1475_v51 = vand.u32 2147483647, %v1443_v15  ;;  %v5584_v62 = vld [vmem:[#allocation17_spill] sm:$0xff] }
 0x4b8   : > { %v1624_v58 = vpop.permute.xlu1 %1623  ;;  %v2966_v4 = vsub.f32 0.0, %v5584_v62 }
 0x4b9   : > { %v5324_v39 = vmul.f32 %v1624_v58, %v1473_v13  ;;  %v2996_v6 = vmul.f32 %v5048_v9, %v2964_v7  ;;  %v2967_v9 = vsub.f32 0.0, %v5151_v0 }
 0x4ba   : > { %v2998_v17 = vmul.f32 %v5575_v16, %v2966_v4  ;;  %v3000_v16 = vmul.f32 %v5579_v41, %v2968_v11  ;;  %v1920_v41 = vsel %vm1796_vm9, %v5299_v42, 0.0 }
 0x4bb   : > { %3073 = vrot.lane.b32.xlu1 %v2990_v35, %s3698_s8  ;;  %1748 = vrot.lane.b32.xlu0 %v1660_v44, %s3703_s15  ;;  %v1474_v44 = vand.u32 2147483647, %v1442_v2  ;;  %v2999_v55 = vmul.f32 %v5577_v45, %v2967_v9  ;;  %v3002_v45 = vmul.f32 %v5582_v18, %v2970_v47  ;;  %v1921_v2 = vadd.f32 %v1920_v41, %v1919_v21 }
 0x4bc   : > { %v1629_v14 = vpop.permute.xlu1 %1628  ;;  %v1926_v23 = vsel %vm1796_vm9, %v5324_v39, 0.0 }
 0x4bd   : > { %v1666_v26 = vmul.f32 %v1629_v14, %v1474_v44  ;;  %v1923_v13 = vadd.f32 %v1922_v36, %v1921_v2 }
 0x4bf   : > { %3075 = vrot.lane.b32.xlu1 %v2991_v10, %s3698_s8  ;;  %1750 = vrot.lane.b32.xlu0 %v5290_v8, %s3703_s15  ;;  %v1928_v7 = vsel %vm1796_vm9, %v1666_v26, 0.0 }
 0x4c0   : > { %v1634_v46 = vpop.permute.xlu1 %1633 }
 0x4c1   : > { %v1667_v3 = vmul.f32 %v1634_v46, %v1475_v51  ;;  %v1924_v46 = vsel %vm1796_vm9, %v5317_v38, 0.0 }
 0x4c3   : > { %3077 = vrot.lane.b32.xlu1 %v2992_v61, %s3698_s8  ;;  %1752 = vrot.lane.b32.xlu0 %v5299_v42, %s3703_s15  ;;  %v1925_v42 = vadd.f32 %v1924_v46, %v1923_v13 }
 0x4c5   : > { %v1927_v54 = vadd.f32 %v1926_v23, %v1925_v42 }
 0x4c7   : > { %3079 = vrot.lane.b32.xlu1 %v2993_v48, %s3698_s8  ;;  %1754 = vrot.lane.b32.xlu0 %v5306_v27, %s3703_s15  ;;  %v1930_v27 = vsel %vm1796_vm9, %v1667_v3, 0.0  ;;  %v1929_v19 = vadd.f32 %v1928_v7, %v1927_v54 }
 0x4c9   : > { %v1931_v51 = vadd.f32 %v1930_v27, %v1929_v19 }
 0x4cb   : > { %3081 = vrot.lane.b32.xlu1 %v2994_v1, %s3698_s8  ;;  %1756 = vrot.lane.b32.xlu0 %v5317_v38, %s3703_s15 }
 0x4cd   : > { %v5328_v31 = vpop.permute.xlu1 %1700 }
 0x4ce   : > { %v1797_v38 = vsel %vm1796_vm9, %v5328_v31, 0.0 }
 0x4cf   : > { %3083 = vrot.lane.b32.xlu1 %v2995_v52, %s3698_s8  ;;  %1758 = vrot.lane.b32.xlu0 %v5324_v39, %s3703_s15 }
 0x4d1   : > { %v1703_v34 = vpop.permute.xlu1 %1702 }
 0x4d2   : > { %v1798_v52 = vsel %vm1796_vm9, %v1703_v34, 0.0 }
 0x4d3   : > { %3085 = vrot.lane.b32.xlu1 %v2996_v6, %s3698_s8  ;;  %1760 = vrot.lane.b32.xlu0 %v1666_v26, %s3703_s15  ;;  %v1799_v20 = vadd.f32 %v1798_v52, %v1797_v38 }
 0x4d5   : > { %v1705_v35 = vpop.permute.xlu1 %1704 }
 0x4d6   : > { %v1800_v6 = vsel %vm1796_vm9, %v1705_v35, 0.0 }
 0x4d7   : > { %3087 = vrot.lane.b32.xlu1 %v2997_v28, %s3698_s8  ;;  %1762 = vrot.lane.b32.xlu0 %v1667_v3, %s3703_s15  ;;  %v1801_v28 = vadd.f32 %v1800_v6, %v1799_v20 }
 0x4d9   : > { %v3036_v37 = vpop.permute.xlu1 %3035  ;;  %v1707_v58 = vpop.permute.xlu0 %1706 }
 0x4da   : > { %v3131_v33 = vsel %vm1339_vm0, %v3036_v37, 0.0  ;;  %v1802_v39 = vsel %vm1796_vm9, %v1707_v58, 0.0 }
 0x4db   : > { %3089 = vrot.lane.b32.xlu1 %v2998_v17, %s3698_s8  ;;  %3095 = vrot.lane.b32.xlu0 %v3001_v49, %s3698_s8  ;;  %v1803_v4 = vadd.f32 %v1802_v39, %v1801_v28 }
 0x4dd   : > { %v3038_v10 = vpop.permute.xlu1 %3037 }
 0x4de   : > { %v3132_v25 = vsel %vm1339_vm0, %v3038_v10, 0.0 }
 0x4df   : > { %v5351_v0 = vadd.f32 %v3132_v25, %v3131_v33  ;;  %3091 = vrot.lane.b32.xlu1 %v2999_v55, %s3698_s8 }
 0x4e1   : > { %v1709_v43 = vpop.permute.xlu1 %1708 }
 0x4e2   : > { %v1804_v62 = vsel %vm1796_vm9, %v1709_v43, 0.0 }
 0x4e3   : > { %3093 = vrot.lane.b32.xlu1 %v3000_v16, %s3698_s8  ;;  %v1805_v59 = vadd.f32 %v1804_v62, %v1803_v4 }
 0x4e5   : > { %v5357_v57 = vpop.permute.xlu1 %3039  ;;  %v1713_v61 = vpop.permute.xlu0 %1712 }
 0x4e6   : > { %v1808_v49 = vsel %vm1796_vm9, %v1713_v61, 0.0 }
 0x4e7   : > { %3097 = vrot.lane.b32.xlu1 %v3002_v45, %s3698_s8  ;;  %v3134_v45 = vsel %vm1339_vm0, %v5357_v57, 0.0 }
 0x4e9   : > { %v1711_v32 = vpop.permute.xlu1 %1710  ;;  %v1715_v24 = vpop.permute.xlu0 %1714 }
 0x4ea   : > { %v1806_v5 = vsel %vm1796_vm9, %v1711_v32, 0.0  ;;  %v1810_v11 = vsel %vm1796_vm9, %v1715_v24, 0.0 }
 0x4eb   : > { %v1807_v9 = vadd.f32 %v1806_v5, %v1805_v59 }
 0x4ed   : > { %v3042_v53 = vpop.permute.xlu1 %3041  ;;  %v1717_v29 = vpop.permute.xlu0 %1716  ;;  %v1809_v37 = vadd.f32 %v1808_v49, %v1807_v9 }
 0x4ee   : > { %v1812_v10 = vsel %vm1796_vm9, %v1717_v29, 0.0  ;;  %v3136_v24 = vsel %vm1339_vm0, %v3042_v53, 0.0  ;;  %v3135_v29 = vadd.f32 %v3134_v45, %v5351_v0 }
 0x4ef   : > { %v1811_v40 = vadd.f32 %v1810_v11, %v1809_v37 }
 0x4f0   : > { %v3137_v13 = vadd.f32 %v3136_v24, %v3135_v29 }
 0x4f1   : > { %v5360_v14 = vpop.permute.xlu1 %3043  ;;  %v1719_v60 = vpop.permute.xlu0 %1718  ;;  %v1813_v16 = vadd.f32 %v1812_v10, %v1811_v40 }
 0x4f2   : > { %v1814_v47 = vsel %vm1796_vm9, %v1719_v60, 0.0  ;;  %v3138_v60 = vsel %vm1339_vm0, %v5360_v14, 0.0 }
 0x4f3   : > { %v1815_v32 = vadd.f32 %v1814_v47, %v1813_v16  ;;  %v3139_v53 = vadd.f32 %v3138_v60, %v3137_v13 }
 0x4f5   : > { %v5362_v22 = vpop.permute.xlu1 %3045  ;;  %v1721_v48 = vpop.permute.xlu0 %1720 }
 0x4f6   : > { %v1816_v61 = vsel %vm1796_vm9, %v1721_v48, 0.0  ;;  %v3140_v57 = vsel %vm1339_vm0, %v5362_v22, 0.0 }
 0x4f7   : > { %v1817_v41 = vadd.f32 %v1816_v61, %v1815_v32  ;;  %v3141_v52 = vadd.f32 %v3140_v57, %v3139_v53 }
 0x4f9   : > { %v5369_v50 = vpop.permute.xlu1 %3047  ;;  %v1723_v30 = vpop.permute.xlu0 %1722 }
 0x4fa   : > { %v1818_v56 = vsel %vm1796_vm9, %v1723_v30, 0.0  ;;  %v3142_v0 = vsel %vm1339_vm0, %v5369_v50, 0.0 }
 0x4fb   : > { %v1819_v46 = vadd.f32 %v1818_v56, %v1817_v41  ;;  %v3143_v27 = vadd.f32 %v3142_v0, %v3141_v52 }
 0x4fd   : > { %v5371_v1 = vpop.permute.xlu1 %3049  ;;  %v1725_v63 = vpop.permute.xlu0 %1724 }
 0x4fe   : > { %v1820_v36 = vsel %vm1796_vm9, %v1725_v63, 0.0  ;;  %v3144_v63 = vsel %vm1339_vm0, %v5371_v1, 0.0 }
 0x4ff   : > { %v1821_v23 = vadd.f32 %v1820_v36, %v1819_v46  ;;  %v3145_v20 = vadd.f32 %v3144_v63, %v3143_v27 }
 0x501   : > { %v5377_v8 = vpop.permute.xlu1 %3051  ;;  %v1727_v44 = vpop.permute.xlu0 %1726 }
 0x502   : > { %v1822_v48 = vsel %vm1796_vm9, %v1727_v44, 0.0  ;;  %v3146_v6 = vsel %vm1339_vm0, %v5377_v8, 0.0 }
 0x503   : > { %v1823_v14 = vadd.f32 %v1822_v48, %v1821_v23 }
 0x505   : > { %v5383_v18 = vpop.permute.xlu1 %3053  ;;  %v1729_v15 = vpop.permute.xlu0 %1728 }
 0x506   : > { %v1824_v7 = vsel %vm1796_vm9, %v1729_v15, 0.0  ;;  %v3148_v15 = vsel %vm1339_vm0, %v5383_v18, 0.0 }
 0x507   : > { %v1825_v22 = vadd.f32 %v1824_v7, %v1823_v14 }
 0x509   : > { %v5390_v26 = vpop.permute.xlu1 %3055  ;;  %v1731_v34 = vpop.permute.xlu0 %1730 }
 0x50a   : > { %v1826_v54 = vsel %vm1796_vm9, %v1731_v34, 0.0  ;;  %v3150_v62 = vsel %vm1339_vm0, %v5390_v26, 0.0 }
 0x50b   : > { %1932 = vadd.xlane.f32.xlu1 %v1931_v51  ;;  %v1827_v50 = vadd.f32 %v1826_v54, %v1825_v22  ;;  %v3147_v51 = vadd.f32 %v3146_v6, %v3145_v20 }
 0x50d   : > { %v3058_v3 = vpop.permute.xlu1 %3057  ;;  %v1733_v31 = vpop.permute.xlu0 %1732  ;;  %v3149_v5 = vadd.f32 %v3148_v15, %v3147_v51 }
 0x50e   : > { %v1828_v19 = vsel %vm1796_vm9, %v1733_v31, 0.0  ;;  %v3152_v59 = vsel %vm1339_vm0, %v3058_v3, 0.0 }
 0x50f   : > { %v1829_v1 = vadd.f32 %v1828_v19, %v1827_v50  ;;  %v3151_v9 = vadd.f32 %v3150_v62, %v3149_v5 }
 0x511   : > { %v5394_v35 = vpop.permute.xlu1 %3059  ;;  %v1735_v17 = vpop.permute.xlu0 %1734  ;;  %v3153_v40 = vadd.f32 %v3152_v59, %v3151_v9 }
 0x512   : > { %v1830_v39 = vsel %vm1796_vm9, %v1735_v17, 0.0  ;;  %v3154_v17 = vsel %vm1339_vm0, %v5394_v35, 0.0 }
 0x513   : > { %v1831_v8 = vadd.f32 %v1830_v39, %v1829_v1  ;;  %v3155_v16 = vadd.f32 %v3154_v17, %v3153_v40 }
 0x515   : > { %v5397_v55 = vpop.permute.xlu1 %3061  ;;  %v1737_v12 = vpop.permute.xlu0 %1736 }
 0x516   : > { %v1832_v4 = vsel %vm1796_vm9, %v1737_v12, 0.0  ;;  %v3156_v26 = vsel %vm1339_vm0, %v5397_v55, 0.0 }
 0x517   : > { %v1833_v49 = vadd.f32 %v1832_v4, %v1831_v8  ;;  %v3157_v32 = vadd.f32 %v3156_v26, %v3155_v16 }
 0x519   : > { %v5401_v33 = vpop.permute.xlu1 %3063  ;;  %v1739_v25 = vpop.permute.xlu0 %1738 }
 0x51a   : > { %v1834_v31 = vsel %vm1796_vm9, %v1739_v25, 0.0  ;;  %v3158_v45 = vsel %vm1339_vm0, %v5401_v33, 0.0 }
 0x51b   : > { %v1835_v10 = vadd.f32 %v1834_v31, %v1833_v49  ;;  %v3159_v56 = vadd.f32 %v3158_v45, %v3157_v32 }
 0x51d   : > { %v5404_v58 = vpop.permute.xlu1 %3065  ;;  %v1741_v43 = vpop.permute.xlu0 %1740 }
 0x51e   : > { %v1836_v11 = vsel %vm1796_vm9, %v1741_v43, 0.0  ;;  %v3160_v43 = vsel %vm1339_vm0, %v5404_v58, 0.0 }
 0x51f   : > { %v1837_v3 = vadd.f32 %v1836_v11, %v1835_v10  ;;  %v3161_v36 = vadd.f32 %v3160_v43, %v3159_v56 }
 0x521   : > { %v3068_v21 = vpop.permute.xlu1 %3067  ;;  %v1743_v2 = vpop.permute.xlu0 %1742 }
 0x522   : > { %v1838_v12 = vsel %vm1796_vm9, %v1743_v2, 0.0  ;;  %v3162_v2 = vsel %vm1339_vm0, %v3068_v21, 0.0 }
 0x523   : > { %v1839_v35 = vadd.f32 %v1838_v12, %v1837_v3  ;;  %v3163_v57 = vadd.f32 %v3162_v2, %v3161_v36 }
 0x525   : > { %v3070_v30 = vpop.permute.xlu1 %3069  ;;  %v1745_v42 = vpop.permute.xlu0 %1744 }
 0x526   : > { %v1840_v61 = vsel %vm1796_vm9, %v1745_v42, 0.0  ;;  %v3164_v33 = vsel %vm1339_vm0, %v3070_v30, 0.0 }
 0x527   : > { %v1841_v55 = vadd.f32 %v1840_v61, %v1839_v35  ;;  %v3165_v0 = vadd.f32 %v3164_v33, %v3163_v57 }
 0x529   : > { %v3072_v38 = vpop.permute.xlu1 %3071  ;;  %v1747_v44 = vpop.permute.xlu0 %1746 }
 0x52a   : > { %v1842_v24 = vsel %vm1796_vm9, %v1747_v44, 0.0  ;;  %v3166_v23 = vsel %vm1339_vm0, %v3072_v38, 0.0 }
 0x52b   : > { %v1843_v13 = vadd.f32 %v1842_v24, %v1841_v55  ;;  %v3167_v14 = vadd.f32 %v3166_v23, %v3165_v0 }
 0x52d   : > { %v3074_v28 = vpop.permute.xlu1 %3073  ;;  %v1749_v34 = vpop.permute.xlu0 %1748 }
 0x52e   : > { %v1844_v60 = vsel %vm1796_vm9, %v1749_v34, 0.0  ;;  %v3168_v21 = vsel %vm1339_vm0, %v3074_v28, 0.0 }
 0x52f   : > { %v1845_v48 = vadd.f32 %v1844_v60, %v1843_v13  ;;  %v3169_v44 = vadd.f32 %v3168_v21, %v3167_v14 }
 0x531   : > { %v3076_v18 = vpop.permute.xlu1 %3075  ;;  %v1751_v37 = vpop.permute.xlu0 %1750 }
 0x532   : > { %v1846_v46 = vsel %vm1796_vm9, %v1751_v37, 0.0  ;;  %v3170_v27 = vsel %vm1339_vm0, %v3076_v18, 0.0 }
 0x533   : > { %v1847_v7 = vadd.f32 %v1846_v46, %v1845_v48  ;;  %v3171_v20 = vadd.f32 %v3170_v27, %v3169_v44  ;;  %v5587_v27 = vlaneseq }
 0x535   : > { %v3078_v47 = vpop.permute.xlu1 %3077  ;;  %v1753_v25 = vpop.permute.xlu0 %1752 }
 0x536   : > { %v1848_v42 = vsel %vm1796_vm9, %v1753_v25, 0.0  ;;  %v3172_v38 = vsel %vm1339_vm0, %v3078_v47, 0.0 }
 0x537   : > { %v1849_v63 = vadd.f32 %v1848_v42, %v1847_v7  ;;  %v3173_v28 = vadd.f32 %v3172_v38, %v3171_v20 }
 0x539   : > { %v3080_v29 = vpop.permute.xlu1 %3079  ;;  %v1755_v41 = vpop.permute.xlu0 %1754 }
 0x53a   : > { %v1850_v52 = vsel %vm1796_vm9, %v1755_v41, 0.0  ;;  %v3174_v51 = vsel %vm1339_vm0, %v3080_v29, 0.0 }
 0x53b   : > { %v1851_v6 = vadd.f32 %v1850_v52, %v1849_v63  ;;  %v3175_v4 = vadd.f32 %v3174_v51, %v3173_v28  ;;  %v3220_v28 = vld [vmem:[#allocation4] sm:$0xff] }
 0x53d   : > { %v3082_v53 = vpop.permute.xlu1 %3081  ;;  %v1757_v58 = vpop.permute.xlu0 %1756 }
 0x53e   : > { %v1852_v22 = vsel %vm1796_vm9, %v1757_v58, 0.0  ;;  %v3176_v62 = vsel %vm1339_vm0, %v3082_v53, 0.0 }
 0x53f   : > { %v1853_v50 = vadd.f32 %v1852_v22, %v1851_v6  ;;  %v3177_v49 = vadd.f32 %v3176_v62, %v3175_v4  ;;  %v3204_v22 = vshrl.u32 %v5587_v27, 7  ;;  %v3206_v6 = vstv %s3345_s17 }
 0x541   : > { %v3084_v54 = vpop.permute.xlu1 %3083  ;;  %v1759_v30 = vpop.permute.xlu0 %1758  ;;  %vm3205_vm12 = vcmp.eq.s32.totalorder %v3204_v22, 0  ;;  %vm3212_vm13 = vcmp.eq.s32.totalorder %v3204_v22, 2  ;;  %vm3216_vm14 = vcmp.eq.s32.totalorder %v3204_v22, 3 }
 0x542   : > { %v1854_v19 = vsel %vm1796_vm9, %v1759_v30, 0.0  ;;  %v3178_v31 = vsel %vm1339_vm0, %v3084_v54, 0.0 }
 0x543   : > { %v1855_v34 = vadd.f32 %v1854_v19, %v1853_v50  ;;  %v3179_v17 = vadd.f32 %v3178_v31, %v3177_v49  ;;  %v3207_v19 = vsel %vm3205_vm12, %v3206_v6, 0.0 }
 0x545   : > { %v3086_v15 = vpop.permute.xlu1 %3085  ;;  %v1761_v39 = vpop.permute.xlu0 %1760 }
 0x546   : > { %v1856_v1 = vsel %vm1796_vm9, %v1761_v39, 0.0  ;;  %v3180_v37 = vsel %vm1339_vm0, %v3086_v15, 0.0 }
 0x547   : > { %v1857_v5 = vadd.f32 %v1856_v1, %v1855_v34  ;;  %v3181_v10 = vadd.f32 %v3180_v37, %v3179_v17 }
 0x549   : > { %v3088_v8 = vpop.permute.xlu1 %3087  ;;  %v1763_v59 = vpop.permute.xlu0 %1762 }
 0x54a   : > { %v1858_v9 = vsel %vm1796_vm9, %v1763_v59, 0.0  ;;  %v3182_v40 = vsel %vm1339_vm0, %v3088_v8, 0.0 }
 0x54b   : > { %v1859_v18 = vadd.f32 %v1858_v9, %v1857_v5  ;;  %v3183_v12 = vadd.f32 %v3182_v40, %v3181_v10 }
 0x54d   : > { %v3090_v11 = vpop.permute.xlu1 %3089  ;;  %1860 = vadd.xlane.f32.xlu0 %v1859_v18  ;;  %v3096_v25 = vpop.permute.xlu0 %3095 }
 0x54e   : > { %v3184_v26 = vsel %vm1339_vm0, %v3090_v11, 0.0  ;;  %v3190_v43 = vsel %vm1339_vm0, %v3096_v25, 0.0 }
 0x54f   : > { %v3185_v47 = vadd.f32 %v3184_v26, %v3183_v12 }
 0x551   : > { %v3092_v16 = vpop.permute.xlu1 %3091 }
 0x552   : > { %v3186_v3 = vsel %vm1339_vm0, %v3092_v16, 0.0 }
 0x553   : > { %v3187_v45 = vadd.f32 %v3186_v3, %v3185_v47 }
 0x555   : > { %v3094_v61 = vpop.permute.xlu1 %3093 }
 0x556   : > { %v3188_v32 = vsel %vm1339_vm0, %v3094_v61, 0.0 }
 0x557   : > { %v3189_v35 = vadd.f32 %v3188_v32, %v3187_v45 }
 0x559   : > { %v3098_v24 = vpop.permute.xlu1 %3097  ;;  %v3191_v56 = vadd.f32 %v3190_v43, %v3189_v35 }
 0x55a   : > { %v3192_v55 = vsel %vm1339_vm0, %v3098_v24, 0.0  ;;  %vm3208_vm0 = vcmp.eq.s32.totalorder %v3204_v22, 1 }
 0x55b   : > { %v3193_v29 = vadd.f32 %v3192_v55, %v3191_v56 }
 0x55d   : > { %3194 = vadd.xlane.f32.xlu0 %v3193_v29 }
 0x598   : > { %v1933_v41 = vpop.xlane.xlu1 %1932 }
 0x599   : > { %v1934_v2 = vrot.slane %v1933_v41, 4 }
 0x59b   : > { %v1935_v60 = vadd.f32 %v1934_v2, %v1933_v41 }
 0x59d   : > { %v1936_v36 = vrot.slane %v1935_v60, 2 }
 0x59f   : > { %v1937_v57 = vadd.f32 %v1936_v36, %v1935_v60 }
 0x5a1   : > { %v1938_v58 = vrot.slane %v1937_v57, 1 }
 0x5a3   : > { %v1939_v0 = vadd.f32 %v1938_v58, %v1937_v57 }
 0x5da   : > { %v1861_v13 = vpop.xlane.xlu0 %1860 }
 0x5db   : > { %v1862_v33 = vrot.slane %v1861_v13, 4 }
 0x5dd   : > { %v1863_v46 = vadd.f32 %v1862_v33, %v1861_v13 }
 0x5df   : > { %v1864_v48 = vrot.slane %v1863_v46, 2 }
 0x5e1   : > { %v1865_v53 = vadd.f32 %v1864_v48, %v1863_v46 }
 0x5e3   : > { %v1866_v23 = vrot.slane %v1865_v53, 1 }
 0x5e5   : > { %v1867_v42 = vadd.f32 %v1866_v23, %v1865_v53 }
 0x5e7   : > { %3346 = vpush %v1867_v42 }
 0x5e8   : > { %3348 = vpush %v1939_v0 }
 0x5ea   : > { %v3195_v7 = vpop.xlane.xlu0 %3194 }
 0x5eb   : > { %v3196_v21 = vrot.slane %v3195_v7, 4 }
 0x5ed   : > { %v3197_v52 = vadd.f32 %v3196_v21, %v3195_v7 }
 0x5ef   : > { %v3198_v14 = vrot.slane %v3197_v52, 2 }
 0x5f1   : > { %v3199_v63 = vadd.f32 %v3198_v14, %v3197_v52 }
 0x5f3   : > { %v3200_v54 = vrot.slane %v3199_v63, 1 }
 0x5f5   : > { %v3201_v30 = vadd.f32 %v3200_v54, %v3199_v63 }
 0x5f7   : > { %3350 = vpush %v3201_v30 }
 0x618   : > { %s3347_s18 = spop %3346 }
 0x619   : > { %v3209_v44 = vstv %s3347_s18  ;;  %s3349_s19 = spop %3348 }
 0x61a   : > { %v3210_v38 = vsel %vm3208_vm0, %v3209_v44, 0.0  ;;  %v3213_v50 = vstv %s3349_s19 }
 0x61b   : > { %v3211_v20 = vadd.f32 %v3210_v38, %v3207_v19  ;;  %v3214_v15 = vsel %vm3212_vm13, %v3213_v50, 0.0 }
 0x61d   : > { %v3215_v39 = vadd.f32 %v3214_v15, %v3211_v20 }
 0x628   : > { %s3351_s20 = spop %3350 }
 0x629   : > { %v3217_v51 = vstv %s3351_s20 }
 0x62a   : > { %v3218_v1 = vsel %vm3216_vm14, %v3217_v51, 0.0 }
 0x62b   : > { %v3219_v34 = vadd.f32 %v3218_v1, %v3215_v39 }
 0x62d   : > { %v3221_v62 = vadd.f32 %v3220_v28, %v3219_v34 }
 0x62f   : > { %3222 = vst [vmem:[#allocation4] sm:$0xff] %v3221_v62 }
 0x630   : > { %3656 = shalt.err (!%p3653_p2)
}
 0x631   : > { %s3657_s12 = scalar_lea.hbm %s5512_s2, 128 }
 0x632   : > { %p3658_p3 = scmp.ne.s32.totalorder %s5512_s2, %s3657_s12  ;;  %p3663_p6 = scmp.lt.u32.totalorder %s3657_s12, %s5512_s2 }
 0x634   : > { %p3659_p4 = pnand %p3658_p3, %p5474_p9 }
 0x636   : > { %p3660_p5 = pneg %p3659_p4 }
 0x638   : > { %p3665_p7 = pnand %p3663_p6, %p3660_p5 }
 0x63a   : > { %3668 = shalt.err (!%p3665_p7)
}
 0x63b   : > { %3353 = dma.vmem_to_hbm [thread:$0]  (%p5474_p9), %s3231_s22, 128, %s5512_s2, [#allocation5]  }
 0x63c   : > { %3682 = dma.done.wait (%p5474_p9), [#allocation5], 128  }
 0x63d   : > { %3684 = vsyncadd (%p5474_p9), [#allocation5], 4294967168 }
 0x63e PF: > { %p10_p8 = scmp.ge.s32.totalorder %s3737_s13, 6   ;;  %s5589_s9 = smov %s3691_s10 }
 0x63f   : > { %s5590_s10 = smov %s3746_s16  ;;  %s5591_s11 = smov %s3737_s13 }
 0x640   :  { %12 = sbr.rel (!%p10_p8) target bundleno = 2 (0x2), region = 148 }
 0x647   :  { %3243 = vsyncpa [#allocation5], 1 }
 0x648   :  { %3245 = vsyncpa [#allocation5 + $0x1], 1 }

</bundles_post_ra>
